<compile_context>
chip_gen: v6e
topology: v6e:2x2x1
jax: 0.10.0
libtpu: 0.0.40
codegen_flags: <defaults>
</compile_context>

<pallas_src>
import jax
import jax.numpy as jnp
from jax import lax
from jax.experimental import pallas as pl
from jax.experimental.pallas import tpu as pltpu


def _round_up(x, m):
    return (x + m - 1) // m * m


def _pick_time_chunk(T, Bp, P):
    """Time-chunk Tc so the f32 xg scratch stays ~<=2 MiB but the input-GEMM
    M-dim (Tc*Bp) stays large enough for good MXU utilization."""
    row_bytes = 4 * P * 4                      # one (4P,) f32 gate row
    max_rows_by_bytes = max(1, (2 << 20) // row_bytes)
    target_rows = max(256, min(1024, max_rows_by_bytes))
    return max(1, min(T, target_rows // max(Bp, 1)))


def _make_encoder_kernel(T, Bp, P, Tc, unroll):
    def kernel(x_ref, wih_ref, whh_ref, b_ref, hid_ref, cell_ref,
               acts_sc, xg_sc):
        """One grid step == one LSTM layer.

        x_ref:    (T, Bp, P)  bf16  padded embedded tokens (same block every step)
        wih_ref:  (P, 4P)     bf16  this layer's input->gate weights
        whh_ref:  (P, 4P)     bf16  this layer's hidden->gate weights
        b_ref:    (1, 4P)     f32   this layer's b_ih + b_hh
        hid_ref:  (Bp, P)     f32   this layer's final hidden state
        cell_ref: (Bp, P)     f32   this layer's final cell state
        acts_sc:  (T, Bp, P)  bf16  inter-layer activations (persist across steps)
        xg_sc:    (Tc, Bp, 4P) f32  time-chunked precomputed input projection
        """

        def run_layer(src_ref):
            h = jnp.zeros((Bp, P), jnp.float32)
            c = jnp.zeros((Bp, P), jnp.float32)

            for t0 in range(0, T, Tc):                 # static chunk loop
                tc_len = min(Tc, T - t0)

                # (1) Input projection for this time-chunk as one MXU GEMM,
                #     bias folded in, f32 accumulation.  Reads src_ref BEFORE
                #     the recurrence below overwrites those acts rows.
                x_chunk = src_ref[t0:t0 + tc_len].reshape(tc_len * Bp, P)
                xg = jnp.dot(x_chunk, wih_ref[...],
                             preferred_element_type=jnp.float32) + b_ref[...]
                xg_sc[0:tc_len] = xg.reshape(tc_len, Bp, 4 * P)

                # (2) Sequential recurrence: only h @ W_hh left per step.
                def step(i, carry, t0=t0):
                    h, c = carry
                    gates = xg_sc[i] + jnp.dot(
                        h.astype(jnp.bfloat16), whh_ref[...],
                        preferred_element_type=jnp.float32)
                    # Gate layout [i | f | o | g]: one fused sigmoid + one tanh.
                    s = jax.nn.sigmoid(gates[:, :3 * P])
                    g_g = jnp.tanh(gates[:, 3 * P:])
                    i_g = s[:, 0 * P:1 * P]
                    f_g = s[:, 1 * P:2 * P]
                    o_g = s[:, 2 * P:3 * P]
                    c_new = f_g * c + i_g * g_g
                    h_new = o_g * jnp.tanh(c_new)
                    # This layer's per-step output is the next layer's input.
                    acts_sc[t0 + i] = h_new.astype(jnp.bfloat16)
                    return (h_new, c_new)

                h, c = lax.fori_loop(0, tc_len, step, (h, c), unroll=unroll)

            hid_ref[...] = h
            cell_ref[...] = c

        l = pl.program_id(0)

        @pl.when(l == 0)
        def _():
            run_layer(x_ref)        # layer 0 reads the embedded input directly

        @pl.when(l != 0)
        def _():
            run_layer(acts_sc)      # deeper layers read the previous layer's acts

    return kernel


def encoder_lstm_pallas(x_pad, wih_all, whh_all, b_all):
    """x_pad: (T, Bp, P) bf16; per-layer weights stacked over L.
    Returns padded (hidden, cell), each (L, Bp, P) float32."""
    T, Bp, P = x_pad.shape
    L = wih_all.shape[0]
    Tc = _pick_time_chunk(T, Bp, P)

    # Unroll the recurrence fully only when the chunk is short and the (h, c)
    # carries are far from the 256 KiB register file; otherwise partial unroll.
    carry_bytes = 2 * Bp * P * 4
    unroll = True if (Tc <= 8 and carry_bytes <= 96 * 1024) else 2

    # Explicit scoped-VMEM budget (+ headroom): scratch + resident/double-buffered
    # blocks.  Defaults (16 MiB v5e / 32 MiB v6e,v7x) are too small at real shapes.
    vmem_bytes = (
        T * Bp * P * 2                      # x (resident, same block every step)
        + T * Bp * P * 2                    # acts scratch (bf16)
        + Tc * Bp * 4 * P * 4               # xg scratch (f32, time-chunked)
        + 2 * 2 * (P * 4 * P * 2)           # W_ih + W_hh blocks, double-buffered
        + 2 * (4 * P * 4)                   # bias blocks, double-buffered
        + 2 * 2 * (Bp * P * 4)              # hid + cell output blocks, dbl-buffered
    )
    vmem_limit = int(min(max(2 * vmem_bytes + (4 << 20), 32 << 20), 100 << 20))

    grid_spec = pltpu.PrefetchScalarGridSpec(
        num_scalar_prefetch=0,
        grid=(L,),
        in_specs=[
            pl.BlockSpec((T, Bp, P), lambda l: (0, 0, 0)),        # x: stays resident
            pl.BlockSpec((None, P, 4 * P), lambda l: (l, 0, 0)),  # W_ih[l]
            pl.BlockSpec((None, P, 4 * P), lambda l: (l, 0, 0)),  # W_hh[l]
            pl.BlockSpec((None, 1, 4 * P), lambda l: (l, 0, 0)),  # bias[l]
        ],
        out_specs=(
            pl.BlockSpec((None, Bp, P), lambda l: (l, 0, 0)),     # hidden[l]
            pl.BlockSpec((None, Bp, P), lambda l: (l, 0, 0)),     # cell[l]
        ),
        scratch_shapes=[
            pltpu.VMEM((T, Bp, P), jnp.bfloat16),       # inter-layer activations
            pltpu.VMEM((Tc, Bp, 4 * P), jnp.float32),   # chunked input projection
        ],
    )

    return pl.pallas_call(
        _make_encoder_kernel(T, Bp, P, Tc, unroll),
        out_shape=(
            jax.ShapeDtypeStruct((L, Bp, P), jnp.float32),
            jax.ShapeDtypeStruct((L, Bp, P), jnp.float32),
        ),
        grid_spec=grid_spec,
        compiler_params=pltpu.CompilerParams(
            dimension_semantics=("arbitrary",),         # layers are sequential
            vmem_limit_bytes=vmem_limit,
        ),
    )(x_pad, wih_all, whh_all, b_all)


def init_encoder_params(key, input_dim, emb_dim, hid_dim, n_layers):
    """Deterministic synthetic parameters mirroring PyTorch shapes."""
    keys = jax.random.split(key, 1 + 4 * n_layers)
    params = {
        "embedding": jax.random.normal(keys[0], (input_dim, emb_dim),
                                       jnp.float32) * 0.1,
        "layers": [],
    }
    for l in range(n_layers):
        in_dim = emb_dim if l == 0 else hid_dim
        k = keys[1 + 4 * l: 1 + 4 * (l + 1)]
        params["layers"].append({
            "w_ih": jax.random.normal(k[0], (4 * hid_dim, in_dim), jnp.float32) * 0.1,
            "w_hh": jax.random.normal(k[1], (4 * hid_dim, hid_dim), jnp.float32) * 0.1,
            "b_ih": jax.random.normal(k[2], (4 * hid_dim,), jnp.float32) * 0.1,
            "b_hh": jax.random.normal(k[3], (4 * hid_dim,), jnp.float32) * 0.1,
        })
    return params


def pack_params_for_kernel(params):
    """One-time packing: pad/stack per-layer LSTM weights into lane-aligned bf16
    tensors with gate column layout [i | f | o | g], and pad+cast the embedding
    table so the per-call gather directly produces bf16 (T, B, P) activations.

    Padded rows/cols are zero, which keeps the padded state columns exactly zero
    through the recurrence."""
    emb = params["embedding"]
    emb_dim = emb.shape[1]
    hid_dim = params["layers"][0]["w_hh"].shape[1]
    H = hid_dim
    P = _round_up(max(emb_dim, hid_dim), 128)
    L = len(params["layers"])

    # Embedding table padded to lane width and cast once.
    emb_pad = jnp.zeros((emb.shape[0], P), jnp.float32).at[:, :emb_dim].set(emb)
    emb_pad = emb_pad.astype(jnp.bfloat16)

    # PyTorch row order is (i, f, g, o); destination column-block order is
    # (i, f, o, g) so the kernel can do one sigmoid over [:3P] and tanh on [3P:].
    gate_dst = {0: 0, 1: 1, 2: 3, 3: 2}

    wih_all = jnp.zeros((L, P, 4 * P), jnp.float32)
    whh_all = jnp.zeros((L, P, 4 * P), jnp.float32)
    b_all = jnp.zeros((L, 1, 4 * P), jnp.float32)
    for l, layer in enumerate(params["layers"]):
        in_dim = layer["w_ih"].shape[1]
        w_ih_t = layer["w_ih"].T            # (in_dim, 4H)
        w_hh_t = layer["w_hh"].T            # (H, 4H)
        bias = layer["b_ih"] + layer["b_hh"]
        for g_src in range(4):
            g = gate_dst[g_src]
            wih_all = wih_all.at[l, :in_dim, g * P:g * P + H].set(
                w_ih_t[:, g_src * H:(g_src + 1) * H])
            whh_all = whh_all.at[l, :H, g * P:g * P + H].set(
                w_hh_t[:, g_src * H:(g_src + 1) * H])
            b_all = b_all.at[l, 0, g * P:g * P + H].set(
                bias[g_src * H:(g_src + 1) * H])

    return (emb_pad,
            wih_all.astype(jnp.bfloat16),
            whh_all.astype(jnp.bfloat16),
            b_all, P)


def encoder_forward(params, src, packed=None):
    """src: (T, B) int32 token ids.  Returns (hidden, cell): (n_layers, B, H).
    Dropout is identity (eval mode); only (hidden, cell) are returned, matching
    the PyTorch module."""
    if packed is None:
        packed = pack_params_for_kernel(params)
    emb_pad, wih_all, whh_all, b_all, P = packed
    hid_dim = params["layers"][0]["w_hh"].shape[1]
    T, B = src.shape
    Bp = _round_up(B, 8)

    # Embedding lookup (gather) on the pre-padded bf16 table -> (T, B, P) bf16.
    embedded = jnp.take(emb_pad, src, axis=0)
    if Bp == B:
        x_pad = embedded
    else:
        x_pad = jnp.zeros((T, Bp, P), jnp.bfloat16).at[:, :B, :].set(embedded)

    hidden_p, cell_p = encoder_lstm_pallas(x_pad, wih_all, whh_all, b_all)
    return hidden_p[:, :B, :hid_dim], cell_p[:, :B, :hid_dim]


def _reference_forward(params, src):
    """Pure-JAX f32 reference (lax.scan) for correctness checking."""
    embedded = jnp.take(params["embedding"], src, axis=0)
    x = embedded
    hiddens, cells = [], []
    for layer in params["layers"]:
        w_ih_t = layer["w_ih"].T
        w_hh_t = layer["w_hh"].T
        bias = (layer["b_ih"] + layer["b_hh"])[None, :]
        H = w_hh_t.shape[0]
        B = x.shape[1]

        def step(carry, x_t, w_ih_t=w_ih_t, w_hh_t=w_hh_t, bias=bias, H=H):
            h, c = carry
            gates = x_t @ w_ih_t + h @ w_hh_t + bias
            i_g = jax.nn.sigmoid(gates[:, 0 * H:1 * H])
            f_g = jax.nn.sigmoid(gates[:, 1 * H:2 * H])
            g_g = jnp.tanh(gates[:, 2 * H:3 * H])
            o_g = jax.nn.sigmoid(gates[:, 3 * H:4 * H])
            c_new = f_g * c + i_g * g_g
            h_new = o_g * jnp.tanh(c_new)
            return (h_new, c_new), h_new

        init = (jnp.zeros((B, H), jnp.float32), jnp.zeros((B, H), jnp.float32))
        (h_t, c_t), outs = lax.scan(step, init, x)
        x = outs
        hiddens.append(h_t)
        cells.append(c_t)
    return jnp.stack(hiddens, 0), jnp.stack(cells, 0)


if __name__ == "__main__":
    # Small shapes consistent with the module.
    input_dim = 50   # vocab size
    emb_dim = 32
    hid_dim = 32
    n_layers = 2
    seq_len = 8
    batch = 8

    key = jax.random.PRNGKey(0)
    pkey, skey = jax.random.split(key)
    params = init_encoder_params(pkey, input_dim, emb_dim, hid_dim, n_layers)
    src = jax.random.randint(skey, (seq_len, batch), 0, input_dim, jnp.int32)

    hidden, cell = encoder_forward(params, src)
    hidden = jax.block_until_ready(hidden)
    cell = jax.block_until_ready(cell)

    # Sanity-check against pure-JAX f32 reference (kernel matmuls use bf16
    # operands with f32 accumulation, so tolerance is loosened accordingly).
    h_ref, c_ref = _reference_forward(params, src)
    assert hidden.shape == (n_layers, batch, hid_dim)
    assert cell.shape == (n_layers, batch, hid_dim)
    assert jnp.allclose(hidden, h_ref, atol=2e-2, rtol=2e-2)
    assert jnp.allclose(cell, c_ref, atol=2e-2, rtol=2e-2)

    print("KERNEL_OK")
</pallas_src>

<mosaic_0001>
module attributes {stable_mosaic.version = 11 : i64} {
  func.func @kernel(%arg0: i32, %arg1: memref<8x8x128xbf16, #tpu.memory_space<vmem>>, %arg2: memref<1x128x512xbf16, #tpu.memory_space<vmem>>, %arg3: memref<1x128x512xbf16, #tpu.memory_space<vmem>>, %arg4: memref<1x1x512xf32, #tpu.memory_space<vmem>>, %arg5: memref<1x8x128xf32, #tpu.memory_space<vmem>>, %arg6: memref<1x8x128xf32, #tpu.memory_space<vmem>>, %arg7: memref<8x8x128xbf16, #tpu.memory_space<vmem>>, %arg8: memref<8x8x512xf32, #tpu.memory_space<vmem>>) attributes {dimension_semantics = [#tpu.dimension_semantics<arbitrary>], iteration_bounds = array<i64: 2>, scalar_prefetch = 0 : i64, scratch_operands = 2 : i64, tpu.core_type = #tpu.core_type<tc>, window_params = [{pipeline_mode = #tpu.pipeline_mode<synchronous>, transform_indices = @transform_0, window_bounds = array<i64: 8, 8, 128>}, {transform_indices = @transform_1, window_bounds = array<i64: 1, 128, 512>}, {transform_indices = @transform_2, window_bounds = array<i64: 1, 128, 512>}, {transform_indices = @transform_3, window_bounds = array<i64: 1, 1, 512>}, {transform_indices = @transform_4, window_bounds = array<i64: 1, 8, 128>}, {transform_indices = @transform_5, window_bounds = array<i64: 1, 8, 128>}]} {
    %c0_i32 = arith.constant 0 : i32
    %0 = arith.cmpi eq, %arg0, %c0_i32 : i32
    %1 = arith.extui %0 : i1 to i32
    %c0_i32_0 = arith.constant 0 : i32
    %2 = arith.cmpi ne, %1, %c0_i32_0 : i32
    scf.if %2 {
      %cst = arith.constant 0.000000e+00 : f32
      %6 = vector.broadcast %cst : f32 to vector<8x128xf32>
      %cst_3 = arith.constant 0.000000e+00 : f32
      %7 = vector.broadcast %cst_3 : f32 to vector<8x128xf32>
      %c0 = arith.constant 0 : index
      %c0_4 = arith.constant 0 : index
      %c0_5 = arith.constant 0 : index
      %8 = vector.load %arg1[%c0, %c0_4, %c0_5] : memref<8x8x128xbf16, #tpu.memory_space<vmem>>, vector<8x8x128xbf16>
      %9 = vector.shape_cast %8 : vector<8x8x128xbf16> to vector<64x128xbf16>
      %c0_6 = arith.constant 0 : index
      %c0_7 = arith.constant 0 : index
      %c0_8 = arith.constant 0 : index
      %10 = vector.load %arg2[%c0_6, %c0_7, %c0_8] : memref<1x128x512xbf16, #tpu.memory_space<vmem>>, vector<1x128x512xbf16>
      %11 = vector.shape_cast %10 : vector<1x128x512xbf16> to vector<128x512xbf16>
      %cst_9 = arith.constant dense<0.000000e+00> : vector<64x512xf32>
      %12 = tpu.matmul %9, %11, %cst_9 {dimension_numbers = #tpu.dot_dimension_numbers<[1], [0], [0], [1], [0, 0, 1, 1], [], []>} : vector<64x128xbf16>, vector<128x512xbf16>, vector<64x512xf32> -> vector<64x512xf32>
      %c0_10 = arith.constant 0 : index
      %c0_11 = arith.constant 0 : index
      %c0_12 = arith.constant 0 : index
      %13 = vector.load %arg4[%c0_10, %c0_11, %c0_12] : memref<1x1x512xf32, #tpu.memory_space<vmem>>, vector<1x1x512xf32>
      %14 = vector.shape_cast %13 : vector<1x1x512xf32> to vector<1x512xf32>
      %15 = vector.broadcast %14 : vector<1x512xf32> to vector<64x512xf32>
      %16 = arith.addf %12, %15 : vector<64x512xf32>
      %17 = vector.shape_cast %16 : vector<64x512xf32> to vector<8x8x512xf32>
      %c0_13 = arith.constant 0 : index
      %c0_14 = arith.constant 0 : index
      %c0_15 = arith.constant 0 : index
      %18 = vector.load %arg8[%c0_13, %c0_14, %c0_15] : memref<8x8x512xf32, #tpu.memory_space<vmem>>, vector<8x8x512xf32>
      tpu.vector_store %arg8[%c0_13, %c0_14, %c0_15], %17 {strides = array<i32>} : memref<8x8x512xf32, #tpu.memory_space<vmem>>, vector<8x8x512xf32>,
      %c0_i32_16 = arith.constant 0 : i32
      %19 = arith.index_cast %c0_i32_16 : i32 to index
      %c0_17 = arith.constant 0 : index
      %c0_18 = arith.constant 0 : index
      %20 = vector.load %arg8[%19, %c0_17, %c0_18] : memref<8x8x512xf32, #tpu.memory_space<vmem>>, vector<1x8x512xf32>
      %21 = vector.shape_cast %20 : vector<1x8x512xf32> to vector<8x512xf32>
      %22 = arith.truncf %6 : vector<8x128xf32> to vector<8x128xbf16>
      %c0_19 = arith.constant 0 : index
      %c0_20 = arith.constant 0 : index
      %c0_21 = arith.constant 0 : index
      %23 = vector.load %arg3[%c0_19, %c0_20, %c0_21] : memref<1x128x512xbf16, #tpu.memory_space<vmem>>, vector<1x128x512xbf16>
      %24 = vector.shape_cast %23 : vector<1x128x512xbf16> to vector<128x512xbf16>
      %cst_22 = arith.constant dense<0.000000e+00> : vector<8x512xf32>
      %25 = tpu.matmul %22, %24, %cst_22 {dimension_numbers = #tpu.dot_dimension_numbers<[1], [0], [0], [1], [0, 0, 1, 1], [], []>} : vector<8x128xbf16>, vector<128x512xbf16>, vector<8x512xf32> -> vector<8x512xf32>
      %26 = arith.addf %21, %25 : vector<8x512xf32>
      %27 = vector.extract_strided_slice %26 {offsets = [0, 0], sizes = [8, 384], strides = [1, 1]} : vector<8x512xf32> to vector<8x384xf32>
      %28 = arith.negf %27 : vector<8x384xf32>
      %29 = math.exp %28 : vector<8x384xf32>
      %cst_23 = arith.constant 1.000000e+00 : f32
      %30 = vector.broadcast %cst_23 : f32 to vector<8x384xf32>
      %31 = arith.addf %30, %29 : vector<8x384xf32>
      %32 = arith.divf %30, %31 : vector<8x384xf32>
      %33 = vector.extract_strided_slice %26 {offsets = [0, 384], sizes = [8, 128], strides = [1, 1]} : vector<8x512xf32> to vector<8x128xf32>
      %34 = math.tanh %33 : vector<8x128xf32>
      %35 = vector.extract_strided_slice %32 {offsets = [0, 0], sizes = [8, 128], strides = [1, 1]} : vector<8x384xf32> to vector<8x128xf32>
      %36 = vector.extract_strided_slice %32 {offsets = [0, 128], sizes = [8, 128], strides = [1, 1]} : vector<8x384xf32> to vector<8x128xf32>
      %37 = vector.extract_strided_slice %32 {offsets = [0, 256], sizes = [8, 128], strides = [1, 1]} : vector<8x384xf32> to vector<8x128xf32>
      %38 = arith.mulf %36, %7 : vector<8x128xf32>
      %39 = arith.mulf %35, %34 : vector<8x128xf32>
      %40 = arith.addf %38, %39 : vector<8x128xf32>
      %41 = math.tanh %40 : vector<8x128xf32>
      %42 = arith.mulf %37, %41 : vector<8x128xf32>
      %43 = arith.truncf %42 : vector<8x128xf32> to vector<8x128xbf16>
      %c0_i32_24 = arith.constant 0 : i32
      %44 = arith.addi %c0_i32_24, %c0_i32_16 : i32
      %45 = arith.index_cast %44 : i32 to index
      %c0_25 = arith.constant 0 : index
      %c0_26 = arith.constant 0 : index
      %46 = vector.load %arg7[%45, %c0_25, %c0_26] : memref<8x8x128xbf16, #tpu.memory_space<vmem>>, vector<1x8x128xbf16>
      %47 = vector.shape_cast %46 : vector<1x8x128xbf16> to vector<8x128xbf16>
      %48 = vector.shape_cast %43 : vector<8x128xbf16> to vector<1x8x128xbf16>
      tpu.vector_store %arg7[%45, %c0_25, %c0_26], %48 {strides = array<i32>} : memref<8x8x128xbf16, #tpu.memory_space<vmem>>, vector<1x8x128xbf16>,
      %c1_i32 = arith.constant 1 : i32
      %49 = arith.index_cast %c1_i32 : i32 to index
      %c0_27 = arith.constant 0 : index
      %c0_28 = arith.constant 0 : index
      %50 = vector.load %arg8[%49, %c0_27, %c0_28] : memref<8x8x512xf32, #tpu.memory_space<vmem>>, vector<1x8x512xf32>
      %51 = vector.shape_cast %50 : vector<1x8x512xf32> to vector<8x512xf32>
      %52 = arith.truncf %42 : vector<8x128xf32> to vector<8x128xbf16>
      %c0_29 = arith.constant 0 : index
      %c0_30 = arith.constant 0 : index
      %c0_31 = arith.constant 0 : index
      %53 = vector.load %arg3[%c0_29, %c0_30, %c0_31] : memref<1x128x512xbf16, #tpu.memory_space<vmem>>, vector<1x128x512xbf16>
      %54 = vector.shape_cast %53 : vector<1x128x512xbf16> to vector<128x512xbf16>
      %cst_32 = arith.constant dense<0.000000e+00> : vector<8x512xf32>
      %55 = tpu.matmul %52, %54, %cst_32 {dimension_numbers = #tpu.dot_dimension_numbers<[1], [0], [0], [1], [0, 0, 1, 1], [], []>} : vector<8x128xbf16>, vector<128x512xbf16>, vector<8x512xf32> -> vector<8x512xf32>
      %56 = arith.addf %51, %55 : vector<8x512xf32>
      %57 = vector.extract_strided_slice %56 {offsets = [0, 0], sizes = [8, 384], strides = [1, 1]} : vector<8x512xf32> to vector<8x384xf32>
      %58 = arith.negf %57 : vector<8x384xf32>
      %59 = math.exp %58 : vector<8x384xf32>
      %cst_33 = arith.constant 1.000000e+00 : f32
      %60 = vector.broadcast %cst_33 : f32 to vector<8x384xf32>
      %61 = arith.addf %60, %59 : vector<8x384xf32>
      %62 = arith.divf %60, %61 : vector<8x384xf32>
      %63 = vector.extract_strided_slice %56 {offsets = [0, 384], sizes = [8, 128], strides = [1, 1]} : vector<8x512xf32> to vector<8x128xf32>
      %64 = math.tanh %63 : vector<8x128xf32>
      %65 = vector.extract_strided_slice %62 {offsets = [0, 0], sizes = [8, 128], strides = [1, 1]} : vector<8x384xf32> to vector<8x128xf32>
      %66 = vector.extract_strided_slice %62 {offsets = [0, 128], sizes = [8, 128], strides = [1, 1]} : vector<8x384xf32> to vector<8x128xf32>
      %67 = vector.extract_strided_slice %62 {offsets = [0, 256], sizes = [8, 128], strides = [1, 1]} : vector<8x384xf32> to vector<8x128xf32>
      %68 = arith.mulf %66, %40 : vector<8x128xf32>
      %69 = arith.mulf %65, %64 : vector<8x128xf32>
      %70 = arith.addf %68, %69 : vector<8x128xf32>
      %71 = math.tanh %70 : vector<8x128xf32>
      %72 = arith.mulf %67, %71 : vector<8x128xf32>
      %73 = arith.truncf %72 : vector<8x128xf32> to vector<8x128xbf16>
      %c0_i32_34 = arith.constant 0 : i32
      %74 = arith.addi %c0_i32_34, %c1_i32 : i32
      %75 = arith.index_cast %74 : i32 to index
      %c0_35 = arith.constant 0 : index
      %c0_36 = arith.constant 0 : index
      %76 = vector.load %arg7[%75, %c0_35, %c0_36] : memref<8x8x128xbf16, #tpu.memory_space<vmem>>, vector<1x8x128xbf16>
      %77 = vector.shape_cast %76 : vector<1x8x128xbf16> to vector<8x128xbf16>
      %78 = vector.shape_cast %73 : vector<8x128xbf16> to vector<1x8x128xbf16>
      tpu.vector_store %arg7[%75, %c0_35, %c0_36], %78 {strides = array<i32>} : memref<8x8x128xbf16, #tpu.memory_space<vmem>>, vector<1x8x128xbf16>,
      %c2_i32 = arith.constant 2 : i32
      %79 = arith.index_cast %c2_i32 : i32 to index
      %c0_37 = arith.constant 0 : index
      %c0_38 = arith.constant 0 : index
      %80 = vector.load %arg8[%79, %c0_37, %c0_38] : memref<8x8x512xf32, #tpu.memory_space<vmem>>, vector<1x8x512xf32>
      %81 = vector.shape_cast %80 : vector<1x8x512xf32> to vector<8x512xf32>
      %82 = arith.truncf %72 : vector<8x128xf32> to vector<8x128xbf16>
      %c0_39 = arith.constant 0 : index
      %c0_40 = arith.constant 0 : index
      %c0_41 = arith.constant 0 : index
      %83 = vector.load %arg3[%c0_39, %c0_40, %c0_41] : memref<1x128x512xbf16, #tpu.memory_space<vmem>>, vector<1x128x512xbf16>
      %84 = vector.shape_cast %83 : vector<1x128x512xbf16> to vector<128x512xbf16>
      %cst_42 = arith.constant dense<0.000000e+00> : vector<8x512xf32>
      %85 = tpu.matmul %82, %84, %cst_42 {dimension_numbers = #tpu.dot_dimension_numbers<[1], [0], [0], [1], [0, 0, 1, 1], [], []>} : vector<8x128xbf16>, vector<128x512xbf16>, vector<8x512xf32> -> vector<8x512xf32>
      %86 = arith.addf %81, %85 : vector<8x512xf32>
      %87 = vector.extract_strided_slice %86 {offsets = [0, 0], sizes = [8, 384], strides = [1, 1]} : vector<8x512xf32> to vector<8x384xf32>
      %88 = arith.negf %87 : vector<8x384xf32>
      %89 = math.exp %88 : vector<8x384xf32>
      %cst_43 = arith.constant 1.000000e+00 : f32
      %90 = vector.broadcast %cst_43 : f32 to vector<8x384xf32>
      %91 = arith.addf %90, %89 : vector<8x384xf32>
      %92 = arith.divf %90, %91 : vector<8x384xf32>
      %93 = vector.extract_strided_slice %86 {offsets = [0, 384], sizes = [8, 128], strides = [1, 1]} : vector<8x512xf32> to vector<8x128xf32>
      %94 = math.tanh %93 : vector<8x128xf32>
      %95 = vector.extract_strided_slice %92 {offsets = [0, 0], sizes = [8, 128], strides = [1, 1]} : vector<8x384xf32> to vector<8x128xf32>
      %96 = vector.extract_strided_slice %92 {offsets = [0, 128], sizes = [8, 128], strides = [1, 1]} : vector<8x384xf32> to vector<8x128xf32>
      %97 = vector.extract_strided_slice %92 {offsets = [0, 256], sizes = [8, 128], strides = [1, 1]} : vector<8x384xf32> to vector<8x128xf32>
      %98 = arith.mulf %96, %70 : vector<8x128xf32>
      %99 = arith.mulf %95, %94 : vector<8x128xf32>
      %100 = arith.addf %98, %99 : vector<8x128xf32>
      %101 = math.tanh %100 : vector<8x128xf32>
      %102 = arith.mulf %97, %101 : vector<8x128xf32>
      %103 = arith.truncf %102 : vector<8x128xf32> to vector<8x128xbf16>
      %c0_i32_44 = arith.constant 0 : i32
      %104 = arith.addi %c0_i32_44, %c2_i32 : i32
      %105 = arith.index_cast %104 : i32 to index
      %c0_45 = arith.constant 0 : index
      %c0_46 = arith.constant 0 : index
      %106 = vector.load %arg7[%105, %c0_45, %c0_46] : memref<8x8x128xbf16, #tpu.memory_space<vmem>>, vector<1x8x128xbf16>
      %107 = vector.shape_cast %106 : vector<1x8x128xbf16> to vector<8x128xbf16>
      %108 = vector.shape_cast %103 : vector<8x128xbf16> to vector<1x8x128xbf16>
      tpu.vector_store %arg7[%105, %c0_45, %c0_46], %108 {strides = array<i32>} : memref<8x8x128xbf16, #tpu.memory_space<vmem>>, vector<1x8x128xbf16>,
      %c3_i32 = arith.constant 3 : i32
      %109 = arith.index_cast %c3_i32 : i32 to index
      %c0_47 = arith.constant 0 : index
      %c0_48 = arith.constant 0 : index
      %110 = vector.load %arg8[%109, %c0_47, %c0_48] : memref<8x8x512xf32, #tpu.memory_space<vmem>>, vector<1x8x512xf32>
      %111 = vector.shape_cast %110 : vector<1x8x512xf32> to vector<8x512xf32>
      %112 = arith.truncf %102 : vector<8x128xf32> to vector<8x128xbf16>
      %c0_49 = arith.constant 0 : index
      %c0_50 = arith.constant 0 : index
      %c0_51 = arith.constant 0 : index
      %113 = vector.load %arg3[%c0_49, %c0_50, %c0_51] : memref<1x128x512xbf16, #tpu.memory_space<vmem>>, vector<1x128x512xbf16>
      %114 = vector.shape_cast %113 : vector<1x128x512xbf16> to vector<128x512xbf16>
      %cst_52 = arith.constant dense<0.000000e+00> : vector<8x512xf32>
      %115 = tpu.matmul %112, %114, %cst_52 {dimension_numbers = #tpu.dot_dimension_numbers<[1], [0], [0], [1], [0, 0, 1, 1], [], []>} : vector<8x128xbf16>, vector<128x512xbf16>, vector<8x512xf32> -> vector<8x512xf32>
      %116 = arith.addf %111, %115 : vector<8x512xf32>
      %117 = vector.extract_strided_slice %116 {offsets = [0, 0], sizes = [8, 384], strides = [1, 1]} : vector<8x512xf32> to vector<8x384xf32>
      %118 = arith.negf %117 : vector<8x384xf32>
      %119 = math.exp %118 : vector<8x384xf32>
      %cst_53 = arith.constant 1.000000e+00 : f32
      %120 = vector.broadcast %cst_53 : f32 to vector<8x384xf32>
      %121 = arith.addf %120, %119 : vector<8x384xf32>
      %122 = arith.divf %120, %121 : vector<8x384xf32>
      %123 = vector.extract_strided_slice %116 {offsets = [0, 384], sizes = [8, 128], strides = [1, 1]} : vector<8x512xf32> to vector<8x128xf32>
      %124 = math.tanh %123 : vector<8x128xf32>
      %125 = vector.extract_strided_slice %122 {offsets = [0, 0], sizes = [8, 128], strides = [1, 1]} : vector<8x384xf32> to vector<8x128xf32>
      %126 = vector.extract_strided_slice %122 {offsets = [0, 128], sizes = [8, 128], strides = [1, 1]} : vector<8x384xf32> to vector<8x128xf32>
      %127 = vector.extract_strided_slice %122 {offsets = [0, 256], sizes = [8, 128], strides = [1, 1]} : vector<8x384xf32> to vector<8x128xf32>
      %128 = arith.mulf %126, %100 : vector<8x128xf32>
      %129 = arith.mulf %125, %124 : vector<8x128xf32>
      %130 = arith.addf %128, %129 : vector<8x128xf32>
      %131 = math.tanh %130 : vector<8x128xf32>
      %132 = arith.mulf %127, %131 : vector<8x128xf32>
      %133 = arith.truncf %132 : vector<8x128xf32> to vector<8x128xbf16>
      %c0_i32_54 = arith.constant 0 : i32
      %134 = arith.addi %c0_i32_54, %c3_i32 : i32
      %135 = arith.index_cast %134 : i32 to index
      %c0_55 = arith.constant 0 : index
      %c0_56 = arith.constant 0 : index
      %136 = vector.load %arg7[%135, %c0_55, %c0_56] : memref<8x8x128xbf16, #tpu.memory_space<vmem>>, vector<1x8x128xbf16>
      %137 = vector.shape_cast %136 : vector<1x8x128xbf16> to vector<8x128xbf16>
      %138 = vector.shape_cast %133 : vector<8x128xbf16> to vector<1x8x128xbf16>
      tpu.vector_store %arg7[%135, %c0_55, %c0_56], %138 {strides = array<i32>} : memref<8x8x128xbf16, #tpu.memory_space<vmem>>, vector<1x8x128xbf16>,
      %c4_i32 = arith.constant 4 : i32
      %139 = arith.index_cast %c4_i32 : i32 to index
      %c0_57 = arith.constant 0 : index
      %c0_58 = arith.constant 0 : index
      %140 = vector.load %arg8[%139, %c0_57, %c0_58] : memref<8x8x512xf32, #tpu.memory_space<vmem>>, vector<1x8x512xf32>
      %141 = vector.shape_cast %140 : vector<1x8x512xf32> to vector<8x512xf32>
      %142 = arith.truncf %132 : vector<8x128xf32> to vector<8x128xbf16>
      %c0_59 = arith.constant 0 : index
      %c0_60 = arith.constant 0 : index
      %c0_61 = arith.constant 0 : index
      %143 = vector.load %arg3[%c0_59, %c0_60, %c0_61] : memref<1x128x512xbf16, #tpu.memory_space<vmem>>, vector<1x128x512xbf16>
      %144 = vector.shape_cast %143 : vector<1x128x512xbf16> to vector<128x512xbf16>
      %cst_62 = arith.constant dense<0.000000e+00> : vector<8x512xf32>
      %145 = tpu.matmul %142, %144, %cst_62 {dimension_numbers = #tpu.dot_dimension_numbers<[1], [0], [0], [1], [0, 0, 1, 1], [], []>} : vector<8x128xbf16>, vector<128x512xbf16>, vector<8x512xf32> -> vector<8x512xf32>
      %146 = arith.addf %141, %145 : vector<8x512xf32>
      %147 = vector.extract_strided_slice %146 {offsets = [0, 0], sizes = [8, 384], strides = [1, 1]} : vector<8x512xf32> to vector<8x384xf32>
      %148 = arith.negf %147 : vector<8x384xf32>
      %149 = math.exp %148 : vector<8x384xf32>
      %cst_63 = arith.constant 1.000000e+00 : f32
      %150 = vector.broadcast %cst_63 : f32 to vector<8x384xf32>
      %151 = arith.addf %150, %149 : vector<8x384xf32>
      %152 = arith.divf %150, %151 : vector<8x384xf32>
      %153 = vector.extract_strided_slice %146 {offsets = [0, 384], sizes = [8, 128], strides = [1, 1]} : vector<8x512xf32> to vector<8x128xf32>
      %154 = math.tanh %153 : vector<8x128xf32>
      %155 = vector.extract_strided_slice %152 {offsets = [0, 0], sizes = [8, 128], strides = [1, 1]} : vector<8x384xf32> to vector<8x128xf32>
      %156 = vector.extract_strided_slice %152 {offsets = [0, 128], sizes = [8, 128], strides = [1, 1]} : vector<8x384xf32> to vector<8x128xf32>
      %157 = vector.extract_strided_slice %152 {offsets = [0, 256], sizes = [8, 128], strides = [1, 1]} : vector<8x384xf32> to vector<8x128xf32>
      %158 = arith.mulf %156, %130 : vector<8x128xf32>
      %159 = arith.mulf %155, %154 : vector<8x128xf32>
      %160 = arith.addf %158, %159 : vector<8x128xf32>
      %161 = math.tanh %160 : vector<8x128xf32>
      %162 = arith.mulf %157, %161 : vector<8x128xf32>
      %163 = arith.truncf %162 : vector<8x128xf32> to vector<8x128xbf16>
      %c0_i32_64 = arith.constant 0 : i32
      %164 = arith.addi %c0_i32_64, %c4_i32 : i32
      %165 = arith.index_cast %164 : i32 to index
      %c0_65 = arith.constant 0 : index
      %c0_66 = arith.constant 0 : index
      %166 = vector.load %arg7[%165, %c0_65, %c0_66] : memref<8x8x128xbf16, #tpu.memory_space<vmem>>, vector<1x8x128xbf16>
      %167 = vector.shape_cast %166 : vector<1x8x128xbf16> to vector<8x128xbf16>
      %168 = vector.shape_cast %163 : vector<8x128xbf16> to vector<1x8x128xbf16>
      tpu.vector_store %arg7[%165, %c0_65, %c0_66], %168 {strides = array<i32>} : memref<8x8x128xbf16, #tpu.memory_space<vmem>>, vector<1x8x128xbf16>,
      %c5_i32 = arith.constant 5 : i32
      %169 = arith.index_cast %c5_i32 : i32 to index
      %c0_67 = arith.constant 0 : index
      %c0_68 = arith.constant 0 : index
      %170 = vector.load %arg8[%169, %c0_67, %c0_68] : memref<8x8x512xf32, #tpu.memory_space<vmem>>, vector<1x8x512xf32>
      %171 = vector.shape_cast %170 : vector<1x8x512xf32> to vector<8x512xf32>
      %172 = arith.truncf %162 : vector<8x128xf32> to vector<8x128xbf16>
      %c0_69 = arith.constant 0 : index
      %c0_70 = arith.constant 0 : index
      %c0_71 = arith.constant 0 : index
      %173 = vector.load %arg3[%c0_69, %c0_70, %c0_71] : memref<1x128x512xbf16, #tpu.memory_space<vmem>>, vector<1x128x512xbf16>
      %174 = vector.shape_cast %173 : vector<1x128x512xbf16> to vector<128x512xbf16>
      %cst_72 = arith.constant dense<0.000000e+00> : vector<8x512xf32>
      %175 = tpu.matmul %172, %174, %cst_72 {dimension_numbers = #tpu.dot_dimension_numbers<[1], [0], [0], [1], [0, 0, 1, 1], [], []>} : vector<8x128xbf16>, vector<128x512xbf16>, vector<8x512xf32> -> vector<8x512xf32>
      %176 = arith.addf %171, %175 : vector<8x512xf32>
      %177 = vector.extract_strided_slice %176 {offsets = [0, 0], sizes = [8, 384], strides = [1, 1]} : vector<8x512xf32> to vector<8x384xf32>
      %178 = arith.negf %177 : vector<8x384xf32>
      %179 = math.exp %178 : vector<8x384xf32>
      %cst_73 = arith.constant 1.000000e+00 : f32
      %180 = vector.broadcast %cst_73 : f32 to vector<8x384xf32>
      %181 = arith.addf %180, %179 : vector<8x384xf32>
      %182 = arith.divf %180, %181 : vector<8x384xf32>
      %183 = vector.extract_strided_slice %176 {offsets = [0, 384], sizes = [8, 128], strides = [1, 1]} : vector<8x512xf32> to vector<8x128xf32>
      %184 = math.tanh %183 : vector<8x128xf32>
      %185 = vector.extract_strided_slice %182 {offsets = [0, 0], sizes = [8, 128], strides = [1, 1]} : vector<8x384xf32> to vector<8x128xf32>
      %186 = vector.extract_strided_slice %182 {offsets = [0, 128], sizes = [8, 128], strides = [1, 1]} : vector<8x384xf32> to vector<8x128xf32>
      %187 = vector.extract_strided_slice %182 {offsets = [0, 256], sizes = [8, 128], strides = [1, 1]} : vector<8x384xf32> to vector<8x128xf32>
      %188 = arith.mulf %186, %160 : vector<8x128xf32>
      %189 = arith.mulf %185, %184 : vector<8x128xf32>
      %190 = arith.addf %188, %189 : vector<8x128xf32>
      %191 = math.tanh %190 : vector<8x128xf32>
      %192 = arith.mulf %187, %191 : vector<8x128xf32>
      %193 = arith.truncf %192 : vector<8x128xf32> to vector<8x128xbf16>
      %c0_i32_74 = arith.constant 0 : i32
      %194 = arith.addi %c0_i32_74, %c5_i32 : i32
      %195 = arith.index_cast %194 : i32 to index
      %c0_75 = arith.constant 0 : index
      %c0_76 = arith.constant 0 : index
      %196 = vector.load %arg7[%195, %c0_75, %c0_76] : memref<8x8x128xbf16, #tpu.memory_space<vmem>>, vector<1x8x128xbf16>
      %197 = vector.shape_cast %196 : vector<1x8x128xbf16> to vector<8x128xbf16>
      %198 = vector.shape_cast %193 : vector<8x128xbf16> to vector<1x8x128xbf16>
      tpu.vector_store %arg7[%195, %c0_75, %c0_76], %198 {strides = array<i32>} : memref<8x8x128xbf16, #tpu.memory_space<vmem>>, vector<1x8x128xbf16>,
      %c6_i32 = arith.constant 6 : i32
      %199 = arith.index_cast %c6_i32 : i32 to index
      %c0_77 = arith.constant 0 : index
      %c0_78 = arith.constant 0 : index
      %200 = vector.load %arg8[%199, %c0_77, %c0_78] : memref<8x8x512xf32, #tpu.memory_space<vmem>>, vector<1x8x512xf32>
      %201 = vector.shape_cast %200 : vector<1x8x512xf32> to vector<8x512xf32>
      %202 = arith.truncf %192 : vector<8x128xf32> to vector<8x128xbf16>
      %c0_79 = arith.constant 0 : index
      %c0_80 = arith.constant 0 : index
      %c0_81 = arith.constant 0 : index
      %203 = vector.load %arg3[%c0_79, %c0_80, %c0_81] : memref<1x128x512xbf16, #tpu.memory_space<vmem>>, vector<1x128x512xbf16>
      %204 = vector.shape_cast %203 : vector<1x128x512xbf16> to vector<128x512xbf16>
      %cst_82 = arith.constant dense<0.000000e+00> : vector<8x512xf32>
      %205 = tpu.matmul %202, %204, %cst_82 {dimension_numbers = #tpu.dot_dimension_numbers<[1], [0], [0], [1], [0, 0, 1, 1], [], []>} : vector<8x128xbf16>, vector<128x512xbf16>, vector<8x512xf32> -> vector<8x512xf32>
      %206 = arith.addf %201, %205 : vector<8x512xf32>
      %207 = vector.extract_strided_slice %206 {offsets = [0, 0], sizes = [8, 384], strides = [1, 1]} : vector<8x512xf32> to vector<8x384xf32>
      %208 = arith.negf %207 : vector<8x384xf32>
      %209 = math.exp %208 : vector<8x384xf32>
      %cst_83 = arith.constant 1.000000e+00 : f32
      %210 = vector.broadcast %cst_83 : f32 to vector<8x384xf32>
      %211 = arith.addf %210, %209 : vector<8x384xf32>
      %212 = arith.divf %210, %211 : vector<8x384xf32>
      %213 = vector.extract_strided_slice %206 {offsets = [0, 384], sizes = [8, 128], strides = [1, 1]} : vector<8x512xf32> to vector<8x128xf32>
      %214 = math.tanh %213 : vector<8x128xf32>
      %215 = vector.extract_strided_slice %212 {offsets = [0, 0], sizes = [8, 128], strides = [1, 1]} : vector<8x384xf32> to vector<8x128xf32>
      %216 = vector.extract_strided_slice %212 {offsets = [0, 128], sizes = [8, 128], strides = [1, 1]} : vector<8x384xf32> to vector<8x128xf32>
      %217 = vector.extract_strided_slice %212 {offsets = [0, 256], sizes = [8, 128], strides = [1, 1]} : vector<8x384xf32> to vector<8x128xf32>
      %218 = arith.mulf %216, %190 : vector<8x128xf32>
      %219 = arith.mulf %215, %214 : vector<8x128xf32>
      %220 = arith.addf %218, %219 : vector<8x128xf32>
      %221 = math.tanh %220 : vector<8x128xf32>
      %222 = arith.mulf %217, %221 : vector<8x128xf32>
      %223 = arith.truncf %222 : vector<8x128xf32> to vector<8x128xbf16>
      %c0_i32_84 = arith.constant 0 : i32
      %224 = arith.addi %c0_i32_84, %c6_i32 : i32
      %225 = arith.index_cast %224 : i32 to index
      %c0_85 = arith.constant 0 : index
      %c0_86 = arith.constant 0 : index
      %226 = vector.load %arg7[%225, %c0_85, %c0_86] : memref<8x8x128xbf16, #tpu.memory_space<vmem>>, vector<1x8x128xbf16>
      %227 = vector.shape_cast %226 : vector<1x8x128xbf16> to vector<8x128xbf16>
      %228 = vector.shape_cast %223 : vector<8x128xbf16> to vector<1x8x128xbf16>
      tpu.vector_store %arg7[%225, %c0_85, %c0_86], %228 {strides = array<i32>} : memref<8x8x128xbf16, #tpu.memory_space<vmem>>, vector<1x8x128xbf16>,
      %c7_i32 = arith.constant 7 : i32
      %229 = arith.index_cast %c7_i32 : i32 to index
      %c0_87 = arith.constant 0 : index
      %c0_88 = arith.constant 0 : index
      %230 = vector.load %arg8[%229, %c0_87, %c0_88] : memref<8x8x512xf32, #tpu.memory_space<vmem>>, vector<1x8x512xf32>
      %231 = vector.shape_cast %230 : vector<1x8x512xf32> to vector<8x512xf32>
      %232 = arith.truncf %222 : vector<8x128xf32> to vector<8x128xbf16>
      %c0_89 = arith.constant 0 : index
      %c0_90 = arith.constant 0 : index
      %c0_91 = arith.constant 0 : index
      %233 = vector.load %arg3[%c0_89, %c0_90, %c0_91] : memref<1x128x512xbf16, #tpu.memory_space<vmem>>, vector<1x128x512xbf16>
      %234 = vector.shape_cast %233 : vector<1x128x512xbf16> to vector<128x512xbf16>
      %cst_92 = arith.constant dense<0.000000e+00> : vector<8x512xf32>
      %235 = tpu.matmul %232, %234, %cst_92 {dimension_numbers = #tpu.dot_dimension_numbers<[1], [0], [0], [1], [0, 0, 1, 1], [], []>} : vector<8x128xbf16>, vector<128x512xbf16>, vector<8x512xf32> -> vector<8x512xf32>
      %236 = arith.addf %231, %235 : vector<8x512xf32>
      %237 = vector.extract_strided_slice %236 {offsets = [0, 0], sizes = [8, 384], strides = [1, 1]} : vector<8x512xf32> to vector<8x384xf32>
      %238 = arith.negf %237 : vector<8x384xf32>
      %239 = math.exp %238 : vector<8x384xf32>
      %cst_93 = arith.constant 1.000000e+00 : f32
      %240 = vector.broadcast %cst_93 : f32 to vector<8x384xf32>
      %241 = arith.addf %240, %239 : vector<8x384xf32>
      %242 = arith.divf %240, %241 : vector<8x384xf32>
      %243 = vector.extract_strided_slice %236 {offsets = [0, 384], sizes = [8, 128], strides = [1, 1]} : vector<8x512xf32> to vector<8x128xf32>
      %244 = math.tanh %243 : vector<8x128xf32>
      %245 = vector.extract_strided_slice %242 {offsets = [0, 0], sizes = [8, 128], strides = [1, 1]} : vector<8x384xf32> to vector<8x128xf32>
      %246 = vector.extract_strided_slice %242 {offsets = [0, 128], sizes = [8, 128], strides = [1, 1]} : vector<8x384xf32> to vector<8x128xf32>
      %247 = vector.extract_strided_slice %242 {offsets = [0, 256], sizes = [8, 128], strides = [1, 1]} : vector<8x384xf32> to vector<8x128xf32>
      %248 = arith.mulf %246, %220 : vector<8x128xf32>
      %249 = arith.mulf %245, %244 : vector<8x128xf32>
      %250 = arith.addf %248, %249 : vector<8x128xf32>
      %251 = math.tanh %250 : vector<8x128xf32>
      %252 = arith.mulf %247, %251 : vector<8x128xf32>
      %253 = arith.truncf %252 : vector<8x128xf32> to vector<8x128xbf16>
      %c0_i32_94 = arith.constant 0 : i32
      %254 = arith.addi %c0_i32_94, %c7_i32 : i32
      %255 = arith.index_cast %254 : i32 to index
      %c0_95 = arith.constant 0 : index
      %c0_96 = arith.constant 0 : index
      %256 = vector.load %arg7[%255, %c0_95, %c0_96] : memref<8x8x128xbf16, #tpu.memory_space<vmem>>, vector<1x8x128xbf16>
      %257 = vector.shape_cast %256 : vector<1x8x128xbf16> to vector<8x128xbf16>
      %258 = vector.shape_cast %253 : vector<8x128xbf16> to vector<1x8x128xbf16>
      tpu.vector_store %arg7[%255, %c0_95, %c0_96], %258 {strides = array<i32>} : memref<8x8x128xbf16, #tpu.memory_space<vmem>>, vector<1x8x128xbf16>,
      %c8_i32 = arith.constant 8 : i32
      %c0_97 = arith.constant 0 : index
      %c0_98 = arith.constant 0 : index
      %c0_99 = arith.constant 0 : index
      %259 = vector.load %arg5[%c0_97, %c0_98, %c0_99] : memref<1x8x128xf32, #tpu.memory_space<vmem>>, vector<1x8x128xf32>
      %260 = vector.shape_cast %259 : vector<1x8x128xf32> to vector<8x128xf32>
      %261 = vector.shape_cast %252 : vector<8x128xf32> to vector<1x8x128xf32>
      tpu.vector_store %arg5[%c0_97, %c0_98, %c0_99], %261 {strides = array<i32>} : memref<1x8x128xf32, #tpu.memory_space<vmem>>, vector<1x8x128xf32>,
      %c0_100 = arith.constant 0 : index
      %c0_101 = arith.constant 0 : index
      %c0_102 = arith.constant 0 : index
      %262 = vector.load %arg6[%c0_100, %c0_101, %c0_102] : memref<1x8x128xf32, #tpu.memory_space<vmem>>, vector<1x8x128xf32>
      %263 = vector.shape_cast %262 : vector<1x8x128xf32> to vector<8x128xf32>
      %264 = vector.shape_cast %250 : vector<8x128xf32> to vector<1x8x128xf32>
      tpu.vector_store %arg6[%c0_100, %c0_101, %c0_102], %264 {strides = array<i32>} : memref<1x8x128xf32, #tpu.memory_space<vmem>>, vector<1x8x128xf32>,
    } else {
    }
    %c0_i32_1 = arith.constant 0 : i32
    %3 = arith.cmpi ne, %arg0, %c0_i32_1 : i32
    %4 = arith.extui %3 : i1 to i32
    %c0_i32_2 = arith.constant 0 : i32
    %5 = arith.cmpi ne, %4, %c0_i32_2 : i32
    scf.if %5 {
      %cst = arith.constant 0.000000e+00 : f32
      %6 = vector.broadcast %cst : f32 to vector<8x128xf32>
      %cst_3 = arith.constant 0.000000e+00 : f32
      %7 = vector.broadcast %cst_3 : f32 to vector<8x128xf32>
      %c0 = arith.constant 0 : index
      %c0_4 = arith.constant 0 : index
      %c0_5 = arith.constant 0 : index
      %8 = vector.load %arg7[%c0, %c0_4, %c0_5] : memref<8x8x128xbf16, #tpu.memory_space<vmem>>, vector<8x8x128xbf16>
      %9 = vector.shape_cast %8 : vector<8x8x128xbf16> to vector<64x128xbf16>
      %c0_6 = arith.constant 0 : index
      %c0_7 = arith.constant 0 : index
      %c0_8 = arith.constant 0 : index
      %10 = vector.load %arg2[%c0_6, %c0_7, %c0_8] : memref<1x128x512xbf16, #tpu.memory_space<vmem>>, vector<1x128x512xbf16>
      %11 = vector.shape_cast %10 : vector<1x128x512xbf16> to vector<128x512xbf16>
      %cst_9 = arith.constant dense<0.000000e+00> : vector<64x512xf32>
      %12 = tpu.matmul %9, %11, %cst_9 {dimension_numbers = #tpu.dot_dimension_numbers<[1], [0], [0], [1], [0, 0, 1, 1], [], []>} : vector<64x128xbf16>, vector<128x512xbf16>, vector<64x512xf32> -> vector<64x512xf32>
      %c0_10 = arith.constant 0 : index
      %c0_11 = arith.constant 0 : index
      %c0_12 = arith.constant 0 : index
      %13 = vector.load %arg4[%c0_10, %c0_11, %c0_12] : memref<1x1x512xf32, #tpu.memory_space<vmem>>, vector<1x1x512xf32>
      %14 = vector.shape_cast %13 : vector<1x1x512xf32> to vector<1x512xf32>
      %15 = vector.broadcast %14 : vector<1x512xf32> to vector<64x512xf32>
      %16 = arith.addf %12, %15 : vector<64x512xf32>
      %17 = vector.shape_cast %16 : vector<64x512xf32> to vector<8x8x512xf32>
      %c0_13 = arith.constant 0 : index
      %c0_14 = arith.constant 0 : index
      %c0_15 = arith.constant 0 : index
      %18 = vector.load %arg8[%c0_13, %c0_14, %c0_15] : memref<8x8x512xf32, #tpu.memory_space<vmem>>, vector<8x8x512xf32>
      tpu.vector_store %arg8[%c0_13, %c0_14, %c0_15], %17 {strides = array<i32>} : memref<8x8x512xf32, #tpu.memory_space<vmem>>, vector<8x8x512xf32>,
      %c0_i32_16 = arith.constant 0 : i32
      %19 = arith.index_cast %c0_i32_16 : i32 to index
      %c0_17 = arith.constant 0 : index
      %c0_18 = arith.constant 0 : index
      %20 = vector.load %arg8[%19, %c0_17, %c0_18] : memref<8x8x512xf32, #tpu.memory_space<vmem>>, vector<1x8x512xf32>
      %21 = vector.shape_cast %20 : vector<1x8x512xf32> to vector<8x512xf32>
      %22 = arith.truncf %6 : vector<8x128xf32> to vector<8x128xbf16>
      %c0_19 = arith.constant 0 : index
      %c0_20 = arith.constant 0 : index
      %c0_21 = arith.constant 0 : index
      %23 = vector.load %arg3[%c0_19, %c0_20, %c0_21] : memref<1x128x512xbf16, #tpu.memory_space<vmem>>, vector<1x128x512xbf16>
      %24 = vector.shape_cast %23 : vector<1x128x512xbf16> to vector<128x512xbf16>
      %cst_22 = arith.constant dense<0.000000e+00> : vector<8x512xf32>
      %25 = tpu.matmul %22, %24, %cst_22 {dimension_numbers = #tpu.dot_dimension_numbers<[1], [0], [0], [1], [0, 0, 1, 1], [], []>} : vector<8x128xbf16>, vector<128x512xbf16>, vector<8x512xf32> -> vector<8x512xf32>
      %26 = arith.addf %21, %25 : vector<8x512xf32>
      %27 = vector.extract_strided_slice %26 {offsets = [0, 0], sizes = [8, 384], strides = [1, 1]} : vector<8x512xf32> to vector<8x384xf32>
      %28 = arith.negf %27 : vector<8x384xf32>
      %29 = math.exp %28 : vector<8x384xf32>
      %cst_23 = arith.constant 1.000000e+00 : f32
      %30 = vector.broadcast %cst_23 : f32 to vector<8x384xf32>
      %31 = arith.addf %30, %29 : vector<8x384xf32>
      %32 = arith.divf %30, %31 : vector<8x384xf32>
      %33 = vector.extract_strided_slice %26 {offsets = [0, 384], sizes = [8, 128], strides = [1, 1]} : vector<8x512xf32> to vector<8x128xf32>
      %34 = math.tanh %33 : vector<8x128xf32>
      %35 = vector.extract_strided_slice %32 {offsets = [0, 0], sizes = [8, 128], strides = [1, 1]} : vector<8x384xf32> to vector<8x128xf32>
      %36 = vector.extract_strided_slice %32 {offsets = [0, 128], sizes = [8, 128], strides = [1, 1]} : vector<8x384xf32> to vector<8x128xf32>
      %37 = vector.extract_strided_slice %32 {offsets = [0, 256], sizes = [8, 128], strides = [1, 1]} : vector<8x384xf32> to vector<8x128xf32>
      %38 = arith.mulf %36, %7 : vector<8x128xf32>
      %39 = arith.mulf %35, %34 : vector<8x128xf32>
      %40 = arith.addf %38, %39 : vector<8x128xf32>
      %41 = math.tanh %40 : vector<8x128xf32>
      %42 = arith.mulf %37, %41 : vector<8x128xf32>
      %43 = arith.truncf %42 : vector<8x128xf32> to vector<8x128xbf16>
      %c0_i32_24 = arith.constant 0 : i32
      %44 = arith.addi %c0_i32_24, %c0_i32_16 : i32
      %45 = arith.index_cast %44 : i32 to index
      %c0_25 = arith.constant 0 : index
      %c0_26 = arith.constant 0 : index
      %46 = vector.load %arg7[%45, %c0_25, %c0_26] : memref<8x8x128xbf16, #tpu.memory_space<vmem>>, vector<1x8x128xbf16>
      %47 = vector.shape_cast %46 : vector<1x8x128xbf16> to vector<8x128xbf16>
      %48 = vector.shape_cast %43 : vector<8x128xbf16> to vector<1x8x128xbf16>
      tpu.vector_store %arg7[%45, %c0_25, %c0_26], %48 {strides = array<i32>} : memref<8x8x128xbf16, #tpu.memory_space<vmem>>, vector<1x8x128xbf16>,
      %c1_i32 = arith.constant 1 : i32
      %49 = arith.index_cast %c1_i32 : i32 to index
      %c0_27 = arith.constant 0 : index
      %c0_28 = arith.constant 0 : index
      %50 = vector.load %arg8[%49, %c0_27, %c0_28] : memref<8x8x512xf32, #tpu.memory_space<vmem>>, vector<1x8x512xf32>
      %51 = vector.shape_cast %50 : vector<1x8x512xf32> to vector<8x512xf32>
      %52 = arith.truncf %42 : vector<8x128xf32> to vector<8x128xbf16>
      %c0_29 = arith.constant 0 : index
      %c0_30 = arith.constant 0 : index
      %c0_31 = arith.constant 0 : index
      %53 = vector.load %arg3[%c0_29, %c0_30, %c0_31] : memref<1x128x512xbf16, #tpu.memory_space<vmem>>, vector<1x128x512xbf16>
      %54 = vector.shape_cast %53 : vector<1x128x512xbf16> to vector<128x512xbf16>
      %cst_32 = arith.constant dense<0.000000e+00> : vector<8x512xf32>
      %55 = tpu.matmul %52, %54, %cst_32 {dimension_numbers = #tpu.dot_dimension_numbers<[1], [0], [0], [1], [0, 0, 1, 1], [], []>} : vector<8x128xbf16>, vector<128x512xbf16>, vector<8x512xf32> -> vector<8x512xf32>
      %56 = arith.addf %51, %55 : vector<8x512xf32>
      %57 = vector.extract_strided_slice %56 {offsets = [0, 0], sizes = [8, 384], strides = [1, 1]} : vector<8x512xf32> to vector<8x384xf32>
      %58 = arith.negf %57 : vector<8x384xf32>
      %59 = math.exp %58 : vector<8x384xf32>
      %cst_33 = arith.constant 1.000000e+00 : f32
      %60 = vector.broadcast %cst_33 : f32 to vector<8x384xf32>
      %61 = arith.addf %60, %59 : vector<8x384xf32>
      %62 = arith.divf %60, %61 : vector<8x384xf32>
      %63 = vector.extract_strided_slice %56 {offsets = [0, 384], sizes = [8, 128], strides = [1, 1]} : vector<8x512xf32> to vector<8x128xf32>
      %64 = math.tanh %63 : vector<8x128xf32>
      %65 = vector.extract_strided_slice %62 {offsets = [0, 0], sizes = [8, 128], strides = [1, 1]} : vector<8x384xf32> to vector<8x128xf32>
      %66 = vector.extract_strided_slice %62 {offsets = [0, 128], sizes = [8, 128], strides = [1, 1]} : vector<8x384xf32> to vector<8x128xf32>
      %67 = vector.extract_strided_slice %62 {offsets = [0, 256], sizes = [8, 128], strides = [1, 1]} : vector<8x384xf32> to vector<8x128xf32>
      %68 = arith.mulf %66, %40 : vector<8x128xf32>
      %69 = arith.mulf %65, %64 : vector<8x128xf32>
      %70 = arith.addf %68, %69 : vector<8x128xf32>
      %71 = math.tanh %70 : vector<8x128xf32>
      %72 = arith.mulf %67, %71 : vector<8x128xf32>
      %73 = arith.truncf %72 : vector<8x128xf32> to vector<8x128xbf16>
      %c0_i32_34 = arith.constant 0 : i32
      %74 = arith.addi %c0_i32_34, %c1_i32 : i32
      %75 = arith.index_cast %74 : i32 to index
      %c0_35 = arith.constant 0 : index
      %c0_36 = arith.constant 0 : index
      %76 = vector.load %arg7[%75, %c0_35, %c0_36] : memref<8x8x128xbf16, #tpu.memory_space<vmem>>, vector<1x8x128xbf16>
      %77 = vector.shape_cast %76 : vector<1x8x128xbf16> to vector<8x128xbf16>
      %78 = vector.shape_cast %73 : vector<8x128xbf16> to vector<1x8x128xbf16>
      tpu.vector_store %arg7[%75, %c0_35, %c0_36], %78 {strides = array<i32>} : memref<8x8x128xbf16, #tpu.memory_space<vmem>>, vector<1x8x128xbf16>,
      %c2_i32 = arith.constant 2 : i32
      %79 = arith.index_cast %c2_i32 : i32 to index
      %c0_37 = arith.constant 0 : index
      %c0_38 = arith.constant 0 : index
      %80 = vector.load %arg8[%79, %c0_37, %c0_38] : memref<8x8x512xf32, #tpu.memory_space<vmem>>, vector<1x8x512xf32>
      %81 = vector.shape_cast %80 : vector<1x8x512xf32> to vector<8x512xf32>
      %82 = arith.truncf %72 : vector<8x128xf32> to vector<8x128xbf16>
      %c0_39 = arith.constant 0 : index
      %c0_40 = arith.constant 0 : index
      %c0_41 = arith.constant 0 : index
      %83 = vector.load %arg3[%c0_39, %c0_40, %c0_41] : memref<1x128x512xbf16, #tpu.memory_space<vmem>>, vector<1x128x512xbf16>
      %84 = vector.shape_cast %83 : vector<1x128x512xbf16> to vector<128x512xbf16>
      %cst_42 = arith.constant dense<0.000000e+00> : vector<8x512xf32>
      %85 = tpu.matmul %82, %84, %cst_42 {dimension_numbers = #tpu.dot_dimension_numbers<[1], [0], [0], [1], [0, 0, 1, 1], [], []>} : vector<8x128xbf16>, vector<128x512xbf16>, vector<8x512xf32> -> vector<8x512xf32>
      %86 = arith.addf %81, %85 : vector<8x512xf32>
      %87 = vector.extract_strided_slice %86 {offsets = [0, 0], sizes = [8, 384], strides = [1, 1]} : vector<8x512xf32> to vector<8x384xf32>
      %88 = arith.negf %87 : vector<8x384xf32>
      %89 = math.exp %88 : vector<8x384xf32>
      %cst_43 = arith.constant 1.000000e+00 : f32
      %90 = vector.broadcast %cst_43 : f32 to vector<8x384xf32>
      %91 = arith.addf %90, %89 : vector<8x384xf32>
      %92 = arith.divf %90, %91 : vector<8x384xf32>
      %93 = vector.extract_strided_slice %86 {offsets = [0, 384], sizes = [8, 128], strides = [1, 1]} : vector<8x512xf32> to vector<8x128xf32>
      %94 = math.tanh %93 : vector<8x128xf32>
      %95 = vector.extract_strided_slice %92 {offsets = [0, 0], sizes = [8, 128], strides = [1, 1]} : vector<8x384xf32> to vector<8x128xf32>
      %96 = vector.extract_strided_slice %92 {offsets = [0, 128], sizes = [8, 128], strides = [1, 1]} : vector<8x384xf32> to vector<8x128xf32>
      %97 = vector.extract_strided_slice %92 {offsets = [0, 256], sizes = [8, 128], strides = [1, 1]} : vector<8x384xf32> to vector<8x128xf32>
      %98 = arith.mulf %96, %70 : vector<8x128xf32>
      %99 = arith.mulf %95, %94 : vector<8x128xf32>
      %100 = arith.addf %98, %99 : vector<8x128xf32>
      %101 = math.tanh %100 : vector<8x128xf32>
      %102 = arith.mulf %97, %101 : vector<8x128xf32>
      %103 = arith.truncf %102 : vector<8x128xf32> to vector<8x128xbf16>
      %c0_i32_44 = arith.constant 0 : i32
      %104 = arith.addi %c0_i32_44, %c2_i32 : i32
      %105 = arith.index_cast %104 : i32 to index
      %c0_45 = arith.constant 0 : index
      %c0_46 = arith.constant 0 : index
      %106 = vector.load %arg7[%105, %c0_45, %c0_46] : memref<8x8x128xbf16, #tpu.memory_space<vmem>>, vector<1x8x128xbf16>
      %107 = vector.shape_cast %106 : vector<1x8x128xbf16> to vector<8x128xbf16>
      %108 = vector.shape_cast %103 : vector<8x128xbf16> to vector<1x8x128xbf16>
      tpu.vector_store %arg7[%105, %c0_45, %c0_46], %108 {strides = array<i32>} : memref<8x8x128xbf16, #tpu.memory_space<vmem>>, vector<1x8x128xbf16>,
      %c3_i32 = arith.constant 3 : i32
      %109 = arith.index_cast %c3_i32 : i32 to index
      %c0_47 = arith.constant 0 : index
      %c0_48 = arith.constant 0 : index
      %110 = vector.load %arg8[%109, %c0_47, %c0_48] : memref<8x8x512xf32, #tpu.memory_space<vmem>>, vector<1x8x512xf32>
      %111 = vector.shape_cast %110 : vector<1x8x512xf32> to vector<8x512xf32>
      %112 = arith.truncf %102 : vector<8x128xf32> to vector<8x128xbf16>
      %c0_49 = arith.constant 0 : index
      %c0_50 = arith.constant 0 : index
      %c0_51 = arith.constant 0 : index
      %113 = vector.load %arg3[%c0_49, %c0_50, %c0_51] : memref<1x128x512xbf16, #tpu.memory_space<vmem>>, vector<1x128x512xbf16>
      %114 = vector.shape_cast %113 : vector<1x128x512xbf16> to vector<128x512xbf16>
      %cst_52 = arith.constant dense<0.000000e+00> : vector<8x512xf32>
      %115 = tpu.matmul %112, %114, %cst_52 {dimension_numbers = #tpu.dot_dimension_numbers<[1], [0], [0], [1], [0, 0, 1, 1], [], []>} : vector<8x128xbf16>, vector<128x512xbf16>, vector<8x512xf32> -> vector<8x512xf32>
      %116 = arith.addf %111, %115 : vector<8x512xf32>
      %117 = vector.extract_strided_slice %116 {offsets = [0, 0], sizes = [8, 384], strides = [1, 1]} : vector<8x512xf32> to vector<8x384xf32>
      %118 = arith.negf %117 : vector<8x384xf32>
      %119 = math.exp %118 : vector<8x384xf32>
      %cst_53 = arith.constant 1.000000e+00 : f32
      %120 = vector.broadcast %cst_53 : f32 to vector<8x384xf32>
      %121 = arith.addf %120, %119 : vector<8x384xf32>
      %122 = arith.divf %120, %121 : vector<8x384xf32>
      %123 = vector.extract_strided_slice %116 {offsets = [0, 384], sizes = [8, 128], strides = [1, 1]} : vector<8x512xf32> to vector<8x128xf32>
      %124 = math.tanh %123 : vector<8x128xf32>
      %125 = vector.extract_strided_slice %122 {offsets = [0, 0], sizes = [8, 128], strides = [1, 1]} : vector<8x384xf32> to vector<8x128xf32>
      %126 = vector.extract_strided_slice %122 {offsets = [0, 128], sizes = [8, 128], strides = [1, 1]} : vector<8x384xf32> to vector<8x128xf32>
      %127 = vector.extract_strided_slice %122 {offsets = [0, 256], sizes = [8, 128], strides = [1, 1]} : vector<8x384xf32> to vector<8x128xf32>
      %128 = arith.mulf %126, %100 : vector<8x128xf32>
      %129 = arith.mulf %125, %124 : vector<8x128xf32>
      %130 = arith.addf %128, %129 : vector<8x128xf32>
      %131 = math.tanh %130 : vector<8x128xf32>
      %132 = arith.mulf %127, %131 : vector<8x128xf32>
      %133 = arith.truncf %132 : vector<8x128xf32> to vector<8x128xbf16>
      %c0_i32_54 = arith.constant 0 : i32
      %134 = arith.addi %c0_i32_54, %c3_i32 : i32
      %135 = arith.index_cast %134 : i32 to index
      %c0_55 = arith.constant 0 : index
      %c0_56 = arith.constant 0 : index
      %136 = vector.load %arg7[%135, %c0_55, %c0_56] : memref<8x8x128xbf16, #tpu.memory_space<vmem>>, vector<1x8x128xbf16>
      %137 = vector.shape_cast %136 : vector<1x8x128xbf16> to vector<8x128xbf16>
      %138 = vector.shape_cast %133 : vector<8x128xbf16> to vector<1x8x128xbf16>
      tpu.vector_store %arg7[%135, %c0_55, %c0_56], %138 {strides = array<i32>} : memref<8x8x128xbf16, #tpu.memory_space<vmem>>, vector<1x8x128xbf16>,
      %c4_i32 = arith.constant 4 : i32
      %139 = arith.index_cast %c4_i32 : i32 to index
      %c0_57 = arith.constant 0 : index
      %c0_58 = arith.constant 0 : index
      %140 = vector.load %arg8[%139, %c0_57, %c0_58] : memref<8x8x512xf32, #tpu.memory_space<vmem>>, vector<1x8x512xf32>
      %141 = vector.shape_cast %140 : vector<1x8x512xf32> to vector<8x512xf32>
      %142 = arith.truncf %132 : vector<8x128xf32> to vector<8x128xbf16>
      %c0_59 = arith.constant 0 : index
      %c0_60 = arith.constant 0 : index
      %c0_61 = arith.constant 0 : index
      %143 = vector.load %arg3[%c0_59, %c0_60, %c0_61] : memref<1x128x512xbf16, #tpu.memory_space<vmem>>, vector<1x128x512xbf16>
      %144 = vector.shape_cast %143 : vector<1x128x512xbf16> to vector<128x512xbf16>
      %cst_62 = arith.constant dense<0.000000e+00> : vector<8x512xf32>
      %145 = tpu.matmul %142, %144, %cst_62 {dimension_numbers = #tpu.dot_dimension_numbers<[1], [0], [0], [1], [0, 0, 1, 1], [], []>} : vector<8x128xbf16>, vector<128x512xbf16>, vector<8x512xf32> -> vector<8x512xf32>
      %146 = arith.addf %141, %145 : vector<8x512xf32>
      %147 = vector.extract_strided_slice %146 {offsets = [0, 0], sizes = [8, 384], strides = [1, 1]} : vector<8x512xf32> to vector<8x384xf32>
      %148 = arith.negf %147 : vector<8x384xf32>
      %149 = math.exp %148 : vector<8x384xf32>
      %cst_63 = arith.constant 1.000000e+00 : f32
      %150 = vector.broadcast %cst_63 : f32 to vector<8x384xf32>
      %151 = arith.addf %150, %149 : vector<8x384xf32>
      %152 = arith.divf %150, %151 : vector<8x384xf32>
      %153 = vector.extract_strided_slice %146 {offsets = [0, 384], sizes = [8, 128], strides = [1, 1]} : vector<8x512xf32> to vector<8x128xf32>
      %154 = math.tanh %153 : vector<8x128xf32>
      %155 = vector.extract_strided_slice %152 {offsets = [0, 0], sizes = [8, 128], strides = [1, 1]} : vector<8x384xf32> to vector<8x128xf32>
      %156 = vector.extract_strided_slice %152 {offsets = [0, 128], sizes = [8, 128], strides = [1, 1]} : vector<8x384xf32> to vector<8x128xf32>
      %157 = vector.extract_strided_slice %152 {offsets = [0, 256], sizes = [8, 128], strides = [1, 1]} : vector<8x384xf32> to vector<8x128xf32>
      %158 = arith.mulf %156, %130 : vector<8x128xf32>
      %159 = arith.mulf %155, %154 : vector<8x128xf32>
      %160 = arith.addf %158, %159 : vector<8x128xf32>
      %161 = math.tanh %160 : vector<8x128xf32>
      %162 = arith.mulf %157, %161 : vector<8x128xf32>
      %163 = arith.truncf %162 : vector<8x128xf32> to vector<8x128xbf16>
      %c0_i32_64 = arith.constant 0 : i32
      %164 = arith.addi %c0_i32_64, %c4_i32 : i32
      %165 = arith.index_cast %164 : i32 to index
      %c0_65 = arith.constant 0 : index
      %c0_66 = arith.constant 0 : index
      %166 = vector.load %arg7[%165, %c0_65, %c0_66] : memref<8x8x128xbf16, #tpu.memory_space<vmem>>, vector<1x8x128xbf16>
      %167 = vector.shape_cast %166 : vector<1x8x128xbf16> to vector<8x128xbf16>
      %168 = vector.shape_cast %163 : vector<8x128xbf16> to vector<1x8x128xbf16>
      tpu.vector_store %arg7[%165, %c0_65, %c0_66], %168 {strides = array<i32>} : memref<8x8x128xbf16, #tpu.memory_space<vmem>>, vector<1x8x128xbf16>,
      %c5_i32 = arith.constant 5 : i32
      %169 = arith.index_cast %c5_i32 : i32 to index
      %c0_67 = arith.constant 0 : index
      %c0_68 = arith.constant 0 : index
      %170 = vector.load %arg8[%169, %c0_67, %c0_68] : memref<8x8x512xf32, #tpu.memory_space<vmem>>, vector<1x8x512xf32>
      %171 = vector.shape_cast %170 : vector<1x8x512xf32> to vector<8x512xf32>
      %172 = arith.truncf %162 : vector<8x128xf32> to vector<8x128xbf16>
      %c0_69 = arith.constant 0 : index
      %c0_70 = arith.constant 0 : index
      %c0_71 = arith.constant 0 : index
      %173 = vector.load %arg3[%c0_69, %c0_70, %c0_71] : memref<1x128x512xbf16, #tpu.memory_space<vmem>>, vector<1x128x512xbf16>
      %174 = vector.shape_cast %173 : vector<1x128x512xbf16> to vector<128x512xbf16>
      %cst_72 = arith.constant dense<0.000000e+00> : vector<8x512xf32>
      %175 = tpu.matmul %172, %174, %cst_72 {dimension_numbers = #tpu.dot_dimension_numbers<[1], [0], [0], [1], [0, 0, 1, 1], [], []>} : vector<8x128xbf16>, vector<128x512xbf16>, vector<8x512xf32> -> vector<8x512xf32>
      %176 = arith.addf %171, %175 : vector<8x512xf32>
      %177 = vector.extract_strided_slice %176 {offsets = [0, 0], sizes = [8, 384], strides = [1, 1]} : vector<8x512xf32> to vector<8x384xf32>
      %178 = arith.negf %177 : vector<8x384xf32>
      %179 = math.exp %178 : vector<8x384xf32>
      %cst_73 = arith.constant 1.000000e+00 : f32
      %180 = vector.broadcast %cst_73 : f32 to vector<8x384xf32>
      %181 = arith.addf %180, %179 : vector<8x384xf32>
      %182 = arith.divf %180, %181 : vector<8x384xf32>
      %183 = vector.extract_strided_slice %176 {offsets = [0, 384], sizes = [8, 128], strides = [1, 1]} : vector<8x512xf32> to vector<8x128xf32>
      %184 = math.tanh %183 : vector<8x128xf32>
      %185 = vector.extract_strided_slice %182 {offsets = [0, 0], sizes = [8, 128], strides = [1, 1]} : vector<8x384xf32> to vector<8x128xf32>
      %186 = vector.extract_strided_slice %182 {offsets = [0, 128], sizes = [8, 128], strides = [1, 1]} : vector<8x384xf32> to vector<8x128xf32>
      %187 = vector.extract_strided_slice %182 {offsets = [0, 256], sizes = [8, 128], strides = [1, 1]} : vector<8x384xf32> to vector<8x128xf32>
      %188 = arith.mulf %186, %160 : vector<8x128xf32>
      %189 = arith.mulf %185, %184 : vector<8x128xf32>
      %190 = arith.addf %188, %189 : vector<8x128xf32>
      %191 = math.tanh %190 : vector<8x128xf32>
      %192 = arith.mulf %187, %191 : vector<8x128xf32>
      %193 = arith.truncf %192 : vector<8x128xf32> to vector<8x128xbf16>
      %c0_i32_74 = arith.constant 0 : i32
      %194 = arith.addi %c0_i32_74, %c5_i32 : i32
      %195 = arith.index_cast %194 : i32 to index
      %c0_75 = arith.constant 0 : index
      %c0_76 = arith.constant 0 : index
      %196 = vector.load %arg7[%195, %c0_75, %c0_76] : memref<8x8x128xbf16, #tpu.memory_space<vmem>>, vector<1x8x128xbf16>
      %197 = vector.shape_cast %196 : vector<1x8x128xbf16> to vector<8x128xbf16>
      %198 = vector.shape_cast %193 : vector<8x128xbf16> to vector<1x8x128xbf16>
      tpu.vector_store %arg7[%195, %c0_75, %c0_76], %198 {strides = array<i32>} : memref<8x8x128xbf16, #tpu.memory_space<vmem>>, vector<1x8x128xbf16>,
      %c6_i32 = arith.constant 6 : i32
      %199 = arith.index_cast %c6_i32 : i32 to index
      %c0_77 = arith.constant 0 : index
      %c0_78 = arith.constant 0 : index
      %200 = vector.load %arg8[%199, %c0_77, %c0_78] : memref<8x8x512xf32, #tpu.memory_space<vmem>>, vector<1x8x512xf32>
      %201 = vector.shape_cast %200 : vector<1x8x512xf32> to vector<8x512xf32>
      %202 = arith.truncf %192 : vector<8x128xf32> to vector<8x128xbf16>
      %c0_79 = arith.constant 0 : index
      %c0_80 = arith.constant 0 : index
      %c0_81 = arith.constant 0 : index
      %203 = vector.load %arg3[%c0_79, %c0_80, %c0_81] : memref<1x128x512xbf16, #tpu.memory_space<vmem>>, vector<1x128x512xbf16>
      %204 = vector.shape_cast %203 : vector<1x128x512xbf16> to vector<128x512xbf16>
      %cst_82 = arith.constant dense<0.000000e+00> : vector<8x512xf32>
      %205 = tpu.matmul %202, %204, %cst_82 {dimension_numbers = #tpu.dot_dimension_numbers<[1], [0], [0], [1], [0, 0, 1, 1], [], []>} : vector<8x128xbf16>, vector<128x512xbf16>, vector<8x512xf32> -> vector<8x512xf32>
      %206 = arith.addf %201, %205 : vector<8x512xf32>
      %207 = vector.extract_strided_slice %206 {offsets = [0, 0], sizes = [8, 384], strides = [1, 1]} : vector<8x512xf32> to vector<8x384xf32>
      %208 = arith.negf %207 : vector<8x384xf32>
      %209 = math.exp %208 : vector<8x384xf32>
      %cst_83 = arith.constant 1.000000e+00 : f32
      %210 = vector.broadcast %cst_83 : f32 to vector<8x384xf32>
      %211 = arith.addf %210, %209 : vector<8x384xf32>
      %212 = arith.divf %210, %211 : vector<8x384xf32>
      %213 = vector.extract_strided_slice %206 {offsets = [0, 384], sizes = [8, 128], strides = [1, 1]} : vector<8x512xf32> to vector<8x128xf32>
      %214 = math.tanh %213 : vector<8x128xf32>
      %215 = vector.extract_strided_slice %212 {offsets = [0, 0], sizes = [8, 128], strides = [1, 1]} : vector<8x384xf32> to vector<8x128xf32>
      %216 = vector.extract_strided_slice %212 {offsets = [0, 128], sizes = [8, 128], strides = [1, 1]} : vector<8x384xf32> to vector<8x128xf32>
      %217 = vector.extract_strided_slice %212 {offsets = [0, 256], sizes = [8, 128], strides = [1, 1]} : vector<8x384xf32> to vector<8x128xf32>
      %218 = arith.mulf %216, %190 : vector<8x128xf32>
      %219 = arith.mulf %215, %214 : vector<8x128xf32>
      %220 = arith.addf %218, %219 : vector<8x128xf32>
      %221 = math.tanh %220 : vector<8x128xf32>
      %222 = arith.mulf %217, %221 : vector<8x128xf32>
      %223 = arith.truncf %222 : vector<8x128xf32> to vector<8x128xbf16>
      %c0_i32_84 = arith.constant 0 : i32
      %224 = arith.addi %c0_i32_84, %c6_i32 : i32
      %225 = arith.index_cast %224 : i32 to index
      %c0_85 = arith.constant 0 : index
      %c0_86 = arith.constant 0 : index
      %226 = vector.load %arg7[%225, %c0_85, %c0_86] : memref<8x8x128xbf16, #tpu.memory_space<vmem>>, vector<1x8x128xbf16>
      %227 = vector.shape_cast %226 : vector<1x8x128xbf16> to vector<8x128xbf16>
      %228 = vector.shape_cast %223 : vector<8x128xbf16> to vector<1x8x128xbf16>
      tpu.vector_store %arg7[%225, %c0_85, %c0_86], %228 {strides = array<i32>} : memref<8x8x128xbf16, #tpu.memory_space<vmem>>, vector<1x8x128xbf16>,
      %c7_i32 = arith.constant 7 : i32
      %229 = arith.index_cast %c7_i32 : i32 to index
      %c0_87 = arith.constant 0 : index
      %c0_88 = arith.constant 0 : index
      %230 = vector.load %arg8[%229, %c0_87, %c0_88] : memref<8x8x512xf32, #tpu.memory_space<vmem>>, vector<1x8x512xf32>
      %231 = vector.shape_cast %230 : vector<1x8x512xf32> to vector<8x512xf32>
      %232 = arith.truncf %222 : vector<8x128xf32> to vector<8x128xbf16>
      %c0_89 = arith.constant 0 : index
      %c0_90 = arith.constant 0 : index
      %c0_91 = arith.constant 0 : index
      %233 = vector.load %arg3[%c0_89, %c0_90, %c0_91] : memref<1x128x512xbf16, #tpu.memory_space<vmem>>, vector<1x128x512xbf16>
      %234 = vector.shape_cast %233 : vector<1x128x512xbf16> to vector<128x512xbf16>
      %cst_92 = arith.constant dense<0.000000e+00> : vector<8x512xf32>
      %235 = tpu.matmul %232, %234, %cst_92 {dimension_numbers = #tpu.dot_dimension_numbers<[1], [0], [0], [1], [0, 0, 1, 1], [], []>} : vector<8x128xbf16>, vector<128x512xbf16>, vector<8x512xf32> -> vector<8x512xf32>
      %236 = arith.addf %231, %235 : vector<8x512xf32>
      %237 = vector.extract_strided_slice %236 {offsets = [0, 0], sizes = [8, 384], strides = [1, 1]} : vector<8x512xf32> to vector<8x384xf32>
      %238 = arith.negf %237 : vector<8x384xf32>
      %239 = math.exp %238 : vector<8x384xf32>
      %cst_93 = arith.constant 1.000000e+00 : f32
      %240 = vector.broadcast %cst_93 : f32 to vector<8x384xf32>
      %241 = arith.addf %240, %239 : vector<8x384xf32>
      %242 = arith.divf %240, %241 : vector<8x384xf32>
      %243 = vector.extract_strided_slice %236 {offsets = [0, 384], sizes = [8, 128], strides = [1, 1]} : vector<8x512xf32> to vector<8x128xf32>
      %244 = math.tanh %243 : vector<8x128xf32>
      %245 = vector.extract_strided_slice %242 {offsets = [0, 0], sizes = [8, 128], strides = [1, 1]} : vector<8x384xf32> to vector<8x128xf32>
      %246 = vector.extract_strided_slice %242 {offsets = [0, 128], sizes = [8, 128], strides = [1, 1]} : vector<8x384xf32> to vector<8x128xf32>
      %247 = vector.extract_strided_slice %242 {offsets = [0, 256], sizes = [8, 128], strides = [1, 1]} : vector<8x384xf32> to vector<8x128xf32>
      %248 = arith.mulf %246, %220 : vector<8x128xf32>
      %249 = arith.mulf %245, %244 : vector<8x128xf32>
      %250 = arith.addf %248, %249 : vector<8x128xf32>
      %251 = math.tanh %250 : vector<8x128xf32>
      %252 = arith.mulf %247, %251 : vector<8x128xf32>
      %253 = arith.truncf %252 : vector<8x128xf32> to vector<8x128xbf16>
      %c0_i32_94 = arith.constant 0 : i32
      %254 = arith.addi %c0_i32_94, %c7_i32 : i32
      %255 = arith.index_cast %254 : i32 to index
      %c0_95 = arith.constant 0 : index
      %c0_96 = arith.constant 0 : index
      %256 = vector.load %arg7[%255, %c0_95, %c0_96] : memref<8x8x128xbf16, #tpu.memory_space<vmem>>, vector<1x8x128xbf16>
      %257 = vector.shape_cast %256 : vector<1x8x128xbf16> to vector<8x128xbf16>
      %258 = vector.shape_cast %253 : vector<8x128xbf16> to vector<1x8x128xbf16>
      tpu.vector_store %arg7[%255, %c0_95, %c0_96], %258 {strides = array<i32>} : memref<8x8x128xbf16, #tpu.memory_space<vmem>>, vector<1x8x128xbf16>,
      %c8_i32 = arith.constant 8 : i32
      %c0_97 = arith.constant 0 : index
      %c0_98 = arith.constant 0 : index
      %c0_99 = arith.constant 0 : index
      %259 = vector.load %arg5[%c0_97, %c0_98, %c0_99] : memref<1x8x128xf32, #tpu.memory_space<vmem>>, vector<1x8x128xf32>
      %260 = vector.shape_cast %259 : vector<1x8x128xf32> to vector<8x128xf32>
      %261 = vector.shape_cast %252 : vector<8x128xf32> to vector<1x8x128xf32>
      tpu.vector_store %arg5[%c0_97, %c0_98, %c0_99], %261 {strides = array<i32>} : memref<1x8x128xf32, #tpu.memory_space<vmem>>, vector<1x8x128xf32>,
      %c0_100 = arith.constant 0 : index
      %c0_101 = arith.constant 0 : index
      %c0_102 = arith.constant 0 : index
      %262 = vector.load %arg6[%c0_100, %c0_101, %c0_102] : memref<1x8x128xf32, #tpu.memory_space<vmem>>, vector<1x8x128xf32>
      %263 = vector.shape_cast %262 : vector<1x8x128xf32> to vector<8x128xf32>
      %264 = vector.shape_cast %250 : vector<8x128xf32> to vector<1x8x128xf32>
      tpu.vector_store %arg6[%c0_100, %c0_101, %c0_102], %264 {strides = array<i32>} : memref<1x8x128xf32, #tpu.memory_space<vmem>>, vector<1x8x128xf32>,
    } else {
    }
    return
  }
  func.func @transform_0(%arg0: i32) -> (i32, i32, i32) {
    %c0_i32 = arith.constant 0 : i32
    %c0_i32_0 = arith.constant 0 : i32
    %c0_i32_1 = arith.constant 0 : i32
    %c0_i32_2 = arith.constant 0 : i32
    return %c0_i32, %c0_i32_0, %c0_i32_1 : i32, i32, i32
  }
  func.func @transform_1(%arg0: i32) -> (i32, i32, i32) {
    %c0_i32 = arith.constant 0 : i32
    %c0_i32_0 = arith.constant 0 : i32
    %c0_i32_1 = arith.constant 0 : i32
    return %arg0, %c0_i32, %c0_i32_0 : i32, i32, i32
  }
  func.func @transform_2(%arg0: i32) -> (i32, i32, i32) {
    %c0_i32 = arith.constant 0 : i32
    %c0_i32_0 = arith.constant 0 : i32
    %c0_i32_1 = arith.constant 0 : i32
    return %arg0, %c0_i32, %c0_i32_0 : i32, i32, i32
  }
  func.func @transform_3(%arg0: i32) -> (i32, i32, i32) {
    %c0_i32 = arith.constant 0 : i32
    %c0_i32_0 = arith.constant 0 : i32
    %c0_i32_1 = arith.constant 0 : i32
    return %arg0, %c0_i32, %c0_i32_0 : i32, i32, i32
  }
  func.func @transform_4(%arg0: i32) -> (i32, i32, i32) {
    %c0_i32 = arith.constant 0 : i32
    %c0_i32_0 = arith.constant 0 : i32
    %c0_i32_1 = arith.constant 0 : i32
    return %arg0, %c0_i32, %c0_i32_0 : i32, i32, i32
  }
  func.func @transform_5(%arg0: i32) -> (i32, i32, i32) {
    %c0_i32 = arith.constant 0 : i32
    %c0_i32_0 = arith.constant 0 : i32
    %c0_i32_1 = arith.constant 0 : i32
    return %arg0, %c0_i32, %c0_i32_0 : i32, i32, i32
  }
}

</mosaic_0001>

<bundles_post_ra>
// kernel: tpu_custom_call.1
= control target key start
LH: loop header
LB: loop body
LE: loop exit
PB: predicated region body
PF: predicated region fallthrough
CT: control target
= control target key end

     0   :  { %s9512_s0 = inlined_call_operand.hbm [shape: bf16[8,8,128], index: 0, kind: input, shape index: {}]   ;;  %s9513_s1 = inlined_call_operand.hbm [shape: bf16[2,128,512], index: 1, kind: input, shape index: {}]   ;;  %s9514_s2 = inlined_call_operand.hbm [shape: bf16[2,128,512], index: 2, kind: input, shape index: {}]   ;;  %s9515_s3 = inlined_call_operand.hbm [shape: f32[2,1,512], index: 3, kind: input, shape index: {}]   ;;  %s9516_s4 = inlined_call_operand.hbm [shape: f32[2,8,128], index: 4, kind: output, shape index: {0}]   ;;  %s9517_s5 = inlined_call_operand.hbm [shape: f32[2,8,128], index: 5, kind: output, shape index: {1}]  }
   0x1   :  { %9534 = sst [smem:[#allocation24_spill]] %s9513_s1 }
   0x2   :  { %9535 = sst [smem:[#allocation25_spill]] %s9514_s2 }
   0x3   :  { %11 = vsyncpa [#allocation5], 0 }
   0x4   :  { %12 = vsyncpa [#allocation8], 0 }
   0x5   :  { %14 = vsyncpa [#allocation8 + $0x1], 0 }
   0x6   :  { %15 = vsyncpa [#allocation11], 0 }
   0x7   :  { %17 = vsyncpa [#allocation11 + $0x1], 0 }
   0x8   :  { %18 = vsyncpa [#allocation6], 0 }
   0x9   :  { %20 = vsyncpa [#allocation6 + $0x1], 0 }
   0xa   :  { %21 = vsyncpa [#allocation14], 0 }
   0xb   :  { %23 = vsyncpa [#allocation14 + $0x1], 0  ;;  %s7971_s18 = smov 0   ;;  %s7973_s19 = smov 0  }
   0xc   :  { %s7975_s20 = smov 0   ;;  %s7977_s21 = smov 0  }
   0xd LB: > { %9536 = sst [smem:[#allocation20_spill]] %s7923_s20  ;;  %s7992_s22 = sadd.s32 1, %s7927_s21   ;;  %s7927_s21 = sphi %s7977_s21, %s9567_s21   ;;  %s7923_s20 = sphi %s7975_s20, %s9569_s20   ;;  %s7919_s19 = sphi %s7973_s19, %s9571_s19   ;;  %s7915_s18 = sphi %s7971_s18, %s9570_s18  }
   0xe   : > { %9537 = sst [smem:[#allocation21_spill]] %s7927_s21  ;;  %s57_s23 = sadd.s32 1, %s7923_s20 }
   0xf   : > { %9538 = sst [smem:[#allocation22_spill]] %s7992_s22  ;;  %s54_s24 = ssub.s32 %s7927_s21, %s7992_s22 }
  0x10   : > { %p9518_p0 = scmp.ne.s32.totalorder %s7923_s20, %s7919_s19  ;;  %p55_p1 = scmp.eq.s32.totalorder %s54_s24, 0 }
  0x11   : > { %p65_p2 = scmp.eq.s32.totalorder %s7927_s21, 0  ;;  %p7049_p4 = scmp.lt.s32.totalorder %s7927_s21, 2 }
  0x12   : > { %s8003_s25 = scalar_select %p55_p1, %s7923_s20, %s57_s23  }
  0x13   : > { %p66_p5 = por %p65_p2, %p9518_p0  ;;  %s211_s26 = sand.u32 1, %s7927_s21  }
  0x14   : > { %9539 = sst [smem:[#allocation23_spill]] %s8003_s25  ;;  %s8010_s27 = sand.u32 1, %s7923_s20  }
  0x15   : > { %s6354_s28 = sshll.u32 %s8010_s27, 8  ;;  %s7010_s29 = sshll.u32 %s7927_s21, 12 }
  0x16   : > { %s9540_s1 = sld [smem:[#allocation24_spill]]  ;;  %s215_s8 = scalar_lea.vmem [#allocation7], %s6354_s28 }
  0x17   : > { %s222_s9 = sshll.u32 %s215_s8, 4  ;;  %p8023_p6 = pnand %p7049_p4, %p66_p5  ;;  %s8027_s9 = int_to_ptr.vmem [resolvable:$true] %s222_s9 }
  0x18   : > { %s8029_s11 = scalar_lea.sflag [#allocation8], %s211_s26 }
  0x19   : > { %p8035_p8 = pneg %p8023_p6 }
  0x1c   : > { %s8019_s7 = scalar_lea.hbm %s9540_s1, %s7010_s29  ;;  %s7720_s16 = scalar_lea.hbm %s9540_s1, 8192 }
  0x1d   : > { %s7715_s12 = scalar_lea.hbm %s8019_s7, 4096  ;;  %p7721_p11 = scmp.lt.s32.totalorder %s8019_s7, %s9540_s1 }
  0x1e   : > { %p7716_p7 = scmp.ne.s32.totalorder %s8019_s7, %s7715_s12  ;;  %p7722_p12 = scmp.lt.s32.totalorder %s7720_s16, %s7715_s12 }
  0x20   : > { %p7718_p9 = pnand %p8035_p8, %p7716_p7  ;;  %p7723_p13 = por %p7722_p12, %p7721_p11 }
  0x22   : > { %p7719_p10 = pneg %p7718_p9 }
  0x24   : > { %p7724_p1 = pnand %p7723_p13, %p7719_p10 }
  0x26   : > { %7727 = shalt.err (!%p7724_p1)
}
  0x27   : > { %s7728_s24 = scalar_lea.vmem %s8027_s9, 4096  ;;  %s7929_s26 = smov [#allocation7]  }
  0x28   : > { %p7729_p2 = scmp.ne.s32.totalorder %s8027_s9, %s7728_s24  ;;  %s7733_s30 = sshll.u32 %s7929_s26, 4  ;;  %s7734_s30 = int_to_ptr.vmem [resolvable:$false] %s7733_s30 }
  0x29   : > { %s7735_s6 = scalar_lea.vmem %s7734_s30, 8192  ;;  %p7736_p7 = scmp.lt.s32.totalorder %s8027_s9, %s7734_s30 }
  0x2a   : > { %p7731_p4 = pnand %p7729_p2, %p8035_p8  ;;  %p7737_p9 = scmp.lt.s32.totalorder %s7735_s6, %s7728_s24 }
  0x2c   : > { %p7732_p5 = pneg %p7731_p4  ;;  %p7738_p3 = por %p7737_p9, %p7736_p7 }
  0x2e   : > { %p7739_p0 = pnand %p7738_p3, %p7732_p5 }
  0x30   : > { %7742 = shalt.err (!%p7739_p0)
}
  0x31   : > { %s9519_s8 = smov 256   ;;  %s9520_s12 = smov 16  }
  0x32   : > { %7034 = dma.hbm_to_vmem [thread:$0]  (!%p8023_p6), %s8019_s7, 4096, %s8027_s9, %s8029_s11, %s9519_s8, %s9519_s8, %s9520_s12  }
  0x33   : > { %s9543_s2 = sld [smem:[#allocation25_spill]]  ;;  %s236_s17 = scalar_lea.vmem [#allocation9], %s6354_s28 }
  0x34   : > { %s243_s23 = sshll.u32 %s236_s17, 4  ;;  %s8073_s24 = sadd.s32 4294967295, %s7927_s21   ;;  %s8070_s23 = int_to_ptr.vmem [resolvable:$true] %s243_s23 }
  0x35   : > { %s6350_s26 = sadd.s32 4294967294, %s7927_s21   ;;  %p70_p0 = scmp.ne.s32.totalorder %s7919_s19, %s7915_s18 }
  0x36   : > { %p9521_p3 = scmp.eq.s32.totalorder %s8073_s24, 0  ;;  %p146_p10 = scmp.eq.s32.totalorder %s8073_s24, 1 }
  0x37   : > { %p152_p11 = scmp.eq.s32.totalorder %s6350_s26, 1  ;;  %p6351_p13 = scmp.ge.s32.totalorder %s7927_s21, 1 }
  0x38   : > { %p8082_p12 = por %p9521_p3, %p70_p0  ;;  %p9545_p1 = scmp.ne.s32.totalorder %s7923_s20, %s7919_s19 }
  0x39   : > { %s8066_s16 = scalar_lea.hbm %s9543_s2, %s7010_s29  ;;  %p8094_p4 = por %p152_p11, %p70_p0 }
  0x3a   : > { %s9544_s28 = scalar_select %p8082_p12, 1, 0 }
  0x3b   : > { %p8090_p2 = por %p146_p10, %p9545_p1  ;;  %p185_p5 = scmp.lt.s32.totalorder %s7927_s21, 3 }
  0x3c   : > { %s9547_s7 = scalar_select %p8094_p4, 1, 0 }
  0x3d   : > { %s9546_s29 = scalar_select %p8090_p2, 1, 0 }
  0x3e   : > { %p8100_p9 = pnand %p6351_p13, %p185_p5  ;;  %s7932_s30 = smov [#allocation4]  }
  0x3f   : > { %s197_s6 = sshll.u32 %s7932_s30, 4  ;;  %s7743_s14 = scalar_lea.hbm %s8066_s16, 4096  ;;  %s8104_s6 = int_to_ptr.vmem [resolvable:$true] %s197_s6 }
  0x40   : > { %s9548_s9 = scalar_select %p8100_p9, 1, 0 }
  0x41   : > { %p7744_p1 = scmp.ne.s32.totalorder %s8066_s16, %s7743_s14  ;;  %s7748_s26 = scalar_lea.hbm %s9543_s2, 8192 }
  0x42   : > { %p7749_p13 = scmp.lt.s32.totalorder %s8066_s16, %s9543_s2  ;;  %p7750_p5 = scmp.lt.s32.totalorder %s7748_s26, %s7743_s14 }
  0x43   : > { %p7746_p0 = pnand %p7744_p1, %p8035_p8 }
  0x44   : > { %p7751_p7 = por %p7750_p5, %p7749_p13 }
  0x45   : > { %p7747_p11 = pneg %p7746_p0 }
  0x47   : > { %p7752_p3 = pnand %p7751_p7, %p7747_p11 }
  0x49   : > { %7755 = shalt.err (!%p7752_p3)
}
  0x4a   : > { %s7756_s30 = scalar_lea.vmem %s8070_s23, 4096  ;;  %s7933_s1 = smov [#allocation9]  }
  0x4b   : > { %p7757_p10 = scmp.ne.s32.totalorder %s8070_s23, %s7756_s30  ;;  %s7761_s15 = sshll.u32 %s7933_s1, 4  ;;  %s7762_s15 = int_to_ptr.vmem [resolvable:$false] %s7761_s15 }
  0x4c   : > { %s7763_s17 = scalar_lea.vmem %s7762_s15, 8192  ;;  %p7764_p4 = scmp.lt.s32.totalorder %s8070_s23, %s7762_s15 }
  0x4d   : > { %p7759_p1 = pnand %p7757_p10, %p8035_p8  ;;  %p7765_p2 = scmp.lt.s32.totalorder %s7763_s17, %s7756_s30 }
  0x4f   : > { %p7760_p0 = pneg %p7759_p1  ;;  %p7766_p12 = por %p7765_p2, %p7764_p4 }
  0x51   : > { %p7767_p9 = pnand %p7766_p12, %p7760_p0 }
  0x53   : > { %7770 = shalt.err (!%p7767_p9)
}
  0x54   : > { %s9549_s8 = smov 16   ;;  %s9550_s12 = smov 256  }
  0x55   : > { %7037 = dma.hbm_to_vmem [thread:$0]  (!%p8023_p6), %s8066_s16, 4096, %s8070_s23, %s8029_s11, %s9550_s12, %s9550_s12, %s9549_s8  }
  0x56   : > { %p9551_p3 = scmp.eq.s32.totalorder %s8073_s24, 0  ;;  %p9552_p2 = scmp.ne.s32.totalorder %s9548_s9, 0 }
  0x57   : > { %s6360_s14 = sshll.u32 %s8010_s27, 2  ;;  %s7012_s26 = sshll.u32 %s7927_s21, 6 }
  0x58   : > { %p9553_p12 = pneg %p9552_p2  ;;  %s8146_s17 = scalar_lea.hbm %s9515_s3, %s7012_s26 }
  0x59   : > { %s7782_s2 = scalar_lea.vmem %s8104_s6, 512  ;;  %p7790_p13 = scmp.lt.s32.totalorder %s8104_s6, %s8104_s6 }
  0x5a   : > { %p8137_p4 = pnand %p9553_p12, %p9551_p3  ;;  %p7783_p9 = scmp.ne.s32.totalorder %s8104_s6, %s7782_s2 }
  0x5b   : > { %p7791_p5 = scmp.lt.s32.totalorder %s7782_s2, %s7782_s2 }
  0x5c   : > { %p7773_p7 = pneg %p8137_p4 }
  0x5d   : > { %p7792_p1 = por %p7791_p5, %p7790_p13 }
  0x5e   : > { %p7785_p10 = pnand %p7783_p9, %p7773_p7 }
  0x60   : > { %p7786_p11 = pneg %p7785_p10 }
  0x62   : > { %p7793_p0 = pnand %p7792_p1, %p7786_p11 }
  0x64   : > { %7796 = shalt.err (!%p7793_p0)
}
  0x65   : > { %s7934_s11 = smov 64   ;;  %s7935_s16 = smov 4  }
  0x66   : > { %7030 = dma.hbm_to_vmem [thread:$0]  (!%p8137_p4), %s9512_s0, 512, %s8104_s6, [#allocation5], %s7934_s11, %s7934_s11, %s7935_s16  }
  0x67   : > { %s257_s12 = scalar_lea.vmem [#allocation10], %s6360_s14  ;;  %s254_s2 = scalar_lea.sflag [#allocation11], %s8010_s27 }
  0x68   : > { %s265_s26 = sshll.u32 %s257_s12, 4  ;;  %s7797_s30 = scalar_lea.hbm %s8146_s17, 64  ;;  %s266_s26 = int_to_ptr.vmem [resolvable:$true] %s265_s26 }
  0x69   : > { %p7798_p3 = scmp.ne.s32.totalorder %s8146_s17, %s7797_s30  ;;  %s7802_s20 = scalar_lea.hbm %s9515_s3, 128 }
  0x6a   : > { %p7803_p9 = scmp.lt.s32.totalorder %s8146_s17, %s9515_s3  ;;  %p7804_p10 = scmp.lt.s32.totalorder %s7802_s20, %s7797_s30 }
  0x6b   : > { %p7800_p12 = pnand %p7798_p3, %p8035_p8 }
  0x6c   : > { %p7805_p11 = por %p7804_p10, %p7803_p9 }
  0x6d   : > { %p7801_p7 = pneg %p7800_p12 }
  0x6f   : > { %p7806_p4 = pnand %p7805_p11, %p7801_p7 }
  0x71   : > { %7809 = shalt.err (!%p7806_p4)
}
  0x72   : > { %s7810_s6 = scalar_lea.vmem %s266_s26, 64  ;;  %s7936_s27 = smov [#allocation10]  }
  0x73   : > { %p7811_p13 = scmp.ne.s32.totalorder %s266_s26, %s7810_s6  ;;  %s7815_s1 = sshll.u32 %s7936_s27, 4  ;;  %s7816_s1 = int_to_ptr.vmem [resolvable:$false] %s7815_s1 }
  0x74   : > { %s7817_s14 = scalar_lea.vmem %s7816_s1, 128  ;;  %p7818_p0 = scmp.lt.s32.totalorder %s266_s26, %s7816_s1 }
  0x75   : > { %p7813_p5 = pnand %p7811_p13, %p8035_p8  ;;  %p7819_p3 = scmp.lt.s32.totalorder %s7817_s14, %s7810_s6 }
  0x77   : > { %p7814_p1 = pneg %p7813_p5  ;;  %p7820_p12 = por %p7819_p3, %p7818_p0 }
  0x79   : > { %p7821_p2 = pnand %p7820_p12, %p7814_p1 }
  0x7b   : > { %7824 = shalt.err (!%p7821_p2)
}
  0x7c   : > { %7040 = dma.hbm_to_vmem [thread:$0]  (!%p8023_p6), %s8146_s17, 64, %s266_s26, %s254_s2  }
  0x7d   : > { %p9555_p7 = scmp.ne.s32.totalorder %s9548_s9, 0 }
  0x7e   : > { %p9556_p9 = scmp.eq.s32.totalorder (!%p9555_p7), %s8073_s24, 0 }
  0x7f   : > { %274 = sbr.rel (%p9555_p7) target bundleno = 4352 (0x1100), region = 36 }
  0x84   : > { %7894 = dma.done.wait (%p9556_p9), [#allocation5], 512   ;;  %p9557_p8 = pmov %p9556_p9 }
  0x85   : > { %s280_s20 = sand.u32 1, %s8073_s24   ;;  %s8185_s21 = sand.u32 1, %s7919_s19  }
  0x86   : > { %7896 = vsyncadd (%p9557_p8), [#allocation5], 4294966784  ;;  %s6365_s22 = sshll.u32 %s8185_s21, 8  ;;  %s281_s25 = scalar_lea.sflag [#allocation8], %s280_s20 }
  0x87   : > { %s8188_s10 = scalar_lea.vmem [#allocation7], %s6365_s22  ;;  %p9558_p6 = scmp.ne.s32.totalorder %s9544_s28, 0 }
  0x89   : > { %7898 = dma.done.wait (%p9558_p6), %s281_s25, 8192  }
  0x8a   : > { %7900 = vsyncadd (%p9558_p6), %s281_s25, 4294959104  ;;  %s6367_s13 = sshll.u32 %s8185_s21, 2  ;;  %s8195_s9 = scalar_lea.vmem [#allocation9], %s6365_s22 }
  0x8b   : > { %s299_s17 = scalar_lea.sflag [#allocation11], %s8185_s21  ;;  %s8198_s11 = scalar_lea.vmem [#allocation10], %s6367_s13 }
  0x8c   : > { %7902 = dma.done.wait (%p9558_p6), %s299_s17, 64  }
  0x8d   : > { %7904 = vsyncadd (%p9558_p6), %s299_s17, 4294967232  ;;  %s6368_s16 = sshll.u32 %s8185_s21, 3  ;;  %p9559_p2 = scmp.ne.s32.totalorder %s8073_s24, 0 }
  0x8e   : > { %s8205_s23 = scalar_lea.vmem [#allocation12], %s6368_s16  ;;  %s8207_s8 = scalar_lea.vmem [#allocation13], %s6368_s16 }
  0x8f   : > { %348 = sbr.rel (%p9559_p2) target bundleno = 2223 (0x8af), region = 56 }
  0x94   : > { %v7091_v0 = vld [vmem:[%s8188_s10 + $0xe4] ss:$16 sps:$4 sm:$0xff]   ;;  %v7093_v1 = vld [vmem:[%s8188_s10 + $0xec] ss:$16 sps:$4 sm:$0xff]   ;;  %v9530_v2 = vmov 0  }
  0x95   : > { %627 = vmatprep.mubr.bf16.mxu0 %v9530_v2  ;;  %700 = vmatprep.mubr.bf16.mxu1 %v9530_v2  ;;  %v7095_v3 = vld [vmem:[%s8188_s10 + $0xe0] ss:$16 sps:$4 sm:$0xff]   ;;  %v7096_v4 = vld [vmem:[%s8188_s10 + $0xe8] ss:$16 sps:$4 sm:$0xff]   ;;  %v7097_v5 = vld [vmem:[%s8188_s10 + $0xc4] ss:$16 sps:$4 sm:$0xff]  }
  0x96   : > { %595 = vmatprep.subr.bf16.mxu0 %v7091_v0  ;;  %668 = vmatprep.subr.bf16.mxu1 %v7093_v1  ;;  %v7099_v6 = vld [vmem:[%s8188_s10 + $0xcc] ss:$16 sps:$4 sm:$0xff]   ;;  %v7101_v7 = vld [vmem:[%s8188_s10 + $0xc0] ss:$16 sps:$4 sm:$0xff]   ;;  %v7102_v8 = vld [vmem:[%s8188_s10 + $0xc8] ss:$16 sps:$4 sm:$0xff]  }
  0x97   : > { %596 = vmatpush1.bf16.msra.mxu0 %v7095_v3  ;;  %669 = vmatpush1.bf16.msra.mxu1 %v7096_v4  ;;  %v7103_v9 = vld [vmem:[%s8188_s10 + $0xa4] ss:$16 sps:$4 sm:$0xff]   ;;  %v7105_v10 = vld [vmem:[%s8188_s10 + $0xac] ss:$16 sps:$4 sm:$0xff]   ;;  %v7107_v11 = vld [vmem:[%s8188_s10 + $0xa0] ss:$16 sps:$4 sm:$0xff]  }
  0x98   : > { %597 = vmatprep.subr.bf16.mxu0 %v7097_v5  ;;  %670 = vmatprep.subr.bf16.mxu1 %v7099_v6  ;;  %v7108_v12 = vld [vmem:[%s8188_s10 + $0xa8] ss:$16 sps:$4 sm:$0xff]   ;;  %v7109_v13 = vld [vmem:[%s8188_s10 + $0x84] ss:$16 sps:$4 sm:$0xff]   ;;  %v7111_v14 = vld [vmem:[%s8188_s10 + $0x8c] ss:$16 sps:$4 sm:$0xff]   ;;  %v391_v6 = vlaneseq }
  0x99   : > { %v7113_v15 = vld [vmem:[%s8188_s10 + $0x80] ss:$16 sps:$4 sm:$0xff]   ;;  %v7114_v16 = vld [vmem:[%s8188_s10 + $0x88] ss:$16 sps:$4 sm:$0xff]   ;;  %v7115_v17 = vld [vmem:[%s8188_s10 + $0x64] ss:$16 sps:$4 sm:$0xff]  }
  0x9a   : > { %v7117_v18 = vld [vmem:[%s8188_s10 + $0x6c] ss:$16 sps:$4 sm:$0xff]   ;;  %v7119_v19 = vld [vmem:[%s8188_s10 + $0x60] ss:$16 sps:$4 sm:$0xff]   ;;  %v7120_v20 = vld [vmem:[%s8188_s10 + $0x68] ss:$16 sps:$4 sm:$0xff]  }
  0x9b   : > { %598 = vmatpush1.bf16.msra.mxu0 %v7101_v7  ;;  %671 = vmatpush1.bf16.msra.mxu1 %v7102_v8  ;;  %v7121_v21 = vld [vmem:[%s8188_s10 + $0x44] ss:$16 sps:$4 sm:$0xff]   ;;  %v7123_v22 = vld [vmem:[%s8188_s10 + $0x4c] ss:$16 sps:$4 sm:$0xff]   ;;  %v7125_v23 = vld [vmem:[%s8188_s10 + $0x40] ss:$16 sps:$4 sm:$0xff]  }
  0x9c   : > { %599 = vmatprep.subr.bf16.mxu0 %v7103_v9  ;;  %672 = vmatprep.subr.bf16.mxu1 %v7105_v10  ;;  %v7126_v24 = vld [vmem:[%s8188_s10 + $0x48] ss:$16 sps:$4 sm:$0xff]   ;;  %v7127_v25 = vld [vmem:[%s8188_s10 + $0x24] ss:$16 sps:$4 sm:$0xff]   ;;  %v7129_v26 = vld [vmem:[%s8188_s10 + $0x2c] ss:$16 sps:$4 sm:$0xff]  }
  0x9d   : > { %v7131_v27 = vld [vmem:[%s8188_s10 + $0x20] ss:$16 sps:$4 sm:$0xff]   ;;  %v7132_v28 = vld [vmem:[%s8188_s10 + $0x28] ss:$16 sps:$4 sm:$0xff]   ;;  %v7133_v29 = vld [vmem:[%s8188_s10 + $0x4] ss:$16 sps:$4 sm:$0xff]  }
  0x9e   : > { %v7135_v30 = vld [vmem:[%s8188_s10 + $0xc] ss:$16 sps:$4 sm:$0xff]   ;;  %v7137_v31 = vld [vmem:[%s8188_s10] ss:$16 sps:$4 sm:$0xff]   ;;  %v7138_v32 = vld [vmem:[%s8188_s10 + $0x8] ss:$16 sps:$4 sm:$0xff]  }
  0x9f   : > { %600 = vmatpush1.bf16.msra.mxu0 %v7107_v11  ;;  %673 = vmatpush1.bf16.msra.mxu1 %v7108_v12  ;;  %v8246_v33 = vld [vmem:[%s8195_s9 + $0xe4] ss:$16 sps:$4 sm:$0xff]   ;;  %v8249_v34 = vld [vmem:[%s8195_s9 + $0xec] ss:$16 sps:$4 sm:$0xff]   ;;  %v8252_v36 = vld [vmem:[%s8195_s9 + $0xe0] ss:$16 sps:$4 sm:$0xff]  }
  0xa0   : > { %601 = vmatprep.subr.bf16.mxu0 %v7109_v13  ;;  %674 = vmatprep.subr.bf16.mxu1 %v7111_v14  ;;  %v7139_v35 = vld [vmem:[#allocation4] sm:$0xff]   ;;  %v8255_v37 = vld [vmem:[%s8195_s9 + $0xe8] ss:$16 sps:$4 sm:$0xff]   ;;  %v8263_v39 = vld [vmem:[%s8195_s9 + $0xcc] ss:$16 sps:$4 sm:$0xff]   ;;  %v392_v7 = vshrl.u32 %v391_v6, 7 }
  0xa1   : > { %v8260_v38 = vld [vmem:[%s8195_s9 + $0xc4] ss:$16 sps:$4 sm:$0xff]   ;;  %v8266_v40 = vld [vmem:[%s8195_s9 + $0xc0] ss:$16 sps:$4 sm:$0xff]   ;;  %v8271_v41 = vld [vmem:[%s8195_s9 + $0xc8] ss:$16 sps:$4 sm:$0xff]  }
  0xa2   : > { %v8276_v42 = vld [vmem:[%s8195_s9 + $0xa4] ss:$16 sps:$4 sm:$0xff]   ;;  %v8279_v43 = vld [vmem:[%s8195_s9 + $0xac] ss:$16 sps:$4 sm:$0xff]   ;;  %v8284_v45 = vld [vmem:[%s8195_s9 + $0xa0] ss:$16 sps:$4 sm:$0xff]  }
  0xa3   : > { %602 = vmatpush1.bf16.msra.mxu0 %v7113_v15  ;;  %675 = vmatpush1.bf16.msra.mxu1 %v7114_v16  ;;  %v7152_v44 = vld [vmem:[#allocation4 + $0x8] sm:$0xff]   ;;  %v8292_v47 = vld [vmem:[%s8195_s9 + $0x84] ss:$16 sps:$4 sm:$0xff]   ;;  %v8300_v49 = vld [vmem:[%s8195_s9 + $0x80] ss:$16 sps:$4 sm:$0xff]   ;;  %v393_v8 = vsub.s32 0, %v392_v7 }
  0xa4   : > { %603 = vmatprep.subr.bf16.mxu0 %v7115_v17  ;;  %676 = vmatprep.subr.bf16.mxu1 %v7117_v18  ;;  %v8287_v46 = vld [vmem:[%s8195_s9 + $0xa8] ss:$16 sps:$4 sm:$0xff]   ;;  %v8297_v48 = vld [vmem:[%s8195_s9 + $0x8c] ss:$16 sps:$4 sm:$0xff]   ;;  %v8308_v51 = vld [vmem:[%s8195_s9 + $0x64] ss:$16 sps:$4 sm:$0xff]  }
  0xa5   : > { %v8303_v50 = vld [vmem:[%s8195_s9 + $0x88] ss:$16 sps:$4 sm:$0xff]   ;;  %v8313_v52 = vld [vmem:[%s8195_s9 + $0x6c] ss:$16 sps:$4 sm:$0xff]   ;;  %v7165_v53 = vld [vmem:[#allocation4 + $0x10] sm:$0xff]   ;;  %v401_v9 = vsub.s32 2, %v392_v7 }
  0xa6   : > { %v8318_v54 = vld [vmem:[%s8195_s9 + $0x60] ss:$16 sps:$4 sm:$0xff]   ;;  %v8321_v55 = vld [vmem:[%s8195_s9 + $0x68] ss:$16 sps:$4 sm:$0xff]   ;;  %v8324_v56 = vld [vmem:[%s8195_s9 + $0x44] ss:$16 sps:$4 sm:$0xff]  }
  0xa7   : > { %604 = vmatpush1.bf16.msra.mxu0 %v7119_v19  ;;  %677 = vmatpush1.bf16.msra.mxu1 %v7120_v20  ;;  %v8327_v57 = vld [vmem:[%s8195_s9 + $0x4c] ss:$16 sps:$4 sm:$0xff]   ;;  %v8334_v58 = vld [vmem:[%s8195_s9 + $0x40] ss:$16 sps:$4 sm:$0xff]   ;;  %v8337_v59 = vld [vmem:[%s8195_s9 + $0x48] ss:$16 sps:$4 sm:$0xff]  }
  0xa8   : > { %605 = vmatprep.subr.bf16.mxu0 %v7121_v21  ;;  %678 = vmatprep.subr.bf16.mxu1 %v7123_v22  ;;  %v8340_v60 = vld [vmem:[%s8195_s9 + $0x24] ss:$16 sps:$4 sm:$0xff]   ;;  %v8343_v61 = vld [vmem:[%s8195_s9 + $0x2c] ss:$16 sps:$4 sm:$0xff]   ;;  %v8352_v63 = vld [vmem:[%s8195_s9 + $0x20] ss:$16 sps:$4 sm:$0xff]  }
  0xa9   : > { %v7178_v62 = vld [vmem:[#allocation4 + $0x18] sm:$0xff]   ;;  %v8358_v1 = vld [vmem:[%s8195_s9 + $0x4] ss:$16 sps:$4 sm:$0xff]   ;;  %v8368_v4 = vld [vmem:[%s8195_s9] ss:$16 sps:$4 sm:$0xff]   ;;  %v397_v11 = vsub.s32 1, %v392_v7 }
  0xaa   : > { %v8355_v0 = vld [vmem:[%s8195_s9 + $0x28] ss:$16 sps:$4 sm:$0xff]   ;;  %v8361_v3 = vld [vmem:[%s8195_s9 + $0xc] ss:$16 sps:$4 sm:$0xff]   ;;  %v389_v10 = vld [vmem:[%s8198_s11] sm:$0xf] }
  0xab   : > { %606 = vmatpush1.bf16.msra.mxu0 %v7125_v23  ;;  %679 = vmatpush1.bf16.msra.mxu1 %v7126_v24  ;;  %v8371_v5 = vld [vmem:[%s8195_s9 + $0x8] ss:$16 sps:$4 sm:$0xff]   ;;  %v405_v12 = vsub.s32 3, %v392_v7  ;;  %v8420_v13 = vrot.slane %v389_v10, %v393_v8  ;;  %v8422_v14 = vrot.slane %v389_v10, %v401_v9  ;;  %v8424_v15 = vrot.slane %v389_v10, %v397_v11 }
  0xac   : > { %607 = vmatprep.subr.bf16.mxu0 %v7127_v25  ;;  %680 = vmatprep.subr.bf16.mxu1 %v7129_v26 }
  0xad   : > { %v8426_v16 = vrot.slane %v389_v10, %v405_v12 }
  0xaf   : > { %608 = vmatpush1.bf16.msra.mxu0 %v7131_v27  ;;  %681 = vmatpush1.bf16.msra.mxu1 %v7132_v28 }
  0xb0   : > { %609 = vmatprep.subr.bf16.mxu0 %v7133_v29  ;;  %682 = vmatprep.subr.bf16.mxu1 %v7135_v30 }
  0xb3   : > { %610 = vmatpush1.bf16.msra.mxu0 %v7137_v31  ;;  %683 = vmatpush1.bf16.msra.mxu1 %v7138_v32 }
  0xb4   : > { %969 = vmatprep.subr.bf16.mxu0 %v8246_v33  ;;  %1010 = vmatprep.subr.bf16.mxu1 %v8249_v34 }
  0xb6   : > { %628 = vmatmul.mubr.bf16.vlgmr.msra.gmra.mxu0 %v7139_v35  ;;  %701 = vmatmul.mubr.bf16.vlgmr.msra.gmra.mxu1 %v7139_v35 }
  0xb7   : > { %970 = vmatpush1.bf16.msra.mxu0 %v8252_v36  ;;  %1011 = vmatpush1.bf16.msra.mxu1 %v8255_v37 }
  0xb8   : > { %971 = vmatprep.subr.bf16.mxu0 %v8260_v38  ;;  %1012 = vmatprep.subr.bf16.mxu1 %v8263_v39 }
  0xb9   : > { %637 = vmatprep.mubr.bf16.mxu0 %v9530_v2  ;;  %710 = vmatprep.mubr.bf16.mxu1 %v9530_v2 }
  0xbb   : > { %972 = vmatpush1.bf16.msra.mxu0 %v8266_v40  ;;  %1013 = vmatpush1.bf16.msra.mxu1 %v8271_v41 }
  0xbc   : > { %973 = vmatprep.subr.bf16.mxu0 %v8276_v42  ;;  %1014 = vmatprep.subr.bf16.mxu1 %v8279_v43 }
  0xbe   : > { %638 = vmatmul.mubr.bf16.gmra.mxu0 %v7152_v44  ;;  %711 = vmatmul.mubr.bf16.gmra.mxu1 %v7152_v44 }
  0xbf   : > { %974 = vmatpush1.bf16.msra.mxu0 %v8284_v45  ;;  %1015 = vmatpush1.bf16.msra.mxu1 %v8287_v46 }
  0xc0   : > { %975 = vmatprep.subr.bf16.mxu0 %v8292_v47  ;;  %1016 = vmatprep.subr.bf16.mxu1 %v8297_v48 }
  0xc1   : > { %647 = vmatprep.mubr.bf16.mxu0 %v9530_v2  ;;  %720 = vmatprep.mubr.bf16.mxu1 %v9530_v2 }
  0xc3   : > { %976 = vmatpush1.bf16.msra.mxu0 %v8300_v49  ;;  %1017 = vmatpush1.bf16.msra.mxu1 %v8303_v50 }
  0xc4   : > { %977 = vmatprep.subr.bf16.mxu0 %v8308_v51  ;;  %1018 = vmatprep.subr.bf16.mxu1 %v8313_v52 }
  0xc6   : > { %648 = vmatmul.mubr.bf16.gmra.mxu0 %v7165_v53  ;;  %721 = vmatmul.mubr.bf16.gmra.mxu1 %v7165_v53 }
  0xc7   : > { %978 = vmatpush1.bf16.msra.mxu0 %v8318_v54  ;;  %1019 = vmatpush1.bf16.msra.mxu1 %v8321_v55 }
  0xc8   : > { %979 = vmatprep.subr.bf16.mxu0 %v8324_v56  ;;  %1020 = vmatprep.subr.bf16.mxu1 %v8327_v57 }
  0xc9   : > { %657 = vmatprep.mubr.bf16.mxu0 %v9530_v2  ;;  %730 = vmatprep.mubr.bf16.mxu1 %v9530_v2 }
  0xcb   : > { %980 = vmatpush1.bf16.msra.mxu0 %v8334_v58  ;;  %1021 = vmatpush1.bf16.msra.mxu1 %v8337_v59 }
  0xcc   : > { %981 = vmatprep.subr.bf16.mxu0 %v8340_v60  ;;  %1022 = vmatprep.subr.bf16.mxu1 %v8343_v61 }
  0xce   : > { %658 = vmatmul.mubr.bf16.gmra.mxu0 %v7178_v62  ;;  %731 = vmatmul.mubr.bf16.gmra.mxu1 %v7178_v62 }
  0xcf   : > { %982 = vmatpush1.bf16.msra.mxu0 %v8352_v63  ;;  %1023 = vmatpush1.bf16.msra.mxu1 %v8355_v0 }
  0xd0   : > { %983 = vmatprep.subr.bf16.mxu0 %v8358_v1  ;;  %1024 = vmatprep.subr.bf16.mxu1 %v8361_v3 }
  0xd1   : > { %1001 = vmatprep.mubr.bf16.mxu0 %v9530_v2  ;;  %1042 = vmatprep.mubr.bf16.mxu1 %v9530_v2 }
  0xd3   : > { %984 = vmatpush1.bf16.msra.mxu0 %v8368_v4  ;;  %1025 = vmatpush1.bf16.msra.mxu1 %v8371_v5 }
  0xd4   : > { %1278 = vmatprep.subr.bf16.mxu0 %v8246_v33  ;;  %1319 = vmatprep.subr.bf16.mxu1 %v8249_v34 }
  0xd6   : > { %1002 = vmatmul.mubr.bf16.vlgmr.msra.gmra.mxu0 %v9530_v2  ;;  %1043 = vmatmul.mubr.bf16.vlgmr.msra.gmra.mxu1 %v9530_v2 }
  0xd7   : > { %1279 = vmatpush1.bf16.msra.mxu0 %v8252_v36  ;;  %1320 = vmatpush1.bf16.msra.mxu1 %v8255_v37 }
  0xd8   : > { %1280 = vmatprep.subr.bf16.mxu0 %v8260_v38  ;;  %1321 = vmatprep.subr.bf16.mxu1 %v8263_v39 }
  0xd9   : > { %1310 = vmatprep.mubr.bf16.mxu0 %v9530_v2  ;;  %1351 = vmatprep.mubr.bf16.mxu1 %v9530_v2 }
  0xdb   : > { %1281 = vmatpush1.bf16.msra.mxu0 %v8266_v40  ;;  %1322 = vmatpush1.bf16.msra.mxu1 %v8271_v41 }
  0xdc   : > { %1282 = vmatprep.subr.bf16.mxu0 %v8276_v42  ;;  %1323 = vmatprep.subr.bf16.mxu1 %v8279_v43 }
  0xdf   : > { %1283 = vmatpush1.bf16.msra.mxu0 %v8284_v45  ;;  %1324 = vmatpush1.bf16.msra.mxu1 %v8287_v46 }
  0xe0   : > { %1284 = vmatprep.subr.bf16.mxu0 %v8292_v47  ;;  %1325 = vmatprep.subr.bf16.mxu1 %v8297_v48 }
  0xe3   : > { %1285 = vmatpush1.bf16.msra.mxu0 %v8300_v49  ;;  %1326 = vmatpush1.bf16.msra.mxu1 %v8303_v50 }
  0xe4   : > { %1286 = vmatprep.subr.bf16.mxu0 %v8308_v51  ;;  %1327 = vmatprep.subr.bf16.mxu1 %v8313_v52 }
  0xe7   : > { %1287 = vmatpush1.bf16.msra.mxu0 %v8318_v54  ;;  %1328 = vmatpush1.bf16.msra.mxu1 %v8321_v55 }
  0xe8   : > { %1288 = vmatprep.subr.bf16.mxu0 %v8324_v56  ;;  %1329 = vmatprep.subr.bf16.mxu1 %v8327_v57 }
  0xeb   : > { %1289 = vmatpush1.bf16.msra.mxu0 %v8334_v58  ;;  %1330 = vmatpush1.bf16.msra.mxu1 %v8337_v59 }
  0xec   : > { %1290 = vmatprep.subr.bf16.mxu0 %v8340_v60  ;;  %1331 = vmatprep.subr.bf16.mxu1 %v8343_v61 }
  0xef   : > { %1291 = vmatpush1.bf16.msra.mxu0 %v8352_v63  ;;  %1332 = vmatpush1.bf16.msra.mxu1 %v8355_v0 }
  0xf0   : > { %1292 = vmatprep.subr.bf16.mxu0 %v8358_v1  ;;  %1333 = vmatprep.subr.bf16.mxu1 %v8361_v3 }
  0xf3   : > { %1293 = vmatpush1.bf16.msra.mxu0 %v8368_v4  ;;  %1334 = vmatpush1.bf16.msra.mxu1 %v8371_v5 }
  0xf4   : > { %1588 = vmatprep.subr.bf16.mxu0 %v8246_v33  ;;  %1629 = vmatprep.subr.bf16.mxu1 %v8249_v34 }
 0x176   : > { %v629_v17 = vpop.f32.mrf.mxu0  ;;  %v702_v18 = vpop.f32.mrf.mxu1 }
 0x177   : > { %v8429_v19 = vadd.f32 %v629_v17, %v8420_v13  ;;  %v8432_v20 = vadd.f32 %v702_v18, %v8422_v14 }
 0x178   : > { %v631_v21 = vpop.f32.mrf.mxu0  ;;  %v704_v22 = vpop.f32.mrf.mxu1 }
 0x179   : > { %v8435_v23 = vadd.f32 %v631_v21, %v8424_v15  ;;  %v8438_v24 = vadd.f32 %v704_v22, %v8426_v16 }
 0x17a   : > { %v633_v25 = vpop.f32.mrf.mxu0  ;;  %v706_v26 = vpop.f32.mrf.mxu1 }
 0x17b   : > { %v8441_v27 = vadd.f32 %v633_v25, %v8420_v13  ;;  %v8444_v28 = vadd.f32 %v706_v26, %v8422_v14 }
 0x17c   : > { %v635_v29 = vpop.f32.mrf.mxu0  ;;  %v708_v30 = vpop.f32.mrf.mxu1 }
 0x17d   : > { %v8447_v31 = vadd.f32 %v635_v29, %v8424_v15  ;;  %v8450_v32 = vadd.f32 %v708_v30, %v8426_v16 }
 0x17e   : > { %v639_v33 = vpop.f32.mrf.mxu0  ;;  %v712_v34 = vpop.f32.mrf.mxu1 }
 0x17f   : > { %v8453_v35 = vadd.f32 %v639_v33, %v8420_v13  ;;  %v8456_v44 = vadd.f32 %v712_v34, %v8422_v14 }
 0x180   : > { %v641_v53 = vpop.f32.mrf.mxu0  ;;  %v714_v62 = vpop.f32.mrf.mxu1 }
 0x181   : > { %v8459_v6 = vadd.f32 %v641_v53, %v8424_v15  ;;  %v8462_v7 = vadd.f32 %v714_v62, %v8426_v16 }
 0x182   : > { %v643_v8 = vpop.f32.mrf.mxu0  ;;  %v716_v9 = vpop.f32.mrf.mxu1 }
 0x183   : > { %v8465_v10 = vadd.f32 %v643_v8, %v8420_v13  ;;  %v8468_v11 = vadd.f32 %v716_v9, %v8422_v14 }
 0x184   : > { %v645_v12 = vpop.f32.mrf.mxu0  ;;  %v718_v17 = vpop.f32.mrf.mxu1 }
 0x185   : > { %v8471_v18 = vadd.f32 %v645_v12, %v8424_v15  ;;  %v8474_v21 = vadd.f32 %v718_v17, %v8426_v16 }
 0x186   : > { %v649_v22 = vpop.f32.mrf.mxu0  ;;  %v722_v25 = vpop.f32.mrf.mxu1 }
 0x187   : > { %v650_v26 = vadd.f32 %v649_v22, %v8420_v13  ;;  %v723_v29 = vadd.f32 %v722_v25, %v8422_v14 }
 0x188   : > { %v651_v30 = vpop.f32.mrf.mxu0  ;;  %v724_v33 = vpop.f32.mrf.mxu1 }
 0x189   : > { %757 = vst [vmem:[#allocation3 + $0x38] sm:$0xff] %v650_v26  ;;  %759 = vst [vmem:[#allocation3 + $0x40] sm:$0xff] %v723_v29  ;;  %v652_v34 = vadd.f32 %v651_v30, %v8424_v15  ;;  %v725_v53 = vadd.f32 %v724_v33, %v8426_v16 }
 0x18a   : > { %v653_v62 = vpop.f32.mrf.mxu0  ;;  %v726_v8 = vpop.f32.mrf.mxu1 }
 0x18b   : > { %758 = vst [vmem:[#allocation3 + $0x58] sm:$0xff] %v652_v34  ;;  %760 = vst [vmem:[#allocation3 + $0xc8] sm:$0xff] %v725_v53  ;;  %v654_v9 = vadd.f32 %v653_v62, %v8420_v13  ;;  %v727_v12 = vadd.f32 %v726_v8, %v8422_v14 }
 0x18c   : > { %v655_v17 = vpop.f32.mrf.mxu0  ;;  %v728_v22 = vpop.f32.mrf.mxu1 }
 0x18d   : > { %761 = vst [vmem:[#allocation3 + $0xe0] sm:$0xff] %v654_v9  ;;  %763 = vst [vmem:[#allocation3 + $0x70] sm:$0xff] %v727_v12  ;;  %v656_v25 = vadd.f32 %v655_v17, %v8424_v15  ;;  %v729_v26 = vadd.f32 %v728_v22, %v8426_v16 }
 0x18e   : > { %v659_v29 = vpop.f32.mrf.mxu0  ;;  %v732_v30 = vpop.f32.mrf.mxu1 }
 0x18f   : > { %762 = vst [vmem:[#allocation3 + $0x90] sm:$0xff] %v656_v25  ;;  %764 = vst [vmem:[#allocation3 + $0xc0] sm:$0xff] %v729_v26  ;;  %v660_v33 = vadd.f32 %v659_v29, %v8420_v13  ;;  %v733_v34 = vadd.f32 %v732_v30, %v8422_v14 }
 0x190   : > { %v661_v53 = vpop.f32.mrf.mxu0  ;;  %v734_v62 = vpop.f32.mrf.mxu1 }
 0x191   : > { %765 = vst [vmem:[#allocation3 + $0xa8] sm:$0xff] %v660_v33  ;;  %767 = vst [vmem:[#allocation3 + $0x10] sm:$0xff] %v733_v34  ;;  %v662_v8 = vadd.f32 %v661_v53, %v8424_v15  ;;  %v735_v9 = vadd.f32 %v734_v62, %v8426_v16 }
 0x192   : > { %v663_v12 = vpop.f32.mrf.mxu0  ;;  %v736_v17 = vpop.f32.mrf.mxu1 }
 0x193   : > { %766 = vst [vmem:[#allocation3 + $0xd0] sm:$0xff] %v662_v8  ;;  %768 = vst [vmem:[#allocation3 + $0x28] sm:$0xff] %v735_v9  ;;  %v664_v22 = vadd.f32 %v663_v12, %v8420_v13  ;;  %v737_v25 = vadd.f32 %v736_v17, %v8422_v14 }
 0x194   : > { %v665_v26 = vpop.f32.mrf.mxu0  ;;  %v738_v29 = vpop.f32.mrf.mxu1 }
 0x195   : > { %769 = vst [vmem:[#allocation3 + $0xa0] sm:$0xff] %v664_v22  ;;  %771 = vst [vmem:[#allocation3 + $0x20] sm:$0xff] %v737_v25  ;;  %v666_v30 = vadd.f32 %v665_v26, %v8424_v15  ;;  %v739_v33 = vadd.f32 %v738_v29, %v8426_v16 }
 0x196   : > { %v1003_v34 = vpop.f32.mrf.mxu0  ;;  %v1044_v53 = vpop.f32.mrf.mxu1 }
 0x197   : > { %770 = vst [vmem:[#allocation3 + $0xf8] sm:$0xff] %v666_v30  ;;  %772 = vst [vmem:[#allocation3 + $0x98] sm:$0xff] %v739_v33  ;;  %v1051_v62 = vadd.f32 %v1003_v34, %v8429_v19  ;;  %v1053_v15 = vadd.f32 %v1044_v53, %v8432_v20 }
 0x198   : > { %v1005_v8 = vpop.f32.mrf.mxu0  ;;  %v1046_v9 = vpop.f32.mrf.mxu1 }
 0x199   : > { %v6439_v2 = vmul.f32 -1.442695, %v1051_v62  ;;  %v1052_v13 = vadd.f32 %v1005_v8, %v8435_v23  ;;  %v6441_v16 = vmul.f32 -1.442695, %v1053_v15  ;;  %v1054_v29 = vadd.f32 %v1046_v9, %v8438_v24 }
 0x19a   : > { %v1007_v14 = vpop.f32.mrf.mxu0  ;;  %v1048_v12 = vpop.f32.mrf.mxu1 }
 0x19b   : > { %7275 = vpow2.f32 %v6439_v2  ;;  %v6440_v17 = vmul.f32 -1.442695, %v1052_v13 }
 0x19c   : > { %v1008_v22 = vpop.f32.mrf.mxu0  ;;  %v1049_v25 = vpop.f32.mrf.mxu1 }
 0x19d   : > { %7277 = vpow2.f32 %v6440_v17  ;;  %v9560_v17 = vmov 0  }
 0x19e   : > { %7279 = vpow2.f32 %v6441_v16 }
 0x1a8   : > { %v7276_v26 = vpop.eup %7275 }
 0x1a9   : > { %v1064_v30 = vadd.f32 1.0, %v7276_v26 }
 0x1aa   : > { %v7278_v19 = vpop.eup %7277 }
 0x1ab   : > { %7281 = vrcp.f32 %v1064_v30  ;;  %v1065_v33 = vadd.f32 1.0, %v7278_v19  ;;  %v7280_v23 = vpop.eup %7279  ;;  %v8545_v30 = vld [vmem:[%s8195_s9 + $0xec] ss:$16 sps:$4 sm:$0xff]   ;;  %v8548_v19 = vld [vmem:[%s8195_s9 + $0xe0] ss:$16 sps:$4 sm:$0xff]  }
 0x1ac   : > { %7283 = vtanh.f32 %v1054_v29  ;;  %v1066_v8 = vadd.f32 1.0, %v7280_v23  ;;  %v8542_v29 = vld [vmem:[%s8195_s9 + $0xe4] ss:$16 sps:$4 sm:$0xff]  }
 0x1ad   : > { %7285 = vrcp.f32 %v1065_v33  ;;  %v8551_v33 = vld [vmem:[%s8195_s9 + $0xe8] ss:$16 sps:$4 sm:$0xff]   ;;  %v8558_v23 = vld [vmem:[%s8195_s9 + $0xc4] ss:$16 sps:$4 sm:$0xff]  }
 0x1ae   : > { %7287 = vrcp.f32 %v1066_v8  ;;  %v8574_v8 = vld [vmem:[%s8195_s9 + $0xa4] ss:$16 sps:$4 sm:$0xff]  }
 0x1b8   : > { %v7282_v34 = vpop.eup %7281 }
 0x1b9   : > { %v7284_v2 = vpop.eup %7283 }
 0x1ba   : > { %v7286_v62 = vpop.eup %7285  ;;  %v1075_v14 = vmul.f32 %v7284_v2, %v7282_v34  ;;  %v8561_v34 = vld [vmem:[%s8195_s9 + $0xcc] ss:$16 sps:$4 sm:$0xff]   ;;  %v8564_v2 = vld [vmem:[%s8195_s9 + $0xc0] ss:$16 sps:$4 sm:$0xff]  }
 0x1bb   : > { %v1074_v13 = vmul.f32 0.0, %v7286_v62  ;;  %v7288_v20 = vpop.eup %7287  ;;  %v8567_v62 = vld [vmem:[%s8195_s9 + $0xc8] ss:$16 sps:$4 sm:$0xff]  }
 0x1bd   : > { %v8496_v12 = vadd.f32 %v1075_v14, %v1074_v13  ;;  %v8577_v13 = vld [vmem:[%s8195_s9 + $0xac] ss:$16 sps:$4 sm:$0xff]   ;;  %v8580_v14 = vld [vmem:[%s8195_s9 + $0xa0] ss:$16 sps:$4 sm:$0xff]  }
 0x1bf   : > { %7289 = vtanh.f32 %v8496_v12 }
 0x1cc   : > { %v7290_v24 = vpop.eup %7289 }
 0x1cd   : > { %v1078_v53 = vmul.f32 %v7290_v24, %v7288_v20  ;;  %v8590_v20 = vld [vmem:[%s8195_s9 + $0x84] ss:$16 sps:$4 sm:$0xff]   ;;  %v8593_v24 = vld [vmem:[%s8195_s9 + $0x8c] ss:$16 sps:$4 sm:$0xff]  }
 0x1cf   : > { %v1079_v9 = vpack.c.bf16 %v1078_v53, %v1078_v53  ;;  %v8596_v53 = vld [vmem:[%s8195_s9 + $0x80] ss:$16 sps:$4 sm:$0xff]  }
 0x1d1   : > { %1080 = vst [vmem:[#allocation2] sm:$0xf] %v1079_v9  ;;  %1311 = vmatmul.mubr.bf16.vlgmr.msra.gmra.mxu0 %v1079_v9  ;;  %1352 = vmatmul.mubr.bf16.vlgmr.msra.gmra.mxu1 %v1079_v9  ;;  %v8599_v9 = vld [vmem:[%s8195_s9 + $0x88] ss:$16 sps:$4 sm:$0xff]  }
 0x1d2   : > { %1589 = vmatpush1.bf16.msra.mxu0 %v8252_v36  ;;  %1630 = vmatpush1.bf16.msra.mxu1 %v8255_v37 }
 0x1d3   : > { %1590 = vmatprep.subr.bf16.mxu0 %v8260_v38  ;;  %1631 = vmatprep.subr.bf16.mxu1 %v8263_v39 }
 0x1d4   : > { %1620 = vmatprep.mubr.bf16.mxu0 %v9560_v17  ;;  %1661 = vmatprep.mubr.bf16.mxu1 %v9560_v17 }
 0x1d6   : > { %1591 = vmatpush1.bf16.msra.mxu0 %v8266_v40  ;;  %1632 = vmatpush1.bf16.msra.mxu1 %v8271_v41 }
 0x1d7   : > { %1592 = vmatprep.subr.bf16.mxu0 %v8276_v42  ;;  %1633 = vmatprep.subr.bf16.mxu1 %v8279_v43 }
 0x1da   : > { %1593 = vmatpush1.bf16.msra.mxu0 %v8284_v45  ;;  %1634 = vmatpush1.bf16.msra.mxu1 %v8287_v46 }
 0x1db   : > { %1594 = vmatprep.subr.bf16.mxu0 %v8292_v47  ;;  %1635 = vmatprep.subr.bf16.mxu1 %v8297_v48 }
 0x1de   : > { %1595 = vmatpush1.bf16.msra.mxu0 %v8300_v49  ;;  %1636 = vmatpush1.bf16.msra.mxu1 %v8303_v50 }
 0x1df   : > { %1596 = vmatprep.subr.bf16.mxu0 %v8308_v51  ;;  %1637 = vmatprep.subr.bf16.mxu1 %v8313_v52 }
 0x1e2   : > { %1597 = vmatpush1.bf16.msra.mxu0 %v8318_v54  ;;  %1638 = vmatpush1.bf16.msra.mxu1 %v8321_v55 }
 0x1e3   : > { %1598 = vmatprep.subr.bf16.mxu0 %v8324_v56  ;;  %1639 = vmatprep.subr.bf16.mxu1 %v8327_v57 }
 0x1e6   : > { %1599 = vmatpush1.bf16.msra.mxu0 %v8334_v58  ;;  %1640 = vmatpush1.bf16.msra.mxu1 %v8337_v59 }
 0x1e7   : > { %1600 = vmatprep.subr.bf16.mxu0 %v8340_v60  ;;  %1641 = vmatprep.subr.bf16.mxu1 %v8343_v61 }
 0x1ea   : > { %1601 = vmatpush1.bf16.msra.mxu0 %v8352_v63  ;;  %1642 = vmatpush1.bf16.msra.mxu1 %v8355_v0 }
 0x1eb   : > { %1602 = vmatprep.subr.bf16.mxu0 %v8358_v1  ;;  %1643 = vmatprep.subr.bf16.mxu1 %v8361_v3 }
 0x1ee   : > { %1603 = vmatpush1.bf16.msra.mxu0 %v8368_v4  ;;  %1644 = vmatpush1.bf16.msra.mxu1 %v8371_v5 }
 0x1ef   : > { %1898 = vmatprep.subr.bf16.mxu0 %v8542_v29  ;;  %1939 = vmatprep.subr.bf16.mxu1 %v8545_v30 }
 0x291   : > { %v1312_v36 = vpop.f32.mrf.mxu0  ;;  %v1353_v37 = vpop.f32.mrf.mxu1 }
 0x292   : > { %v1360_v38 = vadd.f32 %v1312_v36, %v8441_v27  ;;  %v1362_v49 = vadd.f32 %v1353_v37, %v8444_v28  ;;  %v8604_v36 = vld [vmem:[%s8195_s9 + $0x64] ss:$16 sps:$4 sm:$0xff]   ;;  %v8607_v37 = vld [vmem:[%s8195_s9 + $0x6c] ss:$16 sps:$4 sm:$0xff]  }
 0x293   : > { %v1314_v39 = vpop.f32.mrf.mxu0  ;;  %v1355_v40 = vpop.f32.mrf.mxu1 }
 0x294   : > { %v6474_v41 = vmul.f32 -1.442695, %v1360_v38  ;;  %v1361_v42 = vadd.f32 %v1314_v39, %v8447_v31  ;;  %v6476_v50 = vmul.f32 -1.442695, %v1362_v49  ;;  %v1363_v52 = vadd.f32 %v1355_v40, %v8450_v32  ;;  %v8612_v38 = vld [vmem:[%s8195_s9 + $0x60] ss:$16 sps:$4 sm:$0xff]  }
 0x295   : > { %v1316_v43 = vpop.f32.mrf.mxu0  ;;  %v1357_v45 = vpop.f32.mrf.mxu1  ;;  %v8615_v39 = vld [vmem:[%s8195_s9 + $0x68] ss:$16 sps:$4 sm:$0xff]   ;;  %v8620_v40 = vld [vmem:[%s8195_s9 + $0x44] ss:$16 sps:$4 sm:$0xff]  }
 0x296   : > { %7291 = vpow2.f32 %v6474_v41  ;;  %v6475_v46 = vmul.f32 -1.442695, %v1361_v42  ;;  %v8623_v41 = vld [vmem:[%s8195_s9 + $0x4c] ss:$16 sps:$4 sm:$0xff]   ;;  %v8628_v42 = vld [vmem:[%s8195_s9 + $0x40] ss:$16 sps:$4 sm:$0xff]  }
 0x297   : > { %v1317_v47 = vpop.f32.mrf.mxu0  ;;  %v1358_v48 = vpop.f32.mrf.mxu1  ;;  %v8631_v43 = vld [vmem:[%s8195_s9 + $0x48] ss:$16 sps:$4 sm:$0xff]  }
 0x298   : > { %7293 = vpow2.f32 %v6475_v46 }
 0x299   : > { %7295 = vpow2.f32 %v6476_v50 }
 0x2a3   : > { %v7292_v51 = vpop.eup %7291 }
 0x2a4   : > { %v1373_v54 = vadd.f32 1.0, %v7292_v51 }
 0x2a5   : > { %v7294_v55 = vpop.eup %7293 }
 0x2a6   : > { %7297 = vrcp.f32 %v1373_v54  ;;  %v1374_v56 = vadd.f32 1.0, %v7294_v55  ;;  %v7296_v57 = vpop.eup %7295 }
 0x2a7   : > { %7299 = vtanh.f32 %v1363_v52  ;;  %v1375_v31 = vadd.f32 1.0, %v7296_v57 }
 0x2a8   : > { %7301 = vrcp.f32 %v1374_v56 }
 0x2a9   : > { %7303 = vrcp.f32 %v1375_v31 }
 0x2b3   : > { %v7298_v58 = vpop.eup %7297 }
 0x2b4   : > { %v7300_v59 = vpop.eup %7299 }
 0x2b5   : > { %v7302_v27 = vpop.eup %7301  ;;  %v1384_v22 = vmul.f32 %v7300_v59, %v7298_v58 }
 0x2b6   : > { %v1383_v28 = vmul.f32 %v7302_v27, %v8496_v12  ;;  %v7304_v25 = vpop.eup %7303  ;;  %v8583_v12 = vld [vmem:[%s8195_s9 + $0xa8] ss:$16 sps:$4 sm:$0xff]  }
 0x2b8   : > { %v8536_v32 = vadd.f32 %v1384_v22, %v1383_v28 }
 0x2ba   : > { %7305 = vtanh.f32 %v8536_v32 }
 0x2c7   : > { %v7306_v15 = vpop.eup %7305 }
 0x2c8   : > { %v1387_v16 = vmul.f32 %v7306_v15, %v7304_v25  ;;  %v8683_v15 = vld [vmem:[%s8195_s9 + $0x24] ss:$16 sps:$4 sm:$0xff]  }
 0x2ca   : > { %v1388_v26 = vpack.c.bf16 %v1387_v16, %v1387_v16  ;;  %v8686_v16 = vld [vmem:[%s8195_s9 + $0x28] ss:$16 sps:$4 sm:$0xff]  }
 0x2cc   : > { %1390 = vst [vmem:[#allocation2 + $0x4] sm:$0xf] %v1388_v26  ;;  %1621 = vmatmul.mubr.bf16.vlgmr.msra.gmra.mxu0 %v1388_v26  ;;  %1662 = vmatmul.mubr.bf16.vlgmr.msra.gmra.mxu1 %v1388_v26  ;;  %v8689_v26 = vld [vmem:[%s8195_s9 + $0x2c] ss:$16 sps:$4 sm:$0xff]  }
 0x2cd   : > { %1930 = vmatprep.mubr.bf16.mxu0 %v9560_v17  ;;  %1971 = vmatprep.mubr.bf16.mxu1 %v9560_v17 }
 0x2ce   : > { %1899 = vmatpush1.bf16.msra.mxu0 %v8548_v19  ;;  %1940 = vmatpush1.bf16.msra.mxu1 %v8551_v33 }
 0x2cf   : > { %1900 = vmatprep.subr.bf16.mxu0 %v8558_v23  ;;  %1941 = vmatprep.subr.bf16.mxu1 %v8561_v34 }
 0x2d2   : > { %1901 = vmatpush1.bf16.msra.mxu0 %v8564_v2  ;;  %1942 = vmatpush1.bf16.msra.mxu1 %v8567_v62 }
 0x2d3   : > { %1902 = vmatprep.subr.bf16.mxu0 %v8574_v8  ;;  %1943 = vmatprep.subr.bf16.mxu1 %v8577_v13 }
 0x2d6   : > { %1903 = vmatpush1.bf16.msra.mxu0 %v8580_v14  ;;  %1944 = vmatpush1.bf16.msra.mxu1 %v8583_v12 }
 0x2d7   : > { %1904 = vmatprep.subr.bf16.mxu0 %v8590_v20  ;;  %1945 = vmatprep.subr.bf16.mxu1 %v8593_v24 }
 0x2da   : > { %1905 = vmatpush1.bf16.msra.mxu0 %v8596_v53  ;;  %1946 = vmatpush1.bf16.msra.mxu1 %v8599_v9 }
 0x2db   : > { %1906 = vmatprep.subr.bf16.mxu0 %v8604_v36  ;;  %1947 = vmatprep.subr.bf16.mxu1 %v8607_v37 }
 0x2de   : > { %1907 = vmatpush1.bf16.msra.mxu0 %v8612_v38  ;;  %1948 = vmatpush1.bf16.msra.mxu1 %v8615_v39 }
 0x2df   : > { %1908 = vmatprep.subr.bf16.mxu0 %v8620_v40  ;;  %1949 = vmatprep.subr.bf16.mxu1 %v8623_v41 }
 0x2e2   : > { %1909 = vmatpush1.bf16.msra.mxu0 %v8628_v42  ;;  %1950 = vmatpush1.bf16.msra.mxu1 %v8631_v43 }
 0x2e3   : > { %1910 = vmatprep.subr.bf16.mxu0 %v8340_v60  ;;  %1951 = vmatprep.subr.bf16.mxu1 %v8343_v61 }
 0x2e6   : > { %1911 = vmatpush1.bf16.msra.mxu0 %v8352_v63  ;;  %1952 = vmatpush1.bf16.msra.mxu1 %v8355_v0 }
 0x2e7   : > { %1912 = vmatprep.subr.bf16.mxu0 %v8358_v1  ;;  %1953 = vmatprep.subr.bf16.mxu1 %v8361_v3 }
 0x2ea   : > { %1913 = vmatpush1.bf16.msra.mxu0 %v8368_v4  ;;  %1954 = vmatpush1.bf16.msra.mxu1 %v8371_v5 }
 0x2eb   : > { %2208 = vmatprep.subr.bf16.mxu0 %v8542_v29  ;;  %2249 = vmatprep.subr.bf16.mxu1 %v8545_v30 }
 0x38c   : > { %v1622_v45 = vpop.f32.mrf.mxu0  ;;  %v1663_v60 = vpop.f32.mrf.mxu1 }
 0x38d   : > { %v1670_v61 = vadd.f32 %v1622_v45, %v8453_v35  ;;  %v1672_v5 = vadd.f32 %v1663_v60, %v8456_v44  ;;  %v8692_v45 = vld [vmem:[%s8195_s9 + $0x4] ss:$16 sps:$4 sm:$0xff]   ;;  %v8696_v60 = vld [vmem:[%s8195_s9 + $0xc] ss:$16 sps:$4 sm:$0xff]  }
 0x38e   : > { %v1624_v46 = vpop.f32.mrf.mxu0  ;;  %v1665_v63 = vpop.f32.mrf.mxu1 }
 0x38f   : > { %v6509_v47 = vmul.f32 -1.442695, %v1670_v61  ;;  %v1671_v0 = vadd.f32 %v1624_v46, %v8459_v6  ;;  %v6511_v50 = vmul.f32 -1.442695, %v1672_v5  ;;  %v1673_v52 = vadd.f32 %v1665_v63, %v8462_v7  ;;  %v8701_v61 = vld [vmem:[%s8195_s9] ss:$16 sps:$4 sm:$0xff]  }
 0x390   : > { %v1626_v1 = vpop.f32.mrf.mxu0  ;;  %v1667_v48 = vpop.f32.mrf.mxu1  ;;  %v8706_v46 = vld [vmem:[%s8195_s9 + $0x8] ss:$16 sps:$4 sm:$0xff]  }
 0x391   : > { %7307 = vpow2.f32 %v6509_v47  ;;  %v6510_v3 = vmul.f32 -1.442695, %v1671_v0 }
 0x392   : > { %v1627_v4 = vpop.f32.mrf.mxu0  ;;  %v1668_v49 = vpop.f32.mrf.mxu1 }
 0x393   : > { %7309 = vpow2.f32 %v6510_v3 }
 0x394   : > { %7311 = vpow2.f32 %v6511_v50 }
 0x39e   : > { %v7308_v51 = vpop.eup %7307 }
 0x39f   : > { %v1683_v54 = vadd.f32 1.0, %v7308_v51 }
 0x3a0   : > { %v7310_v35 = vpop.eup %7309 }
 0x3a1   : > { %7313 = vrcp.f32 %v1683_v54  ;;  %v1684_v55 = vadd.f32 1.0, %v7310_v35  ;;  %v7312_v6 = vpop.eup %7311 }
 0x3a2   : > { %7315 = vtanh.f32 %v1673_v52  ;;  %v1685_v59 = vadd.f32 1.0, %v7312_v6 }
 0x3a3   : > { %7317 = vrcp.f32 %v1684_v55 }
 0x3a4   : > { %7319 = vrcp.f32 %v1685_v59 }
 0x3ae   : > { %v7314_v56 = vpop.eup %7313 }
 0x3af   : > { %v7316_v57 = vpop.eup %7315 }
 0x3b0   : > { %v7318_v58 = vpop.eup %7317  ;;  %v1694_v31 = vmul.f32 %v7316_v57, %v7314_v56 }
 0x3b1   : > { %v1693_v27 = vmul.f32 %v7318_v58, %v8536_v32  ;;  %v7320_v7 = vpop.eup %7319  ;;  %v8680_v32 = vld [vmem:[%s8195_s9 + $0x20] ss:$16 sps:$4 sm:$0xff]  }
 0x3b3   : > { %v8652_v44 = vadd.f32 %v1694_v31, %v1693_v27 }
 0x3b5   : > { %7321 = vtanh.f32 %v8652_v44 }
 0x3c2   : > { %v7322_v28 = vpop.eup %7321 }
 0x3c3   : > { %v1697_v22 = vmul.f32 %v7322_v28, %v7320_v7 }
 0x3c5   : > { %v1698_v25 = vpack.c.bf16 %v1697_v22, %v1697_v22 }
 0x3c7   : > { %1700 = vst [vmem:[#allocation2 + $0x8] sm:$0xf] %v1698_v25  ;;  %1931 = vmatmul.mubr.bf16.vlgmr.msra.gmra.mxu0 %v1698_v25  ;;  %1972 = vmatmul.mubr.bf16.vlgmr.msra.gmra.mxu1 %v1698_v25 }
 0x3c8   : > { %2209 = vmatpush1.bf16.msra.mxu0 %v8548_v19  ;;  %2250 = vmatpush1.bf16.msra.mxu1 %v8551_v33 }
 0x3c9   : > { %2210 = vmatprep.subr.bf16.mxu0 %v8558_v23  ;;  %2251 = vmatprep.subr.bf16.mxu1 %v8561_v34 }
 0x3ca   : > { %2240 = vmatprep.mubr.bf16.mxu0 %v9560_v17  ;;  %2281 = vmatprep.mubr.bf16.mxu1 %v9560_v17 }
 0x3cc   : > { %2211 = vmatpush1.bf16.msra.mxu0 %v8564_v2  ;;  %2252 = vmatpush1.bf16.msra.mxu1 %v8567_v62 }
 0x3cd   : > { %2212 = vmatprep.subr.bf16.mxu0 %v8574_v8  ;;  %2253 = vmatprep.subr.bf16.mxu1 %v8577_v13 }
 0x3d0   : > { %2213 = vmatpush1.bf16.msra.mxu0 %v8580_v14  ;;  %2254 = vmatpush1.bf16.msra.mxu1 %v8583_v12 }
 0x3d1   : > { %2214 = vmatprep.subr.bf16.mxu0 %v8590_v20  ;;  %2255 = vmatprep.subr.bf16.mxu1 %v8593_v24 }
 0x3d4   : > { %2215 = vmatpush1.bf16.msra.mxu0 %v8596_v53  ;;  %2256 = vmatpush1.bf16.msra.mxu1 %v8599_v9 }
 0x3d5   : > { %2216 = vmatprep.subr.bf16.mxu0 %v8604_v36  ;;  %2257 = vmatprep.subr.bf16.mxu1 %v8607_v37 }
 0x3d8   : > { %2217 = vmatpush1.bf16.msra.mxu0 %v8612_v38  ;;  %2258 = vmatpush1.bf16.msra.mxu1 %v8615_v39 }
 0x3d9   : > { %2218 = vmatprep.subr.bf16.mxu0 %v8620_v40  ;;  %2259 = vmatprep.subr.bf16.mxu1 %v8623_v41 }
 0x3dc   : > { %2219 = vmatpush1.bf16.msra.mxu0 %v8628_v42  ;;  %2260 = vmatpush1.bf16.msra.mxu1 %v8631_v43 }
 0x3dd   : > { %2220 = vmatprep.subr.bf16.mxu0 %v8683_v15  ;;  %2261 = vmatprep.subr.bf16.mxu1 %v8689_v26 }
 0x3e0   : > { %2221 = vmatpush1.bf16.msra.mxu0 %v8680_v32  ;;  %2262 = vmatpush1.bf16.msra.mxu1 %v8686_v16 }
 0x3e1   : > { %2222 = vmatprep.subr.bf16.mxu0 %v8692_v45  ;;  %2263 = vmatprep.subr.bf16.mxu1 %v8696_v60 }
 0x3e4   : > { %2223 = vmatpush1.bf16.msra.mxu0 %v8701_v61  ;;  %2264 = vmatpush1.bf16.msra.mxu1 %v8706_v46 }
 0x3e5   : > { %2518 = vmatprep.subr.bf16.mxu0 %v8542_v29  ;;  %2559 = vmatprep.subr.bf16.mxu1 %v8545_v30 }
 0x487   : > { %v1932_v63 = vpop.f32.mrf.mxu0  ;;  %v1973_v47 = vpop.f32.mrf.mxu1 }
 0x488   : > { %v1980_v0 = vadd.f32 %v1932_v63, %v8465_v10  ;;  %v1982_v54 = vadd.f32 %v1973_v47, %v8468_v11 }
 0x489   : > { %v1934_v1 = vpop.f32.mrf.mxu0  ;;  %v1975_v48 = vpop.f32.mrf.mxu1 }
 0x48a   : > { %v6544_v3 = vmul.f32 -1.442695, %v1980_v0  ;;  %v1981_v4 = vadd.f32 %v1934_v1, %v8471_v18  ;;  %v6546_v35 = vmul.f32 -1.442695, %v1982_v54  ;;  %v1983_v6 = vadd.f32 %v1975_v48, %v8474_v21  ;;  %v2013_v48 = vld [vmem:[#allocation3 + $0x58] sm:$0xff] }
 0x48b   : > { %v1936_v49 = vpop.f32.mrf.mxu0  ;;  %v1977_v5 = vpop.f32.mrf.mxu1 }
 0x48c   : > { %7323 = vpow2.f32 %v6544_v3  ;;  %v6545_v50 = vmul.f32 -1.442695, %v1981_v4 }
 0x48d   : > { %v1937_v51 = vpop.f32.mrf.mxu0  ;;  %v1978_v52 = vpop.f32.mrf.mxu1 }
 0x48e   : > { %7325 = vpow2.f32 %v6545_v50 }
 0x48f   : > { %7327 = vpow2.f32 %v6546_v35 }
 0x499   : > { %v7324_v55 = vpop.eup %7323 }
 0x49a   : > { %v1993_v56 = vadd.f32 1.0, %v7324_v55  ;;  %v2014_v55 = vld [vmem:[#allocation3 + $0x40] sm:$0xff] }
 0x49b   : > { %v7326_v10 = vpop.eup %7325 }
 0x49c   : > { %7329 = vrcp.f32 %v1993_v56  ;;  %v1994_v57 = vadd.f32 1.0, %v7326_v10  ;;  %v7328_v18 = vpop.eup %7327 }
 0x49d   : > { %7331 = vtanh.f32 %v1983_v6  ;;  %v1995_v31 = vadd.f32 1.0, %v7328_v18 }
 0x49e   : > { %7333 = vrcp.f32 %v1994_v57 }
 0x49f   : > { %7335 = vrcp.f32 %v1995_v31 }
 0x4a9   : > { %v7330_v58 = vpop.eup %7329 }
 0x4aa   : > { %v7332_v59 = vpop.eup %7331 }
 0x4ab   : > { %v7334_v27 = vpop.eup %7333  ;;  %v2004_v28 = vmul.f32 %v7332_v59, %v7330_v58 }
 0x4ac   : > { %v2003_v7 = vmul.f32 %v7334_v27, %v8652_v44  ;;  %v7336_v21 = vpop.eup %7335  ;;  %v2012_v44 = vld [vmem:[#allocation3 + $0x38] sm:$0xff] }
 0x4ae   : > { %v8718_v11 = vadd.f32 %v2004_v28, %v2003_v7 }
 0x4b0   : > { %7337 = vtanh.f32 %v8718_v11 }
 0x4bd   : > { %v7338_v22 = vpop.eup %7337 }
 0x4be   : > { %v2007_v25 = vmul.f32 %v7338_v22, %v7336_v21 }
 0x4c0   : > { %v2008_v63 = vpack.c.bf16 %v2007_v25, %v2007_v25 }
 0x4c2   : > { %2010 = vst [vmem:[#allocation2 + $0xc] sm:$0xf] %v2008_v63  ;;  %2241 = vmatmul.mubr.bf16.vlgmr.msra.gmra.mxu0 %v2008_v63  ;;  %2282 = vmatmul.mubr.bf16.vlgmr.msra.gmra.mxu1 %v2008_v63 }
 0x4c3   : > { %2519 = vmatpush1.bf16.msra.mxu0 %v8548_v19  ;;  %2560 = vmatpush1.bf16.msra.mxu1 %v8551_v33 }
 0x4c4   : > { %2520 = vmatprep.subr.bf16.mxu0 %v8558_v23  ;;  %2561 = vmatprep.subr.bf16.mxu1 %v8561_v34 }
 0x4c5   : > { %2550 = vmatprep.mubr.bf16.mxu0 %v9560_v17  ;;  %2591 = vmatprep.mubr.bf16.mxu1 %v9560_v17 }
 0x4c7   : > { %2521 = vmatpush1.bf16.msra.mxu0 %v8564_v2  ;;  %2562 = vmatpush1.bf16.msra.mxu1 %v8567_v62 }
 0x4c8   : > { %2522 = vmatprep.subr.bf16.mxu0 %v8574_v8  ;;  %2563 = vmatprep.subr.bf16.mxu1 %v8577_v13 }
 0x4cb   : > { %2523 = vmatpush1.bf16.msra.mxu0 %v8580_v14  ;;  %2564 = vmatpush1.bf16.msra.mxu1 %v8583_v12 }
 0x4cc   : > { %2524 = vmatprep.subr.bf16.mxu0 %v8590_v20  ;;  %2565 = vmatprep.subr.bf16.mxu1 %v8593_v24 }
 0x4cf   : > { %2525 = vmatpush1.bf16.msra.mxu0 %v8596_v53  ;;  %2566 = vmatpush1.bf16.msra.mxu1 %v8599_v9 }
 0x4d0   : > { %2526 = vmatprep.subr.bf16.mxu0 %v8604_v36  ;;  %2567 = vmatprep.subr.bf16.mxu1 %v8607_v37 }
 0x4d3   : > { %2527 = vmatpush1.bf16.msra.mxu0 %v8612_v38  ;;  %2568 = vmatpush1.bf16.msra.mxu1 %v8615_v39 }
 0x4d4   : > { %2528 = vmatprep.subr.bf16.mxu0 %v8620_v40  ;;  %2569 = vmatprep.subr.bf16.mxu1 %v8623_v41 }
 0x4d7   : > { %2529 = vmatpush1.bf16.msra.mxu0 %v8628_v42  ;;  %2570 = vmatpush1.bf16.msra.mxu1 %v8631_v43 }
 0x4d8   : > { %2530 = vmatprep.subr.bf16.mxu0 %v8683_v15  ;;  %2571 = vmatprep.subr.bf16.mxu1 %v8689_v26 }
 0x4db   : > { %2531 = vmatpush1.bf16.msra.mxu0 %v8680_v32  ;;  %2572 = vmatpush1.bf16.msra.mxu1 %v8686_v16 }
 0x4dc   : > { %2532 = vmatprep.subr.bf16.mxu0 %v8692_v45  ;;  %2573 = vmatprep.subr.bf16.mxu1 %v8696_v60 }
 0x4df   : > { %2533 = vmatpush1.bf16.msra.mxu0 %v8701_v61  ;;  %2574 = vmatpush1.bf16.msra.mxu1 %v8706_v46 }
 0x4e0   : > { %2828 = vmatprep.subr.bf16.mxu0 %v8542_v29  ;;  %2869 = vmatprep.subr.bf16.mxu1 %v8545_v30  ;;  %v2015_v30 = vld [vmem:[#allocation3 + $0xc8] sm:$0xff] }
 0x582   : > { %v2242_v47 = vpop.f32.mrf.mxu0  ;;  %v2283_v0 = vpop.f32.mrf.mxu1 }
 0x583   : > { %v2290_v1 = vadd.f32 %v2242_v47, %v2012_v44  ;;  %v2292_v29 = vadd.f32 %v2283_v0, %v2014_v55 }
 0x584   : > { %v2244_v3 = vpop.f32.mrf.mxu0  ;;  %v2285_v4 = vpop.f32.mrf.mxu1 }
 0x585   : > { %v6579_v49 = vmul.f32 -1.442695, %v2290_v1  ;;  %v2291_v5 = vadd.f32 %v2244_v3, %v2013_v48  ;;  %v6581_v6 = vmul.f32 -1.442695, %v2292_v29  ;;  %v2293_v10 = vadd.f32 %v2285_v4, %v2015_v30  ;;  %v7241_v29 = vld [vmem:[%s8195_s9 + $0xe4] ss:$16 sps:$4 sm:$0xff]  }
 0x586   : > { %v2246_v50 = vpop.f32.mrf.mxu0  ;;  %v2287_v51 = vpop.f32.mrf.mxu1  ;;  %v7239_v30 = vld [vmem:[%s8195_s9 + $0xe0] ss:$16 sps:$4 sm:$0xff]  }
 0x587   : > { %7339 = vpow2.f32 %v6579_v49  ;;  %v6580_v52 = vmul.f32 -1.442695, %v2291_v5 }
 0x588   : > { %v2247_v54 = vpop.f32.mrf.mxu0  ;;  %v2288_v35 = vpop.f32.mrf.mxu1 }
 0x589   : > { %7341 = vpow2.f32 %v6580_v52 }
 0x58a   : > { %7343 = vpow2.f32 %v6581_v6  ;;  %v7244_v6 = vld [vmem:[%s8195_s9 + $0xec] ss:$16 sps:$4 sm:$0xff]  }
 0x594   : > { %v7340_v56 = vpop.eup %7339 }
 0x595   : > { %v2303_v57 = vadd.f32 1.0, %v7340_v56  ;;  %v7242_v56 = vld [vmem:[%s8195_s9 + $0xe8] ss:$16 sps:$4 sm:$0xff]  }
 0x596   : > { %v7342_v18 = vpop.eup %7341 }
 0x597   : > { %7345 = vrcp.f32 %v2303_v57  ;;  %v2304_v58 = vadd.f32 1.0, %v7342_v18  ;;  %v7344_v59 = vpop.eup %7343  ;;  %v7250_v57 = vld [vmem:[%s8195_s9 + $0xcc] ss:$16 sps:$4 sm:$0xff]   ;;  %v7245_v18 = vld [vmem:[%s8195_s9 + $0xc0] ss:$16 sps:$4 sm:$0xff]  }
 0x598   : > { %7347 = vtanh.f32 %v2293_v10  ;;  %v2305_v28 = vadd.f32 1.0, %v7344_v59  ;;  %v7247_v10 = vld [vmem:[%s8195_s9 + $0xc4] ss:$16 sps:$4 sm:$0xff]   ;;  %v7256_v59 = vld [vmem:[%s8195_s9 + $0xac] ss:$16 sps:$4 sm:$0xff]  }
 0x599   : > { %7349 = vrcp.f32 %v2304_v58  ;;  %v7248_v58 = vld [vmem:[%s8195_s9 + $0xc8] ss:$16 sps:$4 sm:$0xff]  }
 0x59a   : > { %7351 = vrcp.f32 %v2305_v28  ;;  %v7262_v28 = vld [vmem:[%s8195_s9 + $0x8c] ss:$16 sps:$4 sm:$0xff]  }
 0x5a4   : > { %v7346_v27 = vpop.eup %7345 }
 0x5a5   : > { %v7348_v31 = vpop.eup %7347 }
 0x5a6   : > { %v7350_v7 = vpop.eup %7349  ;;  %v2314_v22 = vmul.f32 %v7348_v31, %v7346_v27  ;;  %v7251_v27 = vld [vmem:[%s8195_s9 + $0xa0] ss:$16 sps:$4 sm:$0xff]   ;;  %v7254_v31 = vld [vmem:[%s8195_s9 + $0xa8] ss:$16 sps:$4 sm:$0xff]  }
 0x5a7   : > { %v2313_v21 = vmul.f32 %v7350_v7, %v8718_v11  ;;  %v7352_v63 = vpop.eup %7351  ;;  %v7259_v7 = vld [vmem:[%s8195_s9 + $0x84] ss:$16 sps:$4 sm:$0xff]  }
 0x5a9   : > { %v8756_v25 = vadd.f32 %v2314_v22, %v2313_v21  ;;  %v7257_v21 = vld [vmem:[%s8195_s9 + $0x80] ss:$16 sps:$4 sm:$0xff]   ;;  %v7260_v22 = vld [vmem:[%s8195_s9 + $0x88] ss:$16 sps:$4 sm:$0xff]  }
 0x5ab   : > { %7353 = vtanh.f32 %v8756_v25 }
 0x5b8   : > { %v7354_v44 = vpop.eup %7353 }
 0x5b9   : > { %v2317_v47 = vmul.f32 %v7354_v44, %v7352_v63  ;;  %v7268_v63 = vld [vmem:[%s8195_s9 + $0x6c] ss:$16 sps:$4 sm:$0xff]   ;;  %v7263_v44 = vld [vmem:[%s8195_s9 + $0x60] ss:$16 sps:$4 sm:$0xff]  }
 0x5bb   : > { %v2318_v0 = vpack.c.bf16 %v2317_v47, %v2317_v47  ;;  %v7266_v47 = vld [vmem:[%s8195_s9 + $0x68] ss:$16 sps:$4 sm:$0xff]  }
 0x5bd   : > { %2320 = vst [vmem:[#allocation2 + $0x10] sm:$0xf] %v2318_v0  ;;  %2551 = vmatmul.mubr.bf16.vlgmr.msra.gmra.mxu0 %v2318_v0  ;;  %2592 = vmatmul.mubr.bf16.vlgmr.msra.gmra.mxu1 %v2318_v0  ;;  %v7271_v0 = vld [vmem:[%s8195_s9 + $0x44] ss:$16 sps:$4 sm:$0xff]  }
 0x5be   : > { %2829 = vmatpush1.bf16.msra.mxu0 %v8548_v19  ;;  %2870 = vmatpush1.bf16.msra.mxu1 %v8551_v33  ;;  %v2322_v19 = vld [vmem:[#allocation3 + $0xe0] sm:$0xff] }
 0x5bf   : > { %2830 = vmatprep.subr.bf16.mxu0 %v8558_v23  ;;  %2871 = vmatprep.subr.bf16.mxu1 %v8561_v34 }
 0x5c0   : > { %2860 = vmatprep.mubr.bf16.mxu0 %v9560_v17  ;;  %2901 = vmatprep.mubr.bf16.mxu1 %v9560_v17 }
 0x5c2   : > { %2831 = vmatpush1.bf16.msra.mxu0 %v8564_v2  ;;  %2872 = vmatpush1.bf16.msra.mxu1 %v8567_v62  ;;  %v2323_v2 = vld [vmem:[#allocation3 + $0x90] sm:$0xff] }
 0x5c3   : > { %2832 = vmatprep.subr.bf16.mxu0 %v8574_v8  ;;  %2873 = vmatprep.subr.bf16.mxu1 %v8577_v13 }
 0x5c6   : > { %2833 = vmatpush1.bf16.msra.mxu0 %v8580_v14  ;;  %2874 = vmatpush1.bf16.msra.mxu1 %v8583_v12 }
 0x5c7   : > { %2834 = vmatprep.subr.bf16.mxu0 %v8590_v20  ;;  %2875 = vmatprep.subr.bf16.mxu1 %v8593_v24 }
 0x5ca   : > { %2835 = vmatpush1.bf16.msra.mxu0 %v8596_v53  ;;  %2876 = vmatpush1.bf16.msra.mxu1 %v8599_v9 }
 0x5cb   : > { %2836 = vmatprep.subr.bf16.mxu0 %v8604_v36  ;;  %2877 = vmatprep.subr.bf16.mxu1 %v8607_v37  ;;  %v2324_v36 = vld [vmem:[#allocation3 + $0x70] sm:$0xff] }
 0x5ce   : > { %2837 = vmatpush1.bf16.msra.mxu0 %v8612_v38  ;;  %2878 = vmatpush1.bf16.msra.mxu1 %v8615_v39  ;;  %v2325_v39 = vld [vmem:[#allocation3 + $0xc0] sm:$0xff] }
 0x5cf   : > { %2838 = vmatprep.subr.bf16.mxu0 %v8620_v40  ;;  %2879 = vmatprep.subr.bf16.mxu1 %v8623_v41 }
 0x5d2   : > { %2839 = vmatpush1.bf16.msra.mxu0 %v8628_v42  ;;  %2880 = vmatpush1.bf16.msra.mxu1 %v8631_v43 }
 0x5d3   : > { %2840 = vmatprep.subr.bf16.mxu0 %v8683_v15  ;;  %2881 = vmatprep.subr.bf16.mxu1 %v8689_v26 }
 0x5d6   : > { %2841 = vmatpush1.bf16.msra.mxu0 %v8680_v32  ;;  %2882 = vmatpush1.bf16.msra.mxu1 %v8686_v16 }
 0x5d7   : > { %2842 = vmatprep.subr.bf16.mxu0 %v8692_v45  ;;  %2883 = vmatprep.subr.bf16.mxu1 %v8696_v60 }
 0x5da   : > { %2843 = vmatpush1.bf16.msra.mxu0 %v8701_v61  ;;  %2884 = vmatpush1.bf16.msra.mxu1 %v8706_v46 }
 0x5db   : > { %3138 = vmatprep.subr.bf16.mxu0 %v7241_v29  ;;  %3179 = vmatprep.subr.bf16.mxu1 %v7244_v6  ;;  %v2943_v29 = vld [vmem:[#allocation3 + $0xf8] sm:$0xff] }
 0x67d   : > { %v2552_v33 = vpop.f32.mrf.mxu0  ;;  %v2593_v23 = vpop.f32.mrf.mxu1 }
 0x67e   : > { %v2600_v34 = vadd.f32 %v2552_v33, %v2322_v19  ;;  %v2602_v37 = vadd.f32 %v2593_v23, %v2324_v36  ;;  %v7274_v19 = vld [vmem:[%s8195_s9 + $0x4c] ss:$16 sps:$4 sm:$0xff]   ;;  %v7269_v33 = vld [vmem:[%s8195_s9 + $0x40] ss:$16 sps:$4 sm:$0xff]   ;;  %v7272_v23 = vld [vmem:[%s8195_s9 + $0x48] ss:$16 sps:$4 sm:$0xff]  }
 0x67f   : > { %v2554_v62 = vpop.f32.mrf.mxu0  ;;  %v2595_v8 = vpop.f32.mrf.mxu1 }
 0x680   : > { %v6614_v13 = vmul.f32 -1.442695, %v2600_v34  ;;  %v2601_v14 = vadd.f32 %v2554_v62, %v2323_v2  ;;  %v6616_v38 = vmul.f32 -1.442695, %v2602_v37  ;;  %v2603_v41 = vadd.f32 %v2595_v8, %v2325_v39  ;;  %v2632_v34 = vld [vmem:[#allocation3 + $0xa8] sm:$0xff] }
 0x681   : > { %v2556_v12 = vpop.f32.mrf.mxu0  ;;  %v2597_v20 = vpop.f32.mrf.mxu1 }
 0x682   : > { %7355 = vpow2.f32 %v6614_v13  ;;  %v6615_v24 = vmul.f32 -1.442695, %v2601_v14  ;;  %v2633_v13 = vld [vmem:[#allocation3 + $0xd0] sm:$0xff] }
 0x683   : > { %v2557_v53 = vpop.f32.mrf.mxu0  ;;  %v2598_v9 = vpop.f32.mrf.mxu1 }
 0x684   : > { %7357 = vpow2.f32 %v6615_v24 }
 0x685   : > { %7359 = vpow2.f32 %v6616_v38 }
 0x68f   : > { %v7356_v40 = vpop.eup %7355 }
 0x690   : > { %v2613_v42 = vadd.f32 1.0, %v7356_v40 }
 0x691   : > { %v7358_v43 = vpop.eup %7357 }
 0x692   : > { %7361 = vrcp.f32 %v2613_v42  ;;  %v2614_v11 = vadd.f32 1.0, %v7358_v43  ;;  %v7360_v1 = vpop.eup %7359 }
 0x693   : > { %7363 = vtanh.f32 %v2603_v41  ;;  %v2615_v49 = vadd.f32 1.0, %v7360_v1 }
 0x694   : > { %7365 = vrcp.f32 %v2614_v11 }
 0x695   : > { %7367 = vrcp.f32 %v2615_v49 }
 0x69f   : > { %v7362_v48 = vpop.eup %7361 }
 0x6a0   : > { %v7364_v3 = vpop.eup %7363 }
 0x6a1   : > { %v7366_v4 = vpop.eup %7365  ;;  %v2624_v50 = vmul.f32 %v7364_v3, %v7362_v48 }
 0x6a2   : > { %v2623_v5 = vmul.f32 %v7366_v4, %v8756_v25  ;;  %v7368_v52 = vpop.eup %7367  ;;  %v7265_v25 = vld [vmem:[%s8195_s9 + $0x64] ss:$16 sps:$4 sm:$0xff]  }
 0x6a4   : > { %v8792_v51 = vadd.f32 %v2624_v50, %v2623_v5 }
 0x6a6   : > { %7369 = vtanh.f32 %v8792_v51 }
 0x6b3   : > { %v7370_v54 = vpop.eup %7369 }
 0x6b4   : > { %v2627_v35 = vmul.f32 %v7370_v54, %v7368_v52  ;;  %v2942_v52 = vld [vmem:[#allocation3 + $0xa0] sm:$0xff] }
 0x6b6   : > { %v2628_v55 = vpack.c.bf16 %v2627_v35, %v2627_v35 }
 0x6b8   : > { %2630 = vst [vmem:[#allocation2 + $0x14] sm:$0xf] %v2628_v55  ;;  %2861 = vmatmul.mubr.bf16.vlgmr.msra.gmra.mxu0 %v2628_v55  ;;  %2902 = vmatmul.mubr.bf16.vlgmr.msra.gmra.mxu1 %v2628_v55 }
 0x6b9   : > { %3170 = vmatprep.mubr.bf16.mxu0 %v9560_v17  ;;  %3211 = vmatprep.mubr.bf16.mxu1 %v9560_v17  ;;  %v7253_v17 = vld [vmem:[%s8195_s9 + $0xa4] ss:$16 sps:$4 sm:$0xff]  }
 0x6ba   : > { %3139 = vmatpush1.bf16.msra.mxu0 %v7239_v30  ;;  %3180 = vmatpush1.bf16.msra.mxu1 %v7242_v56 }
 0x6bb   : > { %3140 = vmatprep.subr.bf16.mxu0 %v7247_v10  ;;  %3181 = vmatprep.subr.bf16.mxu1 %v7250_v57 }
 0x6be   : > { %3141 = vmatpush1.bf16.msra.mxu0 %v7245_v18  ;;  %3182 = vmatpush1.bf16.msra.mxu1 %v7248_v58 }
 0x6bf   : > { %3142 = vmatprep.subr.bf16.mxu0 %v7253_v17  ;;  %3183 = vmatprep.subr.bf16.mxu1 %v7256_v59  ;;  %v2944_v59 = vld [vmem:[#allocation3 + $0x20] sm:$0xff] }
 0x6c2   : > { %3143 = vmatpush1.bf16.msra.mxu0 %v7251_v27  ;;  %3184 = vmatpush1.bf16.msra.mxu1 %v7254_v31 }
 0x6c3   : > { %3144 = vmatprep.subr.bf16.mxu0 %v7259_v7  ;;  %3185 = vmatprep.subr.bf16.mxu1 %v7262_v28  ;;  %v2945_v7 = vld [vmem:[#allocation3 + $0x98] sm:$0xff] }
 0x6c6   : > { %3145 = vmatpush1.bf16.msra.mxu0 %v7257_v21  ;;  %3186 = vmatpush1.bf16.msra.mxu1 %v7260_v22 }
 0x6c7   : > { %3146 = vmatprep.subr.bf16.mxu0 %v7265_v25  ;;  %3187 = vmatprep.subr.bf16.mxu1 %v7268_v63 }
 0x6ca   : > { %3147 = vmatpush1.bf16.msra.mxu0 %v7263_v44  ;;  %3188 = vmatpush1.bf16.msra.mxu1 %v7266_v47 }
 0x6cb   : > { %3148 = vmatprep.subr.bf16.mxu0 %v7271_v0  ;;  %3189 = vmatprep.subr.bf16.mxu1 %v7274_v19 }
 0x6ce   : > { %3149 = vmatpush1.bf16.msra.mxu0 %v7269_v33  ;;  %3190 = vmatpush1.bf16.msra.mxu1 %v7272_v23 }
 0x6cf   : > { %3150 = vmatprep.subr.bf16.mxu0 %v8683_v15  ;;  %3191 = vmatprep.subr.bf16.mxu1 %v8689_v26 }
 0x6d2   : > { %3151 = vmatpush1.bf16.msra.mxu0 %v8680_v32  ;;  %3192 = vmatpush1.bf16.msra.mxu1 %v8686_v16 }
 0x6d3   : > { %3152 = vmatprep.subr.bf16.mxu0 %v8692_v45  ;;  %3193 = vmatprep.subr.bf16.mxu1 %v8696_v60  ;;  %v2634_v60 = vld [vmem:[#allocation3 + $0x10] sm:$0xff] }
 0x6d6   : > { %3153 = vmatpush1.bf16.msra.mxu0 %v8701_v61  ;;  %3194 = vmatpush1.bf16.msra.mxu1 %v8706_v46  ;;  %v2635_v46 = vld [vmem:[#allocation3 + $0x28] sm:$0xff] }
 0x778   : > { %v2862_v2 = vpop.f32.mrf.mxu0  ;;  %v2903_v62 = vpop.f32.mrf.mxu1 }
 0x779   : > { %v2910_v8 = vadd.f32 %v2862_v2, %v2632_v34  ;;  %v2912_v61 = vadd.f32 %v2903_v62, %v2634_v60 }
 0x77a   : > { %v2864_v15 = vpop.f32.mrf.mxu0  ;;  %v2905_v14 = vpop.f32.mrf.mxu1 }
 0x77b   : > { %v6649_v26 = vmul.f32 -1.442695, %v2910_v8  ;;  %v2911_v12 = vadd.f32 %v2864_v15, %v2633_v13  ;;  %v6651_v53 = vmul.f32 -1.442695, %v2912_v61  ;;  %v2913_v36 = vadd.f32 %v2905_v14, %v2635_v46 }
 0x77c   : > { %v2866_v32 = vpop.f32.mrf.mxu0  ;;  %v2907_v20 = vpop.f32.mrf.mxu1 }
 0x77d   : > { %7371 = vpow2.f32 %v6649_v26  ;;  %v6650_v16 = vmul.f32 -1.442695, %v2911_v12 }
 0x77e   : > { %v2867_v45 = vpop.f32.mrf.mxu0  ;;  %v2908_v24 = vpop.f32.mrf.mxu1 }
 0x77f   : > { %7373 = vpow2.f32 %v6650_v16 }
 0x780   : > { %7375 = vpow2.f32 %v6651_v53 }
 0x78a   : > { %v7372_v9 = vpop.eup %7371 }
 0x78b   : > { %v2923_v37 = vadd.f32 1.0, %v7372_v9 }
 0x78c   : > { %v7374_v38 = vpop.eup %7373 }
 0x78d   : > { %7377 = vrcp.f32 %v2923_v37  ;;  %v2924_v39 = vadd.f32 1.0, %v7374_v38  ;;  %v7376_v40 = vpop.eup %7375 }
 0x78e   : > { %7379 = vtanh.f32 %v2913_v36  ;;  %v2925_v11 = vadd.f32 1.0, %v7376_v40 }
 0x78f   : > { %7381 = vrcp.f32 %v2924_v39 }
 0x790   : > { %7383 = vrcp.f32 %v2925_v11 }
 0x79a   : > { %v7378_v41 = vpop.eup %7377 }
 0x79b   : > { %v7380_v42 = vpop.eup %7379 }
 0x79c   : > { %v7382_v43 = vpop.eup %7381  ;;  %v2934_v48 = vmul.f32 %v7380_v42, %v7378_v41 }
 0x79d   : > { %v2933_v1 = vmul.f32 %v7382_v43, %v8792_v51  ;;  %v7384_v4 = vpop.eup %7383 }
 0x79f   : > { %v2935_v3 = vadd.f32 %v2934_v48, %v2933_v1 }
 0x7a1   : > { %7385 = vtanh.f32 %v2935_v3 }
 0x7ae   : > { %v7386_v49 = vpop.eup %7385 }
 0x7af   : > { %v2937_v5 = vmul.f32 %v7386_v49, %v7384_v4 }
 0x7b1   : > { %v2938_v50 = vpack.c.bf16 %v2937_v5, %v2937_v5 }
 0x7b3   : > { %2940 = vst [vmem:[#allocation2 + $0x18] sm:$0xf] %v2938_v50  ;;  %3171 = vmatmul.mubr.bf16.vlgmr.msra.gmra.mxu0 %v2938_v50  ;;  %3212 = vmatmul.mubr.bf16.vlgmr.msra.gmra.mxu1 %v2938_v50 }
 0x873   : > { %v3172_v54 = vpop.f32.mrf.mxu0  ;;  %v3213_v35 = vpop.f32.mrf.mxu1 }
 0x874   : > { %v3220_v55 = vadd.f32 %v3172_v54, %v2942_v52  ;;  %v3222_v27 = vadd.f32 %v3213_v35, %v2944_v59 }
 0x875   : > { %v3174_v6 = vpop.f32.mrf.mxu0  ;;  %v3215_v30 = vpop.f32.mrf.mxu1 }
 0x876   : > { %v6684_v56 = vmul.f32 -1.442695, %v3220_v55  ;;  %v3221_v51 = vadd.f32 %v3174_v6, %v2943_v29  ;;  %v6686_v31 = vmul.f32 -1.442695, %v3222_v27  ;;  %v3223_v21 = vadd.f32 %v3215_v30, %v2945_v7 }
 0x877   : > { %v3176_v10 = vpop.f32.mrf.mxu0  ;;  %v3217_v57 = vpop.f32.mrf.mxu1 }
 0x878   : > { %7387 = vpow2.f32 %v6684_v56  ;;  %v6685_v18 = vmul.f32 -1.442695, %v3221_v51 }
 0x879   : > { %v3177_v58 = vpop.f32.mrf.mxu0  ;;  %v3218_v17 = vpop.f32.mrf.mxu1 }
 0x87a   : > { %7389 = vpow2.f32 %v6685_v18 }
 0x87b   : > { %7391 = vpow2.f32 %v6686_v31 }
 0x885   : > { %v7388_v28 = vpop.eup %7387 }
 0x886   : > { %v3233_v22 = vadd.f32 1.0, %v7388_v28 }
 0x887   : > { %v7390_v25 = vpop.eup %7389 }
 0x888   : > { %7393 = vrcp.f32 %v3233_v22  ;;  %v3234_v63 = vadd.f32 1.0, %v7390_v25  ;;  %v7392_v44 = vpop.eup %7391 }
 0x889   : > { %7395 = vtanh.f32 %v3223_v21  ;;  %v3235_v33 = vadd.f32 1.0, %v7392_v44 }
 0x88a   : > { %7397 = vrcp.f32 %v3234_v63 }
 0x88b   : > { %7399 = vrcp.f32 %v3235_v33 }
 0x895   : > { %v7394_v47 = vpop.eup %7393 }
 0x896   : > { %v7396_v0 = vpop.eup %7395 }
 0x897   : > { %v7398_v19 = vpop.eup %7397  ;;  %v3244_v34 = vmul.f32 %v7396_v0, %v7394_v47 }
 0x898   : > { %v3243_v23 = vmul.f32 %v7398_v19, %v2935_v3  ;;  %v7400_v62 = vpop.eup %7399 }
 0x89a   : > { %v3245_v2 = vadd.f32 %v3244_v34, %v3243_v23 }
 0x89c   : > { %7401 = vtanh.f32 %v3245_v2  ;;  %3252 = vst [vmem:[%s8207_s8] sm:$0xff] %v3245_v2 }
 0x8a9   : > { %v7402_v8 = vpop.eup %7401 }
 0x8aa   : > { %v3247_v13 = vmul.f32 %v7402_v8, %v7400_v62 }
 0x8ac   : > { %v3248_v15 = vpack.c.bf16 %v3247_v13, %v3247_v13  ;;  %3251 = vst [vmem:[%s8205_s23] sm:$0xff] %v3247_v13 }
 0x8ae   : > { %3250 = vst [vmem:[#allocation2 + $0x1c] sm:$0xf] %v3248_v15 }
 0x8af PF: > { %p9561_p10 = scmp.eq.s32.totalorder %s8073_s24, 0 }
 0x8b1   : > { %3256 = sbr.rel (%p9561_p10) target bundleno = 4305 (0x10d1), region = 60 }
 0x8b6   : > { %v7403_v14 = vld [vmem:[%s8188_s10 + $0xe4] ss:$16 sps:$4 sm:$0xff]   ;;  %v7405_v26 = vld [vmem:[%s8188_s10 + $0xec] ss:$16 sps:$4 sm:$0xff]   ;;  %v9532_v12 = vmov 0  }
 0x8b7   : > { %3535 = vmatprep.mubr.bf16.mxu0 %v9532_v12  ;;  %3608 = vmatprep.mubr.bf16.mxu1 %v9532_v12  ;;  %v7407_v32 = vld [vmem:[%s8188_s10 + $0xe0] ss:$16 sps:$4 sm:$0xff]   ;;  %v7408_v20 = vld [vmem:[%s8188_s10 + $0xe8] ss:$16 sps:$4 sm:$0xff]   ;;  %v7409_v16 = vld [vmem:[%s8188_s10 + $0xc4] ss:$16 sps:$4 sm:$0xff]  }
 0x8b8   : > { %3503 = vmatprep.subr.bf16.mxu0 %v7403_v14  ;;  %3576 = vmatprep.subr.bf16.mxu1 %v7405_v26  ;;  %v7411_v45 = vld [vmem:[%s8188_s10 + $0xcc] ss:$16 sps:$4 sm:$0xff]   ;;  %v7413_v24 = vld [vmem:[%s8188_s10 + $0xc0] ss:$16 sps:$4 sm:$0xff]   ;;  %v7414_v60 = vld [vmem:[%s8188_s10 + $0xc8] ss:$16 sps:$4 sm:$0xff]  }
 0x8b9   : > { %3504 = vmatpush1.bf16.msra.mxu0 %v7407_v32  ;;  %3577 = vmatpush1.bf16.msra.mxu1 %v7408_v20  ;;  %v7415_v61 = vld [vmem:[%s8188_s10 + $0xa4] ss:$16 sps:$4 sm:$0xff]   ;;  %v7417_v53 = vld [vmem:[%s8188_s10 + $0xac] ss:$16 sps:$4 sm:$0xff]   ;;  %v7419_v46 = vld [vmem:[%s8188_s10 + $0xa0] ss:$16 sps:$4 sm:$0xff]  }
 0x8ba   : > { %3505 = vmatprep.subr.bf16.mxu0 %v7409_v16  ;;  %3578 = vmatprep.subr.bf16.mxu1 %v7411_v45  ;;  %v7420_v9 = vld [vmem:[%s8188_s10 + $0xa8] ss:$16 sps:$4 sm:$0xff]   ;;  %v7421_v36 = vld [vmem:[%s8188_s10 + $0x84] ss:$16 sps:$4 sm:$0xff]   ;;  %v7423_v37 = vld [vmem:[%s8188_s10 + $0x8c] ss:$16 sps:$4 sm:$0xff]   ;;  %v3299_v45 = vlaneseq }
 0x8bb   : > { %v7425_v38 = vld [vmem:[%s8188_s10 + $0x80] ss:$16 sps:$4 sm:$0xff]   ;;  %v7426_v39 = vld [vmem:[%s8188_s10 + $0x88] ss:$16 sps:$4 sm:$0xff]   ;;  %v7427_v40 = vld [vmem:[%s8188_s10 + $0x64] ss:$16 sps:$4 sm:$0xff]  }
 0x8bc   : > { %v7429_v41 = vld [vmem:[%s8188_s10 + $0x6c] ss:$16 sps:$4 sm:$0xff]   ;;  %v7431_v42 = vld [vmem:[%s8188_s10 + $0x60] ss:$16 sps:$4 sm:$0xff]   ;;  %v7432_v43 = vld [vmem:[%s8188_s10 + $0x68] ss:$16 sps:$4 sm:$0xff]  }
 0x8bd   : > { %3506 = vmatpush1.bf16.msra.mxu0 %v7413_v24  ;;  %3579 = vmatpush1.bf16.msra.mxu1 %v7414_v60  ;;  %v7433_v11 = vld [vmem:[%s8188_s10 + $0x44] ss:$16 sps:$4 sm:$0xff]   ;;  %v7435_v1 = vld [vmem:[%s8188_s10 + $0x4c] ss:$16 sps:$4 sm:$0xff]   ;;  %v7437_v48 = vld [vmem:[%s8188_s10 + $0x40] ss:$16 sps:$4 sm:$0xff]  }
 0x8be   : > { %3507 = vmatprep.subr.bf16.mxu0 %v7415_v61  ;;  %3580 = vmatprep.subr.bf16.mxu1 %v7417_v53  ;;  %v7438_v3 = vld [vmem:[%s8188_s10 + $0x48] ss:$16 sps:$4 sm:$0xff]   ;;  %v7439_v4 = vld [vmem:[%s8188_s10 + $0x24] ss:$16 sps:$4 sm:$0xff]   ;;  %v7441_v49 = vld [vmem:[%s8188_s10 + $0x2c] ss:$16 sps:$4 sm:$0xff]  }
 0x8bf   : > { %v7443_v5 = vld [vmem:[%s8188_s10 + $0x20] ss:$16 sps:$4 sm:$0xff]   ;;  %v7444_v50 = vld [vmem:[%s8188_s10 + $0x28] ss:$16 sps:$4 sm:$0xff]   ;;  %v7445_v52 = vld [vmem:[%s8188_s10 + $0x4] ss:$16 sps:$4 sm:$0xff]  }
 0x8c0   : > { %v7447_v54 = vld [vmem:[%s8188_s10 + $0xc] ss:$16 sps:$4 sm:$0xff]   ;;  %v7449_v35 = vld [vmem:[%s8188_s10] ss:$16 sps:$4 sm:$0xff]   ;;  %v7450_v55 = vld [vmem:[%s8188_s10 + $0x8] ss:$16 sps:$4 sm:$0xff]  }
 0x8c1   : > { %3508 = vmatpush1.bf16.msra.mxu0 %v7419_v46  ;;  %3581 = vmatpush1.bf16.msra.mxu1 %v7420_v9  ;;  %v8869_v29 = vld [vmem:[%s8195_s9 + $0xe4] ss:$16 sps:$4 sm:$0xff]   ;;  %v8872_v6 = vld [vmem:[%s8195_s9 + $0xec] ss:$16 sps:$4 sm:$0xff]   ;;  %v8875_v56 = vld [vmem:[%s8195_s9 + $0xe0] ss:$16 sps:$4 sm:$0xff]  }
 0x8c2   : > { %3509 = vmatprep.subr.bf16.mxu0 %v7421_v36  ;;  %3582 = vmatprep.subr.bf16.mxu1 %v7423_v37  ;;  %v7451_v30 = vld [vmem:[#allocation2] sm:$0xff]   ;;  %v8878_v51 = vld [vmem:[%s8195_s9 + $0xe8] ss:$16 sps:$4 sm:$0xff]   ;;  %v8886_v57 = vld [vmem:[%s8195_s9 + $0xcc] ss:$16 sps:$4 sm:$0xff]   ;;  %v3300_v24 = vshrl.u32 %v3299_v45, 7 }
 0x8c3   : > { %v8883_v10 = vld [vmem:[%s8195_s9 + $0xc4] ss:$16 sps:$4 sm:$0xff]   ;;  %v8889_v18 = vld [vmem:[%s8195_s9 + $0xc0] ss:$16 sps:$4 sm:$0xff]   ;;  %v8894_v58 = vld [vmem:[%s8195_s9 + $0xc8] ss:$16 sps:$4 sm:$0xff]  }
 0x8c4   : > { %v8899_v17 = vld [vmem:[%s8195_s9 + $0xa4] ss:$16 sps:$4 sm:$0xff]   ;;  %v8902_v59 = vld [vmem:[%s8195_s9 + $0xac] ss:$16 sps:$4 sm:$0xff]   ;;  %v8907_v31 = vld [vmem:[%s8195_s9 + $0xa0] ss:$16 sps:$4 sm:$0xff]  }
 0x8c5   : > { %3510 = vmatpush1.bf16.msra.mxu0 %v7425_v38  ;;  %3583 = vmatpush1.bf16.msra.mxu1 %v7426_v39  ;;  %v7464_v27 = vld [vmem:[#allocation2 + $0x8] sm:$0xff]   ;;  %v8915_v28 = vld [vmem:[%s8195_s9 + $0x84] ss:$16 sps:$4 sm:$0xff]   ;;  %v8923_v22 = vld [vmem:[%s8195_s9 + $0x80] ss:$16 sps:$4 sm:$0xff]   ;;  %v3301_v60 = vsub.s32 0, %v3300_v24 }
 0x8c6   : > { %3511 = vmatprep.subr.bf16.mxu0 %v7427_v40  ;;  %3584 = vmatprep.subr.bf16.mxu1 %v7429_v41  ;;  %v8910_v7 = vld [vmem:[%s8195_s9 + $0xa8] ss:$16 sps:$4 sm:$0xff]   ;;  %v8920_v21 = vld [vmem:[%s8195_s9 + $0x8c] ss:$16 sps:$4 sm:$0xff]   ;;  %v8931_v63 = vld [vmem:[%s8195_s9 + $0x64] ss:$16 sps:$4 sm:$0xff]  }
 0x8c7   : > { %v8926_v25 = vld [vmem:[%s8195_s9 + $0x88] ss:$16 sps:$4 sm:$0xff]   ;;  %v8936_v44 = vld [vmem:[%s8195_s9 + $0x6c] ss:$16 sps:$4 sm:$0xff]   ;;  %v7477_v47 = vld [vmem:[#allocation2 + $0x10] sm:$0xff]   ;;  %v3309_v61 = vsub.s32 2, %v3300_v24 }
 0x8c8   : > { %v8941_v0 = vld [vmem:[%s8195_s9 + $0x60] ss:$16 sps:$4 sm:$0xff]   ;;  %v8944_v19 = vld [vmem:[%s8195_s9 + $0x68] ss:$16 sps:$4 sm:$0xff]   ;;  %v8947_v33 = vld [vmem:[%s8195_s9 + $0x44] ss:$16 sps:$4 sm:$0xff]  }
 0x8c9   : > { %3512 = vmatpush1.bf16.msra.mxu0 %v7431_v42  ;;  %3585 = vmatpush1.bf16.msra.mxu1 %v7432_v43  ;;  %v8950_v23 = vld [vmem:[%s8195_s9 + $0x4c] ss:$16 sps:$4 sm:$0xff]   ;;  %v8957_v34 = vld [vmem:[%s8195_s9 + $0x40] ss:$16 sps:$4 sm:$0xff]   ;;  %v8960_v2 = vld [vmem:[%s8195_s9 + $0x48] ss:$16 sps:$4 sm:$0xff]  }
 0x8ca   : > { %3513 = vmatprep.subr.bf16.mxu0 %v7433_v11  ;;  %3586 = vmatprep.subr.bf16.mxu1 %v7435_v1  ;;  %v8963_v62 = vld [vmem:[%s8195_s9 + $0x24] ss:$16 sps:$4 sm:$0xff]   ;;  %v8966_v8 = vld [vmem:[%s8195_s9 + $0x2c] ss:$16 sps:$4 sm:$0xff]   ;;  %v8975_v15 = vld [vmem:[%s8195_s9 + $0x20] ss:$16 sps:$4 sm:$0xff]  }
 0x8cb   : > { %v7490_v13 = vld [vmem:[#allocation2 + $0x18] sm:$0xff]   ;;  %v8981_v26 = vld [vmem:[%s8195_s9 + $0x4] ss:$16 sps:$4 sm:$0xff]   ;;  %v8991_v20 = vld [vmem:[%s8195_s9] ss:$16 sps:$4 sm:$0xff]   ;;  %v3305_v46 = vsub.s32 1, %v3300_v24 }
 0x8cc   : > { %v8978_v14 = vld [vmem:[%s8195_s9 + $0x28] ss:$16 sps:$4 sm:$0xff]   ;;  %v8984_v32 = vld [vmem:[%s8195_s9 + $0xc] ss:$16 sps:$4 sm:$0xff]   ;;  %v3297_v53 = vld [vmem:[%s8198_s11] sm:$0xf] }
 0x8cd   : > { %3514 = vmatpush1.bf16.msra.mxu0 %v7437_v48  ;;  %3587 = vmatpush1.bf16.msra.mxu1 %v7438_v3  ;;  %v8994_v16 = vld [vmem:[%s8195_s9 + $0x8] ss:$16 sps:$4 sm:$0xff]   ;;  %v3313_v9 = vsub.s32 3, %v3300_v24  ;;  %v9043_v36 = vrot.slane %v3297_v53, %v3301_v60  ;;  %v9045_v37 = vrot.slane %v3297_v53, %v3309_v61  ;;  %v9047_v38 = vrot.slane %v3297_v53, %v3305_v46 }
 0x8ce   : > { %3515 = vmatprep.subr.bf16.mxu0 %v7439_v4  ;;  %3588 = vmatprep.subr.bf16.mxu1 %v7441_v49 }
 0x8cf   : > { %v9049_v39 = vrot.slane %v3297_v53, %v3313_v9 }
 0x8d1   : > { %3516 = vmatpush1.bf16.msra.mxu0 %v7443_v5  ;;  %3589 = vmatpush1.bf16.msra.mxu1 %v7444_v50 }
 0x8d2   : > { %3517 = vmatprep.subr.bf16.mxu0 %v7445_v52  ;;  %3590 = vmatprep.subr.bf16.mxu1 %v7447_v54 }
 0x8d5   : > { %3518 = vmatpush1.bf16.msra.mxu0 %v7449_v35  ;;  %3591 = vmatpush1.bf16.msra.mxu1 %v7450_v55 }
 0x8d6   : > { %3877 = vmatprep.subr.bf16.mxu0 %v8869_v29  ;;  %3918 = vmatprep.subr.bf16.mxu1 %v8872_v6 }
 0x8d8   : > { %3536 = vmatmul.mubr.bf16.vlgmr.msra.gmra.mxu0 %v7451_v30  ;;  %3609 = vmatmul.mubr.bf16.vlgmr.msra.gmra.mxu1 %v7451_v30 }
 0x8d9   : > { %3878 = vmatpush1.bf16.msra.mxu0 %v8875_v56  ;;  %3919 = vmatpush1.bf16.msra.mxu1 %v8878_v51 }
 0x8da   : > { %3879 = vmatprep.subr.bf16.mxu0 %v8883_v10  ;;  %3920 = vmatprep.subr.bf16.mxu1 %v8886_v57 }
 0x8db   : > { %3545 = vmatprep.mubr.bf16.mxu0 %v9532_v12  ;;  %3618 = vmatprep.mubr.bf16.mxu1 %v9532_v12 }
 0x8dd   : > { %3880 = vmatpush1.bf16.msra.mxu0 %v8889_v18  ;;  %3921 = vmatpush1.bf16.msra.mxu1 %v8894_v58 }
 0x8de   : > { %3881 = vmatprep.subr.bf16.mxu0 %v8899_v17  ;;  %3922 = vmatprep.subr.bf16.mxu1 %v8902_v59 }
 0x8e0   : > { %3546 = vmatmul.mubr.bf16.gmra.mxu0 %v7464_v27  ;;  %3619 = vmatmul.mubr.bf16.gmra.mxu1 %v7464_v27 }
 0x8e1   : > { %3882 = vmatpush1.bf16.msra.mxu0 %v8907_v31  ;;  %3923 = vmatpush1.bf16.msra.mxu1 %v8910_v7 }
 0x8e2   : > { %3883 = vmatprep.subr.bf16.mxu0 %v8915_v28  ;;  %3924 = vmatprep.subr.bf16.mxu1 %v8920_v21 }
 0x8e3   : > { %3555 = vmatprep.mubr.bf16.mxu0 %v9532_v12  ;;  %3628 = vmatprep.mubr.bf16.mxu1 %v9532_v12 }
 0x8e5   : > { %3884 = vmatpush1.bf16.msra.mxu0 %v8923_v22  ;;  %3925 = vmatpush1.bf16.msra.mxu1 %v8926_v25 }
 0x8e6   : > { %3885 = vmatprep.subr.bf16.mxu0 %v8931_v63  ;;  %3926 = vmatprep.subr.bf16.mxu1 %v8936_v44 }
 0x8e8   : > { %3556 = vmatmul.mubr.bf16.gmra.mxu0 %v7477_v47  ;;  %3629 = vmatmul.mubr.bf16.gmra.mxu1 %v7477_v47 }
 0x8e9   : > { %3886 = vmatpush1.bf16.msra.mxu0 %v8941_v0  ;;  %3927 = vmatpush1.bf16.msra.mxu1 %v8944_v19 }
 0x8ea   : > { %3887 = vmatprep.subr.bf16.mxu0 %v8947_v33  ;;  %3928 = vmatprep.subr.bf16.mxu1 %v8950_v23 }
 0x8eb   : > { %3565 = vmatprep.mubr.bf16.mxu0 %v9532_v12  ;;  %3638 = vmatprep.mubr.bf16.mxu1 %v9532_v12 }
 0x8ed   : > { %3888 = vmatpush1.bf16.msra.mxu0 %v8957_v34  ;;  %3929 = vmatpush1.bf16.msra.mxu1 %v8960_v2 }
 0x8ee   : > { %3889 = vmatprep.subr.bf16.mxu0 %v8963_v62  ;;  %3930 = vmatprep.subr.bf16.mxu1 %v8966_v8 }
 0x8f0   : > { %3566 = vmatmul.mubr.bf16.gmra.mxu0 %v7490_v13  ;;  %3639 = vmatmul.mubr.bf16.gmra.mxu1 %v7490_v13 }
 0x8f1   : > { %3890 = vmatpush1.bf16.msra.mxu0 %v8975_v15  ;;  %3931 = vmatpush1.bf16.msra.mxu1 %v8978_v14 }
 0x8f2   : > { %3891 = vmatprep.subr.bf16.mxu0 %v8981_v26  ;;  %3932 = vmatprep.subr.bf16.mxu1 %v8984_v32 }
 0x8f3   : > { %3909 = vmatprep.mubr.bf16.mxu0 %v9532_v12  ;;  %3950 = vmatprep.mubr.bf16.mxu1 %v9532_v12 }
 0x8f5   : > { %3892 = vmatpush1.bf16.msra.mxu0 %v8991_v20  ;;  %3933 = vmatpush1.bf16.msra.mxu1 %v8994_v16 }
 0x8f6   : > { %4186 = vmatprep.subr.bf16.mxu0 %v8869_v29  ;;  %4227 = vmatprep.subr.bf16.mxu1 %v8872_v6 }
 0x8f8   : > { %3910 = vmatmul.mubr.bf16.vlgmr.msra.gmra.mxu0 %v9532_v12  ;;  %3951 = vmatmul.mubr.bf16.vlgmr.msra.gmra.mxu1 %v9532_v12 }
 0x8f9   : > { %4187 = vmatpush1.bf16.msra.mxu0 %v8875_v56  ;;  %4228 = vmatpush1.bf16.msra.mxu1 %v8878_v51 }
 0x8fa   : > { %4188 = vmatprep.subr.bf16.mxu0 %v8883_v10  ;;  %4229 = vmatprep.subr.bf16.mxu1 %v8886_v57 }
 0x8fb   : > { %4218 = vmatprep.mubr.bf16.mxu0 %v9532_v12  ;;  %4259 = vmatprep.mubr.bf16.mxu1 %v9532_v12 }
 0x8fd   : > { %4189 = vmatpush1.bf16.msra.mxu0 %v8889_v18  ;;  %4230 = vmatpush1.bf16.msra.mxu1 %v8894_v58 }
 0x8fe   : > { %4190 = vmatprep.subr.bf16.mxu0 %v8899_v17  ;;  %4231 = vmatprep.subr.bf16.mxu1 %v8902_v59 }
 0x901   : > { %4191 = vmatpush1.bf16.msra.mxu0 %v8907_v31  ;;  %4232 = vmatpush1.bf16.msra.mxu1 %v8910_v7 }
 0x902   : > { %4192 = vmatprep.subr.bf16.mxu0 %v8915_v28  ;;  %4233 = vmatprep.subr.bf16.mxu1 %v8920_v21 }
 0x905   : > { %4193 = vmatpush1.bf16.msra.mxu0 %v8923_v22  ;;  %4234 = vmatpush1.bf16.msra.mxu1 %v8926_v25 }
 0x906   : > { %4194 = vmatprep.subr.bf16.mxu0 %v8931_v63  ;;  %4235 = vmatprep.subr.bf16.mxu1 %v8936_v44 }
 0x909   : > { %4195 = vmatpush1.bf16.msra.mxu0 %v8941_v0  ;;  %4236 = vmatpush1.bf16.msra.mxu1 %v8944_v19 }
 0x90a   : > { %4196 = vmatprep.subr.bf16.mxu0 %v8947_v33  ;;  %4237 = vmatprep.subr.bf16.mxu1 %v8950_v23 }
 0x90d   : > { %4197 = vmatpush1.bf16.msra.mxu0 %v8957_v34  ;;  %4238 = vmatpush1.bf16.msra.mxu1 %v8960_v2 }
 0x90e   : > { %4198 = vmatprep.subr.bf16.mxu0 %v8963_v62  ;;  %4239 = vmatprep.subr.bf16.mxu1 %v8966_v8 }
 0x911   : > { %4199 = vmatpush1.bf16.msra.mxu0 %v8975_v15  ;;  %4240 = vmatpush1.bf16.msra.mxu1 %v8978_v14 }
 0x912   : > { %4200 = vmatprep.subr.bf16.mxu0 %v8981_v26  ;;  %4241 = vmatprep.subr.bf16.mxu1 %v8984_v32 }
 0x915   : > { %4201 = vmatpush1.bf16.msra.mxu0 %v8991_v20  ;;  %4242 = vmatpush1.bf16.msra.mxu1 %v8994_v16 }
 0x916   : > { %4496 = vmatprep.subr.bf16.mxu0 %v8869_v29  ;;  %4537 = vmatprep.subr.bf16.mxu1 %v8872_v6 }
 0x998   : > { %v3537_v40 = vpop.f32.mrf.mxu0  ;;  %v3610_v41 = vpop.f32.mrf.mxu1 }
 0x999   : > { %v9052_v42 = vadd.f32 %v3537_v40, %v9043_v36  ;;  %v9055_v43 = vadd.f32 %v3610_v41, %v9045_v37 }
 0x99a   : > { %v3539_v11 = vpop.f32.mrf.mxu0  ;;  %v3612_v1 = vpop.f32.mrf.mxu1 }
 0x99b   : > { %v9058_v48 = vadd.f32 %v3539_v11, %v9047_v38  ;;  %v9061_v3 = vadd.f32 %v3612_v1, %v9049_v39 }
 0x99c   : > { %v3541_v4 = vpop.f32.mrf.mxu0  ;;  %v3614_v49 = vpop.f32.mrf.mxu1 }
 0x99d   : > { %v9064_v5 = vadd.f32 %v3541_v4, %v9043_v36  ;;  %v9067_v50 = vadd.f32 %v3614_v49, %v9045_v37 }
 0x99e   : > { %v3543_v52 = vpop.f32.mrf.mxu0  ;;  %v3616_v54 = vpop.f32.mrf.mxu1 }
 0x99f   : > { %v9070_v35 = vadd.f32 %v3543_v52, %v9047_v38  ;;  %v9073_v55 = vadd.f32 %v3616_v54, %v9049_v39 }
 0x9a0   : > { %v3547_v29 = vpop.f32.mrf.mxu0  ;;  %v3620_v6 = vpop.f32.mrf.mxu1 }
 0x9a1   : > { %v9076_v30 = vadd.f32 %v3547_v29, %v9043_v36  ;;  %v9079_v27 = vadd.f32 %v3620_v6, %v9045_v37 }
 0x9a2   : > { %v3549_v47 = vpop.f32.mrf.mxu0  ;;  %v3622_v13 = vpop.f32.mrf.mxu1 }
 0x9a3   : > { %v9082_v45 = vadd.f32 %v3549_v47, %v9047_v38  ;;  %v9085_v24 = vadd.f32 %v3622_v13, %v9049_v39 }
 0x9a4   : > { %v3551_v60 = vpop.f32.mrf.mxu0  ;;  %v3624_v61 = vpop.f32.mrf.mxu1 }
 0x9a5   : > { %v9088_v53 = vadd.f32 %v3551_v60, %v9043_v36  ;;  %v9091_v46 = vadd.f32 %v3624_v61, %v9045_v37 }
 0x9a6   : > { %v3553_v9 = vpop.f32.mrf.mxu0  ;;  %v3626_v40 = vpop.f32.mrf.mxu1 }
 0x9a7   : > { %v9094_v41 = vadd.f32 %v3553_v9, %v9047_v38  ;;  %v9097_v11 = vadd.f32 %v3626_v40, %v9049_v39 }
 0x9a8   : > { %v3557_v1 = vpop.f32.mrf.mxu0  ;;  %v3630_v4 = vpop.f32.mrf.mxu1 }
 0x9a9   : > { %v3558_v49 = vadd.f32 %v3557_v1, %v9043_v36  ;;  %v3631_v52 = vadd.f32 %v3630_v4, %v9045_v37 }
 0x9aa   : > { %v3559_v54 = vpop.f32.mrf.mxu0  ;;  %v3632_v29 = vpop.f32.mrf.mxu1 }
 0x9ab   : > { %3665 = vst [vmem:[#allocation3 + $0x38] sm:$0xff] %v3558_v49  ;;  %3667 = vst [vmem:[#allocation3 + $0x40] sm:$0xff] %v3631_v52  ;;  %v3560_v6 = vadd.f32 %v3559_v54, %v9047_v38  ;;  %v3633_v47 = vadd.f32 %v3632_v29, %v9049_v39 }
 0x9ac   : > { %v3561_v13 = vpop.f32.mrf.mxu0  ;;  %v3634_v60 = vpop.f32.mrf.mxu1 }
 0x9ad   : > { %3666 = vst [vmem:[#allocation3 + $0x58] sm:$0xff] %v3560_v6  ;;  %3668 = vst [vmem:[#allocation3 + $0xc8] sm:$0xff] %v3633_v47  ;;  %v3562_v61 = vadd.f32 %v3561_v13, %v9043_v36  ;;  %v3635_v9 = vadd.f32 %v3634_v60, %v9045_v37 }
 0x9ae   : > { %v3563_v40 = vpop.f32.mrf.mxu0  ;;  %v3636_v1 = vpop.f32.mrf.mxu1 }
 0x9af   : > { %3669 = vst [vmem:[#allocation3 + $0xe0] sm:$0xff] %v3562_v61  ;;  %3671 = vst [vmem:[#allocation3 + $0x70] sm:$0xff] %v3635_v9  ;;  %v3564_v4 = vadd.f32 %v3563_v40, %v9047_v38  ;;  %v3637_v49 = vadd.f32 %v3636_v1, %v9049_v39 }
 0x9b0   : > { %v3567_v52 = vpop.f32.mrf.mxu0  ;;  %v3640_v54 = vpop.f32.mrf.mxu1 }
 0x9b1   : > { %3670 = vst [vmem:[#allocation3 + $0x90] sm:$0xff] %v3564_v4  ;;  %3672 = vst [vmem:[#allocation3 + $0xc0] sm:$0xff] %v3637_v49  ;;  %v3568_v29 = vadd.f32 %v3567_v52, %v9043_v36  ;;  %v3641_v6 = vadd.f32 %v3640_v54, %v9045_v37 }
 0x9b2   : > { %v3569_v47 = vpop.f32.mrf.mxu0  ;;  %v3642_v13 = vpop.f32.mrf.mxu1 }
 0x9b3   : > { %3673 = vst [vmem:[#allocation3 + $0xa8] sm:$0xff] %v3568_v29  ;;  %3675 = vst [vmem:[#allocation3 + $0x10] sm:$0xff] %v3641_v6  ;;  %v3570_v60 = vadd.f32 %v3569_v47, %v9047_v38  ;;  %v3643_v61 = vadd.f32 %v3642_v13, %v9049_v39 }
 0x9b4   : > { %v3571_v9 = vpop.f32.mrf.mxu0  ;;  %v3644_v40 = vpop.f32.mrf.mxu1 }
 0x9b5   : > { %3674 = vst [vmem:[#allocation3 + $0xd0] sm:$0xff] %v3570_v60  ;;  %3676 = vst [vmem:[#allocation3 + $0x28] sm:$0xff] %v3643_v61  ;;  %v3572_v1 = vadd.f32 %v3571_v9, %v9043_v36  ;;  %v3645_v4 = vadd.f32 %v3644_v40, %v9045_v37 }
 0x9b6   : > { %v3573_v49 = vpop.f32.mrf.mxu0  ;;  %v3646_v52 = vpop.f32.mrf.mxu1 }
 0x9b7   : > { %3677 = vst [vmem:[#allocation3 + $0xa0] sm:$0xff] %v3572_v1  ;;  %3679 = vst [vmem:[#allocation3 + $0x20] sm:$0xff] %v3645_v4  ;;  %v3574_v54 = vadd.f32 %v3573_v49, %v9047_v38  ;;  %v3647_v29 = vadd.f32 %v3646_v52, %v9049_v39 }
 0x9b8   : > { %v3911_v6 = vpop.f32.mrf.mxu0  ;;  %v3952_v47 = vpop.f32.mrf.mxu1 }
 0x9b9   : > { %3678 = vst [vmem:[#allocation3 + $0xf8] sm:$0xff] %v3574_v54  ;;  %3680 = vst [vmem:[#allocation3 + $0x98] sm:$0xff] %v3647_v29  ;;  %v3959_v13 = vadd.f32 %v3911_v6, %v9052_v42  ;;  %v3961_v38 = vadd.f32 %v3952_v47, %v9055_v43 }
 0x9ba   : > { %v3913_v60 = vpop.f32.mrf.mxu0  ;;  %v3954_v61 = vpop.f32.mrf.mxu1 }
 0x9bb   : > { %v6756_v12 = vmul.f32 -1.442695, %v3959_v13  ;;  %v3960_v36 = vadd.f32 %v3913_v60, %v9058_v48  ;;  %v6758_v39 = vmul.f32 -1.442695, %v3961_v38  ;;  %v3962_v52 = vadd.f32 %v3954_v61, %v9061_v3 }
 0x9bc   : > { %v3915_v37 = vpop.f32.mrf.mxu0  ;;  %v3956_v9 = vpop.f32.mrf.mxu1 }
 0x9bd   : > { %7587 = vpow2.f32 %v6756_v12  ;;  %v6757_v40 = vmul.f32 -1.442695, %v3960_v36 }
 0x9be   : > { %v3916_v1 = vpop.f32.mrf.mxu0  ;;  %v3957_v4 = vpop.f32.mrf.mxu1 }
 0x9bf   : > { %7589 = vpow2.f32 %v6757_v40  ;;  %v9562_v40 = vmov 0  }
 0x9c0   : > { %7591 = vpow2.f32 %v6758_v39 }
 0x9ca   : > { %v7588_v49 = vpop.eup %7587 }
 0x9cb   : > { %v3972_v54 = vadd.f32 1.0, %v7588_v49 }
 0x9cc   : > { %v7590_v42 = vpop.eup %7589 }
 0x9cd   : > { %7593 = vrcp.f32 %v3972_v54  ;;  %v3973_v29 = vadd.f32 1.0, %v7590_v42  ;;  %v7592_v48 = vpop.eup %7591  ;;  %v9168_v54 = vld [vmem:[%s8195_s9 + $0xec] ss:$16 sps:$4 sm:$0xff]   ;;  %v9171_v42 = vld [vmem:[%s8195_s9 + $0xe0] ss:$16 sps:$4 sm:$0xff]  }
 0x9ce   : > { %7595 = vtanh.f32 %v3962_v52  ;;  %v3974_v60 = vadd.f32 1.0, %v7592_v48  ;;  %v9165_v52 = vld [vmem:[%s8195_s9 + $0xe4] ss:$16 sps:$4 sm:$0xff]  }
 0x9cf   : > { %7597 = vrcp.f32 %v3973_v29  ;;  %v9174_v29 = vld [vmem:[%s8195_s9 + $0xe8] ss:$16 sps:$4 sm:$0xff]   ;;  %v9181_v48 = vld [vmem:[%s8195_s9 + $0xc4] ss:$16 sps:$4 sm:$0xff]  }
 0x9d0   : > { %7599 = vrcp.f32 %v3974_v60  ;;  %v9197_v60 = vld [vmem:[%s8195_s9 + $0xa4] ss:$16 sps:$4 sm:$0xff]  }
 0x9da   : > { %v7594_v6 = vpop.eup %7593 }
 0x9db   : > { %v7596_v12 = vpop.eup %7595 }
 0x9dc   : > { %v7598_v13 = vpop.eup %7597  ;;  %v3983_v37 = vmul.f32 %v7596_v12, %v7594_v6  ;;  %v9184_v6 = vld [vmem:[%s8195_s9 + $0xcc] ss:$16 sps:$4 sm:$0xff]   ;;  %v9187_v12 = vld [vmem:[%s8195_s9 + $0xc0] ss:$16 sps:$4 sm:$0xff]  }
 0x9dd   : > { %v3982_v36 = vmul.f32 0.0, %v7598_v13  ;;  %v7600_v43 = vpop.eup %7599  ;;  %v9190_v13 = vld [vmem:[%s8195_s9 + $0xc8] ss:$16 sps:$4 sm:$0xff]  }
 0x9df   : > { %v9119_v9 = vadd.f32 %v3983_v37, %v3982_v36  ;;  %v9200_v36 = vld [vmem:[%s8195_s9 + $0xac] ss:$16 sps:$4 sm:$0xff]   ;;  %v9203_v37 = vld [vmem:[%s8195_s9 + $0xa0] ss:$16 sps:$4 sm:$0xff]  }
 0x9e1   : > { %7601 = vtanh.f32 %v9119_v9 }
 0x9ee   : > { %v7602_v3 = vpop.eup %7601 }
 0x9ef   : > { %v3986_v47 = vmul.f32 %v7602_v3, %v7600_v43  ;;  %v9213_v43 = vld [vmem:[%s8195_s9 + $0x84] ss:$16 sps:$4 sm:$0xff]   ;;  %v9216_v3 = vld [vmem:[%s8195_s9 + $0x8c] ss:$16 sps:$4 sm:$0xff]  }
 0x9f1   : > { %v3987_v61 = vpack.c.bf16 %v3986_v47, %v3986_v47  ;;  %v9219_v47 = vld [vmem:[%s8195_s9 + $0x80] ss:$16 sps:$4 sm:$0xff]  }
 0x9f3   : > { %3988 = vst [vmem:[#allocation2] sm:$0xf] %v3987_v61  ;;  %4219 = vmatmul.mubr.bf16.vlgmr.msra.gmra.mxu0 %v3987_v61  ;;  %4260 = vmatmul.mubr.bf16.vlgmr.msra.gmra.mxu1 %v3987_v61  ;;  %v9222_v61 = vld [vmem:[%s8195_s9 + $0x88] ss:$16 sps:$4 sm:$0xff]  }
 0x9f4   : > { %4497 = vmatpush1.bf16.msra.mxu0 %v8875_v56  ;;  %4538 = vmatpush1.bf16.msra.mxu1 %v8878_v51 }
 0x9f5   : > { %4498 = vmatprep.subr.bf16.mxu0 %v8883_v10  ;;  %4539 = vmatprep.subr.bf16.mxu1 %v8886_v57 }
 0x9f6   : > { %4528 = vmatprep.mubr.bf16.mxu0 %v9562_v40  ;;  %4569 = vmatprep.mubr.bf16.mxu1 %v9562_v40 }
 0x9f8   : > { %4499 = vmatpush1.bf16.msra.mxu0 %v8889_v18  ;;  %4540 = vmatpush1.bf16.msra.mxu1 %v8894_v58 }
 0x9f9   : > { %4500 = vmatprep.subr.bf16.mxu0 %v8899_v17  ;;  %4541 = vmatprep.subr.bf16.mxu1 %v8902_v59 }
 0x9fc   : > { %4501 = vmatpush1.bf16.msra.mxu0 %v8907_v31  ;;  %4542 = vmatpush1.bf16.msra.mxu1 %v8910_v7 }
 0x9fd   : > { %4502 = vmatprep.subr.bf16.mxu0 %v8915_v28  ;;  %4543 = vmatprep.subr.bf16.mxu1 %v8920_v21 }
 0xa00   : > { %4503 = vmatpush1.bf16.msra.mxu0 %v8923_v22  ;;  %4544 = vmatpush1.bf16.msra.mxu1 %v8926_v25 }
 0xa01   : > { %4504 = vmatprep.subr.bf16.mxu0 %v8931_v63  ;;  %4545 = vmatprep.subr.bf16.mxu1 %v8936_v44 }
 0xa04   : > { %4505 = vmatpush1.bf16.msra.mxu0 %v8941_v0  ;;  %4546 = vmatpush1.bf16.msra.mxu1 %v8944_v19 }
 0xa05   : > { %4506 = vmatprep.subr.bf16.mxu0 %v8947_v33  ;;  %4547 = vmatprep.subr.bf16.mxu1 %v8950_v23 }
 0xa08   : > { %4507 = vmatpush1.bf16.msra.mxu0 %v8957_v34  ;;  %4548 = vmatpush1.bf16.msra.mxu1 %v8960_v2 }
 0xa09   : > { %4508 = vmatprep.subr.bf16.mxu0 %v8963_v62  ;;  %4549 = vmatprep.subr.bf16.mxu1 %v8966_v8 }
 0xa0c   : > { %4509 = vmatpush1.bf16.msra.mxu0 %v8975_v15  ;;  %4550 = vmatpush1.bf16.msra.mxu1 %v8978_v14 }
 0xa0d   : > { %4510 = vmatprep.subr.bf16.mxu0 %v8981_v26  ;;  %4551 = vmatprep.subr.bf16.mxu1 %v8984_v32 }
 0xa10   : > { %4511 = vmatpush1.bf16.msra.mxu0 %v8991_v20  ;;  %4552 = vmatpush1.bf16.msra.mxu1 %v8994_v16 }
 0xa11   : > { %4806 = vmatprep.subr.bf16.mxu0 %v9165_v52  ;;  %4847 = vmatprep.subr.bf16.mxu1 %v9168_v54 }
 0xab3   : > { %v4220_v56 = vpop.f32.mrf.mxu0  ;;  %v4261_v51 = vpop.f32.mrf.mxu1 }
 0xab4   : > { %v4268_v10 = vadd.f32 %v4220_v56, %v9064_v5  ;;  %v4270_v22 = vadd.f32 %v4261_v51, %v9067_v50  ;;  %v9227_v56 = vld [vmem:[%s8195_s9 + $0x64] ss:$16 sps:$4 sm:$0xff]   ;;  %v9230_v51 = vld [vmem:[%s8195_s9 + $0x6c] ss:$16 sps:$4 sm:$0xff]  }
 0xab5   : > { %v4222_v57 = vpop.f32.mrf.mxu0  ;;  %v4263_v18 = vpop.f32.mrf.mxu1 }
 0xab6   : > { %v6791_v58 = vmul.f32 -1.442695, %v4268_v10  ;;  %v4269_v17 = vadd.f32 %v4222_v57, %v9070_v35  ;;  %v6793_v25 = vmul.f32 -1.442695, %v4270_v22  ;;  %v4271_v44 = vadd.f32 %v4263_v18, %v9073_v55  ;;  %v9235_v10 = vld [vmem:[%s8195_s9 + $0x60] ss:$16 sps:$4 sm:$0xff]  }
 0xab7   : > { %v4224_v59 = vpop.f32.mrf.mxu0  ;;  %v4265_v31 = vpop.f32.mrf.mxu1  ;;  %v9238_v57 = vld [vmem:[%s8195_s9 + $0x68] ss:$16 sps:$4 sm:$0xff]   ;;  %v9243_v18 = vld [vmem:[%s8195_s9 + $0x44] ss:$16 sps:$4 sm:$0xff]  }
 0xab8   : > { %7603 = vpow2.f32 %v6791_v58  ;;  %v6792_v7 = vmul.f32 -1.442695, %v4269_v17  ;;  %v9246_v58 = vld [vmem:[%s8195_s9 + $0x4c] ss:$16 sps:$4 sm:$0xff]   ;;  %v9251_v17 = vld [vmem:[%s8195_s9 + $0x40] ss:$16 sps:$4 sm:$0xff]  }
 0xab9   : > { %v4225_v28 = vpop.f32.mrf.mxu0  ;;  %v4266_v21 = vpop.f32.mrf.mxu1  ;;  %v9254_v59 = vld [vmem:[%s8195_s9 + $0x48] ss:$16 sps:$4 sm:$0xff]  }
 0xaba   : > { %7605 = vpow2.f32 %v6792_v7 }
 0xabb   : > { %7607 = vpow2.f32 %v6793_v25 }
 0xac5   : > { %v7604_v63 = vpop.eup %7603 }
 0xac6   : > { %v4281_v0 = vadd.f32 1.0, %v7604_v63 }
 0xac7   : > { %v7606_v19 = vpop.eup %7605 }
 0xac8   : > { %7609 = vrcp.f32 %v4281_v0  ;;  %v4282_v33 = vadd.f32 1.0, %v7606_v19  ;;  %v7608_v23 = vpop.eup %7607 }
 0xac9   : > { %7611 = vtanh.f32 %v4271_v44  ;;  %v4283_v35 = vadd.f32 1.0, %v7608_v23 }
 0xaca   : > { %7613 = vrcp.f32 %v4282_v33 }
 0xacb   : > { %7615 = vrcp.f32 %v4283_v35 }
 0xad5   : > { %v7610_v34 = vpop.eup %7609 }
 0xad6   : > { %v7612_v2 = vpop.eup %7611 }
 0xad7   : > { %v7614_v5 = vpop.eup %7613  ;;  %v4292_v1 = vmul.f32 %v7612_v2, %v7610_v34 }
 0xad8   : > { %v4291_v50 = vmul.f32 %v7614_v5, %v9119_v9  ;;  %v7616_v4 = vpop.eup %7615  ;;  %v9206_v9 = vld [vmem:[%s8195_s9 + $0xa8] ss:$16 sps:$4 sm:$0xff]  }
 0xada   : > { %v9159_v55 = vadd.f32 %v4292_v1, %v4291_v50 }
 0xadc   : > { %7617 = vtanh.f32 %v9159_v55 }
 0xae9   : > { %v7618_v38 = vpop.eup %7617 }
 0xaea   : > { %v4295_v39 = vmul.f32 %v7618_v38, %v7616_v4  ;;  %v9306_v38 = vld [vmem:[%s8195_s9 + $0x24] ss:$16 sps:$4 sm:$0xff]  }
 0xaec   : > { %v4296_v49 = vpack.c.bf16 %v4295_v39, %v4295_v39  ;;  %v9309_v39 = vld [vmem:[%s8195_s9 + $0x28] ss:$16 sps:$4 sm:$0xff]  }
 0xaee   : > { %4298 = vst [vmem:[#allocation2 + $0x4] sm:$0xf] %v4296_v49  ;;  %4529 = vmatmul.mubr.bf16.vlgmr.msra.gmra.mxu0 %v4296_v49  ;;  %4570 = vmatmul.mubr.bf16.vlgmr.msra.gmra.mxu1 %v4296_v49  ;;  %v9312_v49 = vld [vmem:[%s8195_s9 + $0x2c] ss:$16 sps:$4 sm:$0xff]  }
 0xaef   : > { %4838 = vmatprep.mubr.bf16.mxu0 %v9562_v40  ;;  %4879 = vmatprep.mubr.bf16.mxu1 %v9562_v40 }
 0xaf0   : > { %4807 = vmatpush1.bf16.msra.mxu0 %v9171_v42  ;;  %4848 = vmatpush1.bf16.msra.mxu1 %v9174_v29 }
 0xaf1   : > { %4808 = vmatprep.subr.bf16.mxu0 %v9181_v48  ;;  %4849 = vmatprep.subr.bf16.mxu1 %v9184_v6 }
 0xaf4   : > { %4809 = vmatpush1.bf16.msra.mxu0 %v9187_v12  ;;  %4850 = vmatpush1.bf16.msra.mxu1 %v9190_v13 }
 0xaf5   : > { %4810 = vmatprep.subr.bf16.mxu0 %v9197_v60  ;;  %4851 = vmatprep.subr.bf16.mxu1 %v9200_v36 }
 0xaf8   : > { %4811 = vmatpush1.bf16.msra.mxu0 %v9203_v37  ;;  %4852 = vmatpush1.bf16.msra.mxu1 %v9206_v9 }
 0xaf9   : > { %4812 = vmatprep.subr.bf16.mxu0 %v9213_v43  ;;  %4853 = vmatprep.subr.bf16.mxu1 %v9216_v3 }
 0xafc   : > { %4813 = vmatpush1.bf16.msra.mxu0 %v9219_v47  ;;  %4854 = vmatpush1.bf16.msra.mxu1 %v9222_v61 }
 0xafd   : > { %4814 = vmatprep.subr.bf16.mxu0 %v9227_v56  ;;  %4855 = vmatprep.subr.bf16.mxu1 %v9230_v51 }
 0xb00   : > { %4815 = vmatpush1.bf16.msra.mxu0 %v9235_v10  ;;  %4856 = vmatpush1.bf16.msra.mxu1 %v9238_v57 }
 0xb01   : > { %4816 = vmatprep.subr.bf16.mxu0 %v9243_v18  ;;  %4857 = vmatprep.subr.bf16.mxu1 %v9246_v58 }
 0xb04   : > { %4817 = vmatpush1.bf16.msra.mxu0 %v9251_v17  ;;  %4858 = vmatpush1.bf16.msra.mxu1 %v9254_v59 }
 0xb05   : > { %4818 = vmatprep.subr.bf16.mxu0 %v8963_v62  ;;  %4859 = vmatprep.subr.bf16.mxu1 %v8966_v8 }
 0xb08   : > { %4819 = vmatpush1.bf16.msra.mxu0 %v8975_v15  ;;  %4860 = vmatpush1.bf16.msra.mxu1 %v8978_v14 }
 0xb09   : > { %4820 = vmatprep.subr.bf16.mxu0 %v8981_v26  ;;  %4861 = vmatprep.subr.bf16.mxu1 %v8984_v32 }
 0xb0c   : > { %4821 = vmatpush1.bf16.msra.mxu0 %v8991_v20  ;;  %4862 = vmatpush1.bf16.msra.mxu1 %v8994_v16 }
 0xb0d   : > { %5116 = vmatprep.subr.bf16.mxu0 %v9165_v52  ;;  %5157 = vmatprep.subr.bf16.mxu1 %v9168_v54 }
 0xbae   : > { %v4530_v31 = vpop.f32.mrf.mxu0  ;;  %v4571_v62 = vpop.f32.mrf.mxu1 }
 0xbaf   : > { %v4578_v8 = vadd.f32 %v4530_v31, %v9076_v30  ;;  %v4580_v16 = vadd.f32 %v4571_v62, %v9079_v27  ;;  %v9315_v31 = vld [vmem:[%s8195_s9 + $0x4] ss:$16 sps:$4 sm:$0xff]   ;;  %v9319_v62 = vld [vmem:[%s8195_s9 + $0xc] ss:$16 sps:$4 sm:$0xff]  }
 0xbb0   : > { %v4532_v7 = vpop.f32.mrf.mxu0  ;;  %v4573_v15 = vpop.f32.mrf.mxu1 }
 0xbb1   : > { %v6826_v28 = vmul.f32 -1.442695, %v4578_v8  ;;  %v4579_v14 = vadd.f32 %v4532_v7, %v9082_v45  ;;  %v6828_v25 = vmul.f32 -1.442695, %v4580_v16  ;;  %v4581_v44 = vadd.f32 %v4573_v15, %v9085_v24  ;;  %v9324_v8 = vld [vmem:[%s8195_s9] ss:$16 sps:$4 sm:$0xff]  }
 0xbb2   : > { %v4534_v26 = vpop.f32.mrf.mxu0  ;;  %v4575_v21 = vpop.f32.mrf.mxu1  ;;  %v9329_v7 = vld [vmem:[%s8195_s9 + $0x8] ss:$16 sps:$4 sm:$0xff]  }
 0xbb3   : > { %7619 = vpow2.f32 %v6826_v28  ;;  %v6827_v32 = vmul.f32 -1.442695, %v4579_v14 }
 0xbb4   : > { %v4535_v20 = vpop.f32.mrf.mxu0  ;;  %v4576_v22 = vpop.f32.mrf.mxu1 }
 0xbb5   : > { %7621 = vpow2.f32 %v6827_v32 }
 0xbb6   : > { %7623 = vpow2.f32 %v6828_v25 }
 0xbc0   : > { %v7620_v63 = vpop.eup %7619 }
 0xbc1   : > { %v4591_v0 = vadd.f32 1.0, %v7620_v63 }
 0xbc2   : > { %v7622_v30 = vpop.eup %7621 }
 0xbc3   : > { %7625 = vrcp.f32 %v4591_v0  ;;  %v4592_v19 = vadd.f32 1.0, %v7622_v30  ;;  %v7624_v45 = vpop.eup %7623 }
 0xbc4   : > { %7627 = vtanh.f32 %v4581_v44  ;;  %v4593_v2 = vadd.f32 1.0, %v7624_v45 }
 0xbc5   : > { %7629 = vrcp.f32 %v4592_v19 }
 0xbc6   : > { %7631 = vrcp.f32 %v4593_v2 }
 0xbd0   : > { %v7626_v33 = vpop.eup %7625 }
 0xbd1   : > { %v7628_v23 = vpop.eup %7627 }
 0xbd2   : > { %v7630_v34 = vpop.eup %7629  ;;  %v4602_v35 = vmul.f32 %v7628_v23, %v7626_v33 }
 0xbd3   : > { %v4601_v5 = vmul.f32 %v7630_v34, %v9159_v55  ;;  %v7632_v24 = vpop.eup %7631  ;;  %v9303_v55 = vld [vmem:[%s8195_s9 + $0x20] ss:$16 sps:$4 sm:$0xff]  }
 0xbd5   : > { %v9275_v27 = vadd.f32 %v4602_v35, %v4601_v5 }
 0xbd7   : > { %7633 = vtanh.f32 %v9275_v27 }
 0xbe4   : > { %v7634_v50 = vpop.eup %7633 }
 0xbe5   : > { %v4605_v1 = vmul.f32 %v7634_v50, %v7632_v24 }
 0xbe7   : > { %v4606_v4 = vpack.c.bf16 %v4605_v1, %v4605_v1 }
 0xbe9   : > { %4608 = vst [vmem:[#allocation2 + $0x8] sm:$0xf] %v4606_v4  ;;  %4839 = vmatmul.mubr.bf16.vlgmr.msra.gmra.mxu0 %v4606_v4  ;;  %4880 = vmatmul.mubr.bf16.vlgmr.msra.gmra.mxu1 %v4606_v4 }
 0xbea   : > { %5117 = vmatpush1.bf16.msra.mxu0 %v9171_v42  ;;  %5158 = vmatpush1.bf16.msra.mxu1 %v9174_v29 }
 0xbeb   : > { %5118 = vmatprep.subr.bf16.mxu0 %v9181_v48  ;;  %5159 = vmatprep.subr.bf16.mxu1 %v9184_v6 }
 0xbec   : > { %5148 = vmatprep.mubr.bf16.mxu0 %v9562_v40  ;;  %5189 = vmatprep.mubr.bf16.mxu1 %v9562_v40 }
 0xbee   : > { %5119 = vmatpush1.bf16.msra.mxu0 %v9187_v12  ;;  %5160 = vmatpush1.bf16.msra.mxu1 %v9190_v13 }
 0xbef   : > { %5120 = vmatprep.subr.bf16.mxu0 %v9197_v60  ;;  %5161 = vmatprep.subr.bf16.mxu1 %v9200_v36 }
 0xbf2   : > { %5121 = vmatpush1.bf16.msra.mxu0 %v9203_v37  ;;  %5162 = vmatpush1.bf16.msra.mxu1 %v9206_v9 }
 0xbf3   : > { %5122 = vmatprep.subr.bf16.mxu0 %v9213_v43  ;;  %5163 = vmatprep.subr.bf16.mxu1 %v9216_v3 }
 0xbf6   : > { %5123 = vmatpush1.bf16.msra.mxu0 %v9219_v47  ;;  %5164 = vmatpush1.bf16.msra.mxu1 %v9222_v61 }
 0xbf7   : > { %5124 = vmatprep.subr.bf16.mxu0 %v9227_v56  ;;  %5165 = vmatprep.subr.bf16.mxu1 %v9230_v51 }
 0xbfa   : > { %5125 = vmatpush1.bf16.msra.mxu0 %v9235_v10  ;;  %5166 = vmatpush1.bf16.msra.mxu1 %v9238_v57 }
 0xbfb   : > { %5126 = vmatprep.subr.bf16.mxu0 %v9243_v18  ;;  %5167 = vmatprep.subr.bf16.mxu1 %v9246_v58 }
 0xbfe   : > { %5127 = vmatpush1.bf16.msra.mxu0 %v9251_v17  ;;  %5168 = vmatpush1.bf16.msra.mxu1 %v9254_v59 }
 0xbff   : > { %5128 = vmatprep.subr.bf16.mxu0 %v9306_v38  ;;  %5169 = vmatprep.subr.bf16.mxu1 %v9312_v49 }
 0xc02   : > { %5129 = vmatpush1.bf16.msra.mxu0 %v9303_v55  ;;  %5170 = vmatpush1.bf16.msra.mxu1 %v9309_v39 }
 0xc03   : > { %5130 = vmatprep.subr.bf16.mxu0 %v9315_v31  ;;  %5171 = vmatprep.subr.bf16.mxu1 %v9319_v62 }
 0xc06   : > { %5131 = vmatpush1.bf16.msra.mxu0 %v9324_v8  ;;  %5172 = vmatpush1.bf16.msra.mxu1 %v9329_v7 }
 0xc07   : > { %5426 = vmatprep.subr.bf16.mxu0 %v9165_v52  ;;  %5467 = vmatprep.subr.bf16.mxu1 %v9168_v54 }
 0xca9   : > { %v4840_v15 = vpop.f32.mrf.mxu0  ;;  %v4881_v28 = vpop.f32.mrf.mxu1 }
 0xcaa   : > { %v4888_v14 = vadd.f32 %v4840_v15, %v9088_v53  ;;  %v4890_v0 = vadd.f32 %v4881_v28, %v9091_v46 }
 0xcab   : > { %v4842_v26 = vpop.f32.mrf.mxu0  ;;  %v4883_v21 = vpop.f32.mrf.mxu1 }
 0xcac   : > { %v6861_v32 = vmul.f32 -1.442695, %v4888_v14  ;;  %v4889_v20 = vadd.f32 %v4842_v26, %v9094_v41  ;;  %v6863_v30 = vmul.f32 -1.442695, %v4890_v0  ;;  %v4891_v45 = vadd.f32 %v4883_v21, %v9097_v11  ;;  %v4921_v21 = vld [vmem:[#allocation3 + $0x58] sm:$0xff] }
 0xcad   : > { %v4844_v22 = vpop.f32.mrf.mxu0  ;;  %v4885_v16 = vpop.f32.mrf.mxu1 }
 0xcae   : > { %7635 = vpow2.f32 %v6861_v32  ;;  %v6862_v25 = vmul.f32 -1.442695, %v4889_v20 }
 0xcaf   : > { %v4845_v63 = vpop.f32.mrf.mxu0  ;;  %v4886_v44 = vpop.f32.mrf.mxu1 }
 0xcb0   : > { %7637 = vpow2.f32 %v6862_v25 }
 0xcb1   : > { %7639 = vpow2.f32 %v6863_v30 }
 0xcbb   : > { %v7636_v19 = vpop.eup %7635 }
 0xcbc   : > { %v4901_v33 = vadd.f32 1.0, %v7636_v19  ;;  %v4922_v19 = vld [vmem:[#allocation3 + $0x40] sm:$0xff] }
 0xcbd   : > { %v7638_v53 = vpop.eup %7637 }
 0xcbe   : > { %7641 = vrcp.f32 %v4901_v33  ;;  %v4902_v23 = vadd.f32 1.0, %v7638_v53  ;;  %v7640_v41 = vpop.eup %7639 }
 0xcbf   : > { %7643 = vtanh.f32 %v4891_v45  ;;  %v4903_v35 = vadd.f32 1.0, %v7640_v41 }
 0xcc0   : > { %7645 = vrcp.f32 %v4902_v23 }
 0xcc1   : > { %7647 = vrcp.f32 %v4903_v35 }
 0xccb   : > { %v7642_v34 = vpop.eup %7641 }
 0xccc   : > { %v7644_v2 = vpop.eup %7643 }
 0xccd   : > { %v7646_v5 = vpop.eup %7645  ;;  %v4912_v50 = vmul.f32 %v7644_v2, %v7642_v34 }
 0xcce   : > { %v4911_v24 = vmul.f32 %v7646_v5, %v9275_v27  ;;  %v7648_v11 = vpop.eup %7647  ;;  %v4920_v27 = vld [vmem:[#allocation3 + $0x38] sm:$0xff] }
 0xcd0   : > { %v9341_v46 = vadd.f32 %v4912_v50, %v4911_v24 }
 0xcd2   : > { %7649 = vtanh.f32 %v9341_v46 }
 0xcdf   : > { %v7650_v1 = vpop.eup %7649 }
 0xce0   : > { %v4915_v4 = vmul.f32 %v7650_v1, %v7648_v11 }
 0xce2   : > { %v4916_v15 = vpack.c.bf16 %v4915_v4, %v4915_v4 }
 0xce4   : > { %4918 = vst [vmem:[#allocation2 + $0xc] sm:$0xf] %v4916_v15  ;;  %5149 = vmatmul.mubr.bf16.vlgmr.msra.gmra.mxu0 %v4916_v15  ;;  %5190 = vmatmul.mubr.bf16.vlgmr.msra.gmra.mxu1 %v4916_v15 }
 0xce5   : > { %5427 = vmatpush1.bf16.msra.mxu0 %v9171_v42  ;;  %5468 = vmatpush1.bf16.msra.mxu1 %v9174_v29 }
 0xce6   : > { %5428 = vmatprep.subr.bf16.mxu0 %v9181_v48  ;;  %5469 = vmatprep.subr.bf16.mxu1 %v9184_v6 }
 0xce7   : > { %5458 = vmatprep.mubr.bf16.mxu0 %v9562_v40  ;;  %5499 = vmatprep.mubr.bf16.mxu1 %v9562_v40 }
 0xce9   : > { %5429 = vmatpush1.bf16.msra.mxu0 %v9187_v12  ;;  %5470 = vmatpush1.bf16.msra.mxu1 %v9190_v13 }
 0xcea   : > { %5430 = vmatprep.subr.bf16.mxu0 %v9197_v60  ;;  %5471 = vmatprep.subr.bf16.mxu1 %v9200_v36 }
 0xced   : > { %5431 = vmatpush1.bf16.msra.mxu0 %v9203_v37  ;;  %5472 = vmatpush1.bf16.msra.mxu1 %v9206_v9 }
 0xcee   : > { %5432 = vmatprep.subr.bf16.mxu0 %v9213_v43  ;;  %5473 = vmatprep.subr.bf16.mxu1 %v9216_v3 }
 0xcf1   : > { %5433 = vmatpush1.bf16.msra.mxu0 %v9219_v47  ;;  %5474 = vmatpush1.bf16.msra.mxu1 %v9222_v61 }
 0xcf2   : > { %5434 = vmatprep.subr.bf16.mxu0 %v9227_v56  ;;  %5475 = vmatprep.subr.bf16.mxu1 %v9230_v51 }
 0xcf5   : > { %5435 = vmatpush1.bf16.msra.mxu0 %v9235_v10  ;;  %5476 = vmatpush1.bf16.msra.mxu1 %v9238_v57 }
 0xcf6   : > { %5436 = vmatprep.subr.bf16.mxu0 %v9243_v18  ;;  %5477 = vmatprep.subr.bf16.mxu1 %v9246_v58 }
 0xcf9   : > { %5437 = vmatpush1.bf16.msra.mxu0 %v9251_v17  ;;  %5478 = vmatpush1.bf16.msra.mxu1 %v9254_v59 }
 0xcfa   : > { %5438 = vmatprep.subr.bf16.mxu0 %v9306_v38  ;;  %5479 = vmatprep.subr.bf16.mxu1 %v9312_v49 }
 0xcfd   : > { %5439 = vmatpush1.bf16.msra.mxu0 %v9303_v55  ;;  %5480 = vmatpush1.bf16.msra.mxu1 %v9309_v39 }
 0xcfe   : > { %5440 = vmatprep.subr.bf16.mxu0 %v9315_v31  ;;  %5481 = vmatprep.subr.bf16.mxu1 %v9319_v62 }
 0xd01   : > { %5441 = vmatpush1.bf16.msra.mxu0 %v9324_v8  ;;  %5482 = vmatpush1.bf16.msra.mxu1 %v9329_v7 }
 0xd02   : > { %5736 = vmatprep.subr.bf16.mxu0 %v9165_v52  ;;  %5777 = vmatprep.subr.bf16.mxu1 %v9168_v54  ;;  %v4923_v54 = vld [vmem:[#allocation3 + $0xc8] sm:$0xff] }
 0xda4   : > { %v5150_v28 = vpop.f32.mrf.mxu0  ;;  %v5191_v14 = vpop.f32.mrf.mxu1 }
 0xda5   : > { %v5198_v26 = vadd.f32 %v5150_v28, %v4920_v27  ;;  %v5200_v52 = vadd.f32 %v5191_v14, %v4922_v19 }
 0xda6   : > { %v5152_v32 = vpop.f32.mrf.mxu0  ;;  %v5193_v20 = vpop.f32.mrf.mxu1 }
 0xda7   : > { %v6896_v22 = vmul.f32 -1.442695, %v5198_v26  ;;  %v5199_v16 = vadd.f32 %v5152_v32, %v4921_v21  ;;  %v6898_v45 = vmul.f32 -1.442695, %v5200_v52  ;;  %v5201_v53 = vadd.f32 %v5193_v20, %v4923_v54  ;;  %v7553_v52 = vld [vmem:[%s8195_s9 + $0xe4] ss:$16 sps:$4 sm:$0xff]  }
 0xda8   : > { %v5154_v25 = vpop.f32.mrf.mxu0  ;;  %v5195_v63 = vpop.f32.mrf.mxu1  ;;  %v7551_v54 = vld [vmem:[%s8195_s9 + $0xe0] ss:$16 sps:$4 sm:$0xff]  }
 0xda9   : > { %7651 = vpow2.f32 %v6896_v22  ;;  %v6897_v44 = vmul.f32 -1.442695, %v5199_v16 }
 0xdaa   : > { %v5155_v0 = vpop.f32.mrf.mxu0  ;;  %v5196_v30 = vpop.f32.mrf.mxu1 }
 0xdab   : > { %7653 = vpow2.f32 %v6897_v44 }
 0xdac   : > { %7655 = vpow2.f32 %v6898_v45  ;;  %v7556_v45 = vld [vmem:[%s8195_s9 + $0xec] ss:$16 sps:$4 sm:$0xff]  }
 0xdb6   : > { %v7652_v33 = vpop.eup %7651 }
 0xdb7   : > { %v5211_v23 = vadd.f32 1.0, %v7652_v33  ;;  %v7554_v33 = vld [vmem:[%s8195_s9 + $0xe8] ss:$16 sps:$4 sm:$0xff]  }
 0xdb8   : > { %v7654_v41 = vpop.eup %7653 }
 0xdb9   : > { %7657 = vrcp.f32 %v5211_v23  ;;  %v5212_v34 = vadd.f32 1.0, %v7654_v41  ;;  %v7656_v2 = vpop.eup %7655  ;;  %v7562_v23 = vld [vmem:[%s8195_s9 + $0xcc] ss:$16 sps:$4 sm:$0xff]   ;;  %v7557_v41 = vld [vmem:[%s8195_s9 + $0xc0] ss:$16 sps:$4 sm:$0xff]  }
 0xdba   : > { %7659 = vtanh.f32 %v5201_v53  ;;  %v5213_v50 = vadd.f32 1.0, %v7656_v2  ;;  %v7559_v53 = vld [vmem:[%s8195_s9 + $0xc4] ss:$16 sps:$4 sm:$0xff]   ;;  %v7568_v2 = vld [vmem:[%s8195_s9 + $0xac] ss:$16 sps:$4 sm:$0xff]  }
 0xdbb   : > { %7661 = vrcp.f32 %v5212_v34  ;;  %v7560_v34 = vld [vmem:[%s8195_s9 + $0xc8] ss:$16 sps:$4 sm:$0xff]  }
 0xdbc   : > { %7663 = vrcp.f32 %v5213_v50  ;;  %v7574_v50 = vld [vmem:[%s8195_s9 + $0x8c] ss:$16 sps:$4 sm:$0xff]  }
 0xdc6   : > { %v7658_v5 = vpop.eup %7657 }
 0xdc7   : > { %v7660_v35 = vpop.eup %7659 }
 0xdc8   : > { %v7662_v24 = vpop.eup %7661  ;;  %v5222_v1 = vmul.f32 %v7660_v35, %v7658_v5  ;;  %v7563_v5 = vld [vmem:[%s8195_s9 + $0xa0] ss:$16 sps:$4 sm:$0xff]   ;;  %v7566_v35 = vld [vmem:[%s8195_s9 + $0xa8] ss:$16 sps:$4 sm:$0xff]  }
 0xdc9   : > { %v5221_v11 = vmul.f32 %v7662_v24, %v9341_v46  ;;  %v7664_v15 = vpop.eup %7663  ;;  %v7571_v24 = vld [vmem:[%s8195_s9 + $0x84] ss:$16 sps:$4 sm:$0xff]  }
 0xdcb   : > { %v9379_v4 = vadd.f32 %v5222_v1, %v5221_v11  ;;  %v7569_v11 = vld [vmem:[%s8195_s9 + $0x80] ss:$16 sps:$4 sm:$0xff]   ;;  %v7572_v1 = vld [vmem:[%s8195_s9 + $0x88] ss:$16 sps:$4 sm:$0xff]  }
 0xdcd   : > { %7665 = vtanh.f32 %v9379_v4 }
 0xdda   : > { %v7666_v27 = vpop.eup %7665 }
 0xddb   : > { %v5225_v28 = vmul.f32 %v7666_v27, %v7664_v15  ;;  %v7580_v15 = vld [vmem:[%s8195_s9 + $0x6c] ss:$16 sps:$4 sm:$0xff]   ;;  %v7575_v27 = vld [vmem:[%s8195_s9 + $0x60] ss:$16 sps:$4 sm:$0xff]  }
 0xddd   : > { %v5226_v14 = vpack.c.bf16 %v5225_v28, %v5225_v28  ;;  %v7578_v28 = vld [vmem:[%s8195_s9 + $0x68] ss:$16 sps:$4 sm:$0xff]  }
 0xddf   : > { %5228 = vst [vmem:[#allocation2 + $0x10] sm:$0xf] %v5226_v14  ;;  %5459 = vmatmul.mubr.bf16.vlgmr.msra.gmra.mxu0 %v5226_v14  ;;  %5500 = vmatmul.mubr.bf16.vlgmr.msra.gmra.mxu1 %v5226_v14  ;;  %v7583_v14 = vld [vmem:[%s8195_s9 + $0x44] ss:$16 sps:$4 sm:$0xff]  }
 0xde0   : > { %5737 = vmatpush1.bf16.msra.mxu0 %v9171_v42  ;;  %5778 = vmatpush1.bf16.msra.mxu1 %v9174_v29  ;;  %v5230_v42 = vld [vmem:[#allocation3 + $0xe0] sm:$0xff] }
 0xde1   : > { %5738 = vmatprep.subr.bf16.mxu0 %v9181_v48  ;;  %5779 = vmatprep.subr.bf16.mxu1 %v9184_v6 }
 0xde2   : > { %5768 = vmatprep.mubr.bf16.mxu0 %v9562_v40  ;;  %5809 = vmatprep.mubr.bf16.mxu1 %v9562_v40 }
 0xde4   : > { %5739 = vmatpush1.bf16.msra.mxu0 %v9187_v12  ;;  %5780 = vmatpush1.bf16.msra.mxu1 %v9190_v13  ;;  %v5231_v12 = vld [vmem:[#allocation3 + $0x90] sm:$0xff] }
 0xde5   : > { %5740 = vmatprep.subr.bf16.mxu0 %v9197_v60  ;;  %5781 = vmatprep.subr.bf16.mxu1 %v9200_v36 }
 0xde8   : > { %5741 = vmatpush1.bf16.msra.mxu0 %v9203_v37  ;;  %5782 = vmatpush1.bf16.msra.mxu1 %v9206_v9 }
 0xde9   : > { %5742 = vmatprep.subr.bf16.mxu0 %v9213_v43  ;;  %5783 = vmatprep.subr.bf16.mxu1 %v9216_v3 }
 0xdec   : > { %5743 = vmatpush1.bf16.msra.mxu0 %v9219_v47  ;;  %5784 = vmatpush1.bf16.msra.mxu1 %v9222_v61 }
 0xded   : > { %5744 = vmatprep.subr.bf16.mxu0 %v9227_v56  ;;  %5785 = vmatprep.subr.bf16.mxu1 %v9230_v51  ;;  %v5232_v56 = vld [vmem:[#allocation3 + $0x70] sm:$0xff] }
 0xdf0   : > { %5745 = vmatpush1.bf16.msra.mxu0 %v9235_v10  ;;  %5786 = vmatpush1.bf16.msra.mxu1 %v9238_v57  ;;  %v5233_v57 = vld [vmem:[#allocation3 + $0xc0] sm:$0xff] }
 0xdf1   : > { %5746 = vmatprep.subr.bf16.mxu0 %v9243_v18  ;;  %5787 = vmatprep.subr.bf16.mxu1 %v9246_v58 }
 0xdf4   : > { %5747 = vmatpush1.bf16.msra.mxu0 %v9251_v17  ;;  %5788 = vmatpush1.bf16.msra.mxu1 %v9254_v59 }
 0xdf5   : > { %5748 = vmatprep.subr.bf16.mxu0 %v9306_v38  ;;  %5789 = vmatprep.subr.bf16.mxu1 %v9312_v49 }
 0xdf8   : > { %5749 = vmatpush1.bf16.msra.mxu0 %v9303_v55  ;;  %5790 = vmatpush1.bf16.msra.mxu1 %v9309_v39 }
 0xdf9   : > { %5750 = vmatprep.subr.bf16.mxu0 %v9315_v31  ;;  %5791 = vmatprep.subr.bf16.mxu1 %v9319_v62 }
 0xdfc   : > { %5751 = vmatpush1.bf16.msra.mxu0 %v9324_v8  ;;  %5792 = vmatpush1.bf16.msra.mxu1 %v9329_v7 }
 0xdfd   : > { %6046 = vmatprep.subr.bf16.mxu0 %v7553_v52  ;;  %6087 = vmatprep.subr.bf16.mxu1 %v7556_v45  ;;  %v5851_v52 = vld [vmem:[#allocation3 + $0xf8] sm:$0xff] }
 0xe9f   : > { %v5460_v29 = vpop.f32.mrf.mxu0  ;;  %v5501_v48 = vpop.f32.mrf.mxu1 }
 0xea0   : > { %v5508_v6 = vadd.f32 %v5460_v29, %v5230_v42  ;;  %v5510_v51 = vadd.f32 %v5501_v48, %v5232_v56  ;;  %v7586_v42 = vld [vmem:[%s8195_s9 + $0x4c] ss:$16 sps:$4 sm:$0xff]   ;;  %v7581_v29 = vld [vmem:[%s8195_s9 + $0x40] ss:$16 sps:$4 sm:$0xff]   ;;  %v7584_v48 = vld [vmem:[%s8195_s9 + $0x48] ss:$16 sps:$4 sm:$0xff]  }
 0xea1   : > { %v5462_v13 = vpop.f32.mrf.mxu0  ;;  %v5503_v60 = vpop.f32.mrf.mxu1 }
 0xea2   : > { %v6931_v36 = vmul.f32 -1.442695, %v5508_v6  ;;  %v5509_v37 = vadd.f32 %v5462_v13, %v5231_v12  ;;  %v6933_v10 = vmul.f32 -1.442695, %v5510_v51  ;;  %v5511_v58 = vadd.f32 %v5503_v60, %v5233_v57  ;;  %v5540_v6 = vld [vmem:[#allocation3 + $0xa8] sm:$0xff] }
 0xea3   : > { %v5464_v9 = vpop.f32.mrf.mxu0  ;;  %v5505_v43 = vpop.f32.mrf.mxu1 }
 0xea4   : > { %7667 = vpow2.f32 %v6931_v36  ;;  %v6932_v3 = vmul.f32 -1.442695, %v5509_v37  ;;  %v5541_v36 = vld [vmem:[#allocation3 + $0xd0] sm:$0xff] }
 0xea5   : > { %v5465_v47 = vpop.f32.mrf.mxu0  ;;  %v5506_v61 = vpop.f32.mrf.mxu1 }
 0xea6   : > { %7669 = vpow2.f32 %v6932_v3 }
 0xea7   : > { %7671 = vpow2.f32 %v6933_v10 }
 0xeb1   : > { %v7668_v18 = vpop.eup %7667 }
 0xeb2   : > { %v5521_v17 = vadd.f32 1.0, %v7668_v18 }
 0xeb3   : > { %v7670_v59 = vpop.eup %7669 }
 0xeb4   : > { %7673 = vrcp.f32 %v5521_v17  ;;  %v5522_v46 = vadd.f32 1.0, %v7670_v59  ;;  %v7672_v26 = vpop.eup %7671 }
 0xeb5   : > { %7675 = vtanh.f32 %v5511_v58  ;;  %v5523_v22 = vadd.f32 1.0, %v7672_v26 }
 0xeb6   : > { %7677 = vrcp.f32 %v5522_v46 }
 0xeb7   : > { %7679 = vrcp.f32 %v5523_v22 }
 0xec1   : > { %v7674_v21 = vpop.eup %7673 }
 0xec2   : > { %v7676_v32 = vpop.eup %7675 }
 0xec3   : > { %v7678_v20 = vpop.eup %7677  ;;  %v5532_v25 = vmul.f32 %v7676_v32, %v7674_v21 }
 0xec4   : > { %v5531_v16 = vmul.f32 %v7678_v20, %v9379_v4  ;;  %v7680_v44 = vpop.eup %7679  ;;  %v7577_v4 = vld [vmem:[%s8195_s9 + $0x64] ss:$16 sps:$4 sm:$0xff]  }
 0xec6   : > { %v9415_v63 = vadd.f32 %v5532_v25, %v5531_v16 }
 0xec8   : > { %7681 = vtanh.f32 %v9415_v63 }
 0xed5   : > { %v7682_v0 = vpop.eup %7681 }
 0xed6   : > { %v5535_v30 = vmul.f32 %v7682_v0, %v7680_v44  ;;  %v5850_v44 = vld [vmem:[#allocation3 + $0xa0] sm:$0xff] }
 0xed8   : > { %v5536_v19 = vpack.c.bf16 %v5535_v30, %v5535_v30 }
 0xeda   : > { %5538 = vst [vmem:[#allocation2 + $0x14] sm:$0xf] %v5536_v19  ;;  %5769 = vmatmul.mubr.bf16.vlgmr.msra.gmra.mxu0 %v5536_v19  ;;  %5810 = vmatmul.mubr.bf16.vlgmr.msra.gmra.mxu1 %v5536_v19 }
 0xedb   : > { %6078 = vmatprep.mubr.bf16.mxu0 %v9562_v40  ;;  %6119 = vmatprep.mubr.bf16.mxu1 %v9562_v40  ;;  %v7565_v40 = vld [vmem:[%s8195_s9 + $0xa4] ss:$16 sps:$4 sm:$0xff]  }
 0xedc   : > { %6047 = vmatpush1.bf16.msra.mxu0 %v7551_v54  ;;  %6088 = vmatpush1.bf16.msra.mxu1 %v7554_v33 }
 0xedd   : > { %6048 = vmatprep.subr.bf16.mxu0 %v7559_v53  ;;  %6089 = vmatprep.subr.bf16.mxu1 %v7562_v23 }
 0xee0   : > { %6049 = vmatpush1.bf16.msra.mxu0 %v7557_v41  ;;  %6090 = vmatpush1.bf16.msra.mxu1 %v7560_v34 }
 0xee1   : > { %6050 = vmatprep.subr.bf16.mxu0 %v7565_v40  ;;  %6091 = vmatprep.subr.bf16.mxu1 %v7568_v2  ;;  %v5852_v2 = vld [vmem:[#allocation3 + $0x20] sm:$0xff] }
 0xee4   : > { %6051 = vmatpush1.bf16.msra.mxu0 %v7563_v5  ;;  %6092 = vmatpush1.bf16.msra.mxu1 %v7566_v35 }
 0xee5   : > { %6052 = vmatprep.subr.bf16.mxu0 %v7571_v24  ;;  %6093 = vmatprep.subr.bf16.mxu1 %v7574_v50  ;;  %v5853_v24 = vld [vmem:[#allocation3 + $0x98] sm:$0xff] }
 0xee8   : > { %6053 = vmatpush1.bf16.msra.mxu0 %v7569_v11  ;;  %6094 = vmatpush1.bf16.msra.mxu1 %v7572_v1 }
 0xee9   : > { %6054 = vmatprep.subr.bf16.mxu0 %v7577_v4  ;;  %6095 = vmatprep.subr.bf16.mxu1 %v7580_v15 }
 0xeec   : > { %6055 = vmatpush1.bf16.msra.mxu0 %v7575_v27  ;;  %6096 = vmatpush1.bf16.msra.mxu1 %v7578_v28 }
 0xeed   : > { %6056 = vmatprep.subr.bf16.mxu0 %v7583_v14  ;;  %6097 = vmatprep.subr.bf16.mxu1 %v7586_v42 }
 0xef0   : > { %6057 = vmatpush1.bf16.msra.mxu0 %v7581_v29  ;;  %6098 = vmatpush1.bf16.msra.mxu1 %v7584_v48 }
 0xef1   : > { %6058 = vmatprep.subr.bf16.mxu0 %v9306_v38  ;;  %6099 = vmatprep.subr.bf16.mxu1 %v9312_v49 }
 0xef4   : > { %6059 = vmatpush1.bf16.msra.mxu0 %v9303_v55  ;;  %6100 = vmatpush1.bf16.msra.mxu1 %v9309_v39 }
 0xef5   : > { %6060 = vmatprep.subr.bf16.mxu0 %v9315_v31  ;;  %6101 = vmatprep.subr.bf16.mxu1 %v9319_v62  ;;  %v5542_v62 = vld [vmem:[#allocation3 + $0x10] sm:$0xff] }
 0xef8   : > { %6061 = vmatpush1.bf16.msra.mxu0 %v9324_v8  ;;  %6102 = vmatpush1.bf16.msra.mxu1 %v9329_v7  ;;  %v5543_v7 = vld [vmem:[#allocation3 + $0x28] sm:$0xff] }
 0xf9a   : > { %v5770_v12 = vpop.f32.mrf.mxu0  ;;  %v5811_v13 = vpop.f32.mrf.mxu1 }
 0xf9b   : > { %v5818_v60 = vadd.f32 %v5770_v12, %v5540_v6  ;;  %v5820_v8 = vadd.f32 %v5811_v13, %v5542_v62 }
 0xf9c   : > { %v5772_v38 = vpop.f32.mrf.mxu0  ;;  %v5813_v37 = vpop.f32.mrf.mxu1 }
 0xf9d   : > { %v6966_v49 = vmul.f32 -1.442695, %v5818_v60  ;;  %v5819_v9 = vadd.f32 %v5772_v38, %v5541_v36  ;;  %v6968_v47 = vmul.f32 -1.442695, %v5820_v8  ;;  %v5821_v56 = vadd.f32 %v5813_v37, %v5543_v7 }
 0xf9e   : > { %v5774_v55 = vpop.f32.mrf.mxu0  ;;  %v5815_v43 = vpop.f32.mrf.mxu1 }
 0xf9f   : > { %7683 = vpow2.f32 %v6966_v49  ;;  %v6967_v39 = vmul.f32 -1.442695, %v5819_v9 }
 0xfa0   : > { %v5775_v31 = vpop.f32.mrf.mxu0  ;;  %v5816_v3 = vpop.f32.mrf.mxu1 }
 0xfa1   : > { %7685 = vpow2.f32 %v6967_v39 }
 0xfa2   : > { %7687 = vpow2.f32 %v6968_v47 }
 0xfac   : > { %v7684_v61 = vpop.eup %7683 }
 0xfad   : > { %v5831_v51 = vadd.f32 1.0, %v7684_v61 }
 0xfae   : > { %v7686_v10 = vpop.eup %7685 }
 0xfaf   : > { %7689 = vrcp.f32 %v5831_v51  ;;  %v5832_v57 = vadd.f32 1.0, %v7686_v10  ;;  %v7688_v18 = vpop.eup %7687 }
 0xfb0   : > { %7691 = vtanh.f32 %v5821_v56  ;;  %v5833_v46 = vadd.f32 1.0, %v7688_v18 }
 0xfb1   : > { %7693 = vrcp.f32 %v5832_v57 }
 0xfb2   : > { %7695 = vrcp.f32 %v5833_v46 }
 0xfbc   : > { %v7690_v58 = vpop.eup %7689 }
 0xfbd   : > { %v7692_v17 = vpop.eup %7691 }
 0xfbe   : > { %v7694_v59 = vpop.eup %7693  ;;  %v5842_v21 = vmul.f32 %v7692_v17, %v7690_v58 }
 0xfbf   : > { %v5841_v26 = vmul.f32 %v7694_v59, %v9415_v63  ;;  %v7696_v20 = vpop.eup %7695 }
 0xfc1   : > { %v5843_v32 = vadd.f32 %v5842_v21, %v5841_v26 }
 0xfc3   : > { %7697 = vtanh.f32 %v5843_v32 }
 0xfd0   : > { %v7698_v22 = vpop.eup %7697 }
 0xfd1   : > { %v5845_v16 = vmul.f32 %v7698_v22, %v7696_v20 }
 0xfd3   : > { %v5846_v25 = vpack.c.bf16 %v5845_v16, %v5845_v16 }
 0xfd5   : > { %5848 = vst [vmem:[#allocation2 + $0x18] sm:$0xf] %v5846_v25  ;;  %6079 = vmatmul.mubr.bf16.vlgmr.msra.gmra.mxu0 %v5846_v25  ;;  %6120 = vmatmul.mubr.bf16.vlgmr.msra.gmra.mxu1 %v5846_v25 }
0x1095   : > { %v6080_v0 = vpop.f32.mrf.mxu0  ;;  %v6121_v30 = vpop.f32.mrf.mxu1 }
0x1096   : > { %v6128_v19 = vadd.f32 %v6080_v0, %v5850_v44  ;;  %v6130_v5 = vadd.f32 %v6121_v30, %v5852_v2 }
0x1097   : > { %v6082_v45 = vpop.f32.mrf.mxu0  ;;  %v6123_v54 = vpop.f32.mrf.mxu1 }
0x1098   : > { %v7001_v33 = vmul.f32 -1.442695, %v6128_v19  ;;  %v6129_v63 = vadd.f32 %v6082_v45, %v5851_v52  ;;  %v7003_v35 = vmul.f32 -1.442695, %v6130_v5  ;;  %v6131_v11 = vadd.f32 %v6123_v54, %v5853_v24 }
0x1099   : > { %v6084_v53 = vpop.f32.mrf.mxu0  ;;  %v6125_v23 = vpop.f32.mrf.mxu1 }
0x109a   : > { %7699 = vpow2.f32 %v7001_v33  ;;  %v7002_v41 = vmul.f32 -1.442695, %v6129_v63 }
0x109b   : > { %v6085_v34 = vpop.f32.mrf.mxu0  ;;  %v6126_v40 = vpop.f32.mrf.mxu1 }
0x109c   : > { %7701 = vpow2.f32 %v7002_v41 }
0x109d   : > { %7703 = vpow2.f32 %v7003_v35 }
0x10a7   : > { %v7700_v50 = vpop.eup %7699 }
0x10a8   : > { %v6141_v1 = vadd.f32 1.0, %v7700_v50 }
0x10a9   : > { %v7702_v4 = vpop.eup %7701 }
0x10aa   : > { %7705 = vrcp.f32 %v6141_v1  ;;  %v6142_v15 = vadd.f32 1.0, %v7702_v4  ;;  %v7704_v27 = vpop.eup %7703 }
0x10ab   : > { %7707 = vtanh.f32 %v6131_v11  ;;  %v6143_v29 = vadd.f32 1.0, %v7704_v27 }
0x10ac   : > { %7709 = vrcp.f32 %v6142_v15 }
0x10ad   : > { %7711 = vrcp.f32 %v6143_v29 }
0x10b7   : > { %v7706_v28 = vpop.eup %7705 }
0x10b8   : > { %v7708_v14 = vpop.eup %7707 }
0x10b9   : > { %v7710_v42 = vpop.eup %7709  ;;  %v6152_v6 = vmul.f32 %v7708_v14, %v7706_v28 }
0x10ba   : > { %v6151_v48 = vmul.f32 %v7710_v42, %v5843_v32  ;;  %v7712_v13 = vpop.eup %7711 }
0x10bc   : > { %v6153_v12 = vadd.f32 %v6152_v6, %v6151_v48 }
0x10be   : > { %7713 = vtanh.f32 %v6153_v12  ;;  %6160 = vst [vmem:[%s8207_s8] sm:$0xff] %v6153_v12 }
0x10cb   : > { %v7714_v60 = vpop.eup %7713 }
0x10cc   : > { %v6155_v36 = vmul.f32 %v7714_v60, %v7712_v13 }
0x10ce   : > { %v6156_v38 = vpack.c.bf16 %v6155_v36, %v6155_v36  ;;  %6159 = vst [vmem:[%s8205_s23] sm:$0xff] %v6155_v36 }
0x10d0   : > { %6158 = vst [vmem:[#allocation2 + $0x1c] sm:$0xf] %v6156_v38 }
0x10d1 PF: > { %s7006_s28 = sshll.u32 %s8073_s24, 7  ;;  %s6180_s30 = sshll.u32 %s8205_s23, 4  ;;  %s6181_s30 = int_to_ptr.vmem [resolvable:$true] %s6180_s30 }
0x10d2   : > { %s6178_s2 = scalar_lea.hbm %s9516_s4, %s7006_s28  ;;  %s6162_s15 = scalar_lea.sflag [#allocation6], %s8185_s21 }
0x10d3   : > { %s7825_s6 = scalar_lea.vmem %s6181_s30, 128  ;;  %p9563_p4 = scmp.ne.s32.totalorder %s9546_s29, 0 }
0x10d4   : > { %p7826_p11 = scmp.ne.s32.totalorder %s6181_s30, %s7825_s6  ;;  %s7939_s27 = smov [#allocation12]  }
0x10d5   : > { %s7829_s1 = sshll.u32 %s7939_s27, 4  ;;  %s7830_s1 = int_to_ptr.vmem [resolvable:$false] %s7829_s1 }
0x10d6   : > { %p7827_p13 = pnand %p7826_p11, %p9563_p4  ;;  %s7831_s14 = scalar_lea.vmem %s7830_s1, 256 }
0x10d7   : > { %p7832_p1 = scmp.lt.s32.totalorder %s6181_s30, %s7830_s1  ;;  %p7833_p0 = scmp.lt.s32.totalorder %s7831_s14, %s7825_s6 }
0x10d8   : > { %p7828_p5 = pneg %p7827_p13 }
0x10d9   : > { %p7834_p3 = por %p7833_p0, %p7832_p1 }
0x10db   : > { %p7835_p12 = pnand %p7834_p3, %p7828_p5 }
0x10dd   : > { %7838 = shalt.err (!%p7835_p12)
}
0x10de   : > { %s7839_s20 = scalar_lea.hbm %s6178_s2, 128  ;;  %s7843_s10 = scalar_lea.hbm %s9516_s4, 256 }
0x10df   : > { %p7840_p7 = scmp.ne.s32.totalorder %s6178_s2, %s7839_s20  ;;  %p7844_p6 = scmp.lt.s32.totalorder %s6178_s2, %s9516_s4 }
0x10e0   : > { %p7845_p2 = scmp.lt.s32.totalorder %s7843_s10, %s7839_s20 }
0x10e1   : > { %p7841_p9 = pnand %p7840_p7, %p9563_p4 }
0x10e2   : > { %p7846_p10 = por %p7845_p2, %p7844_p6 }
0x10e3   : > { %p7842_p8 = pneg %p7841_p9 }
0x10e5   : > { %p7847_p11 = pnand %p7846_p10, %p7842_p8 }
0x10e7   : > { %7850 = shalt.err (!%p7847_p11)
}
0x10e8   : > { %7023 = dma.vmem_to_hbm [thread:$0]  (%p9563_p4), %s6181_s30, 128, %s6178_s2, %s6162_s15  }
0x10e9   : > { %s6191_s16 = scalar_lea.hbm %s9517_s5, %s7006_s28  ;;  %s6193_s23 = sshll.u32 %s8207_s8, 4  ;;  %s6194_s23 = int_to_ptr.vmem [resolvable:$true] %s6193_s23 }
0x10ea   : > { %s6167_s12 = scalar_lea.sflag [#allocation14], %s8185_s21  ;;  %s7851_s26 = scalar_lea.vmem %s6194_s23, 128 }
0x10eb   : > { %p7852_p13 = scmp.ne.s32.totalorder %s6194_s23, %s7851_s26  ;;  %s7940_s6 = smov [#allocation13]  }
0x10ec   : > { %s7855_s27 = sshll.u32 %s7940_s6, 4  ;;  %s7856_s27 = int_to_ptr.vmem [resolvable:$false] %s7855_s27 }
0x10ed   : > { %p7853_p5 = pnand %p7852_p13, %p9563_p4  ;;  %s7857_s1 = scalar_lea.vmem %s7856_s27, 256 }
0x10ee   : > { %p7858_p0 = scmp.lt.s32.totalorder %s6194_s23, %s7856_s27  ;;  %p7859_p3 = scmp.lt.s32.totalorder %s7857_s1, %s7851_s26 }
0x10ef   : > { %p7854_p1 = pneg %p7853_p5 }
0x10f0   : > { %p7860_p12 = por %p7859_p3, %p7858_p0 }
0x10f2   : > { %p7861_p7 = pnand %p7860_p12, %p7854_p1 }
0x10f4   : > { %7864 = shalt.err (!%p7861_p7)
}
0x10f5   : > { %s7865_s24 = scalar_lea.hbm %s6191_s16, 128  ;;  %s7869_s28 = scalar_lea.hbm %s9517_s5, 256 }
0x10f6   : > { %p7866_p9 = scmp.ne.s32.totalorder %s6191_s16, %s7865_s24  ;;  %p7870_p2 = scmp.lt.s32.totalorder %s6191_s16, %s9517_s5 }
0x10f7   : > { %p7871_p10 = scmp.lt.s32.totalorder %s7869_s28, %s7865_s24 }
0x10f8   : > { %p7867_p8 = pnand %p7866_p9, %p9563_p4 }
0x10f9   : > { %p7872_p11 = por %p7871_p10, %p7870_p2 }
0x10fa   : > { %p7868_p6 = pneg %p7867_p8 }
0x10fc   : > { %p7873_p13 = pnand %p7872_p11, %p7868_p6 }
0x10fe   : > { %7876 = shalt.err (!%p7873_p13)
}
0x10ff   : > { %7024 = dma.vmem_to_hbm [thread:$0]  (%p9563_p4), %s6194_s23, 128, %s6191_s16, %s6167_s12  }
0x1100 PF: > { %s9564_s15 = sld [smem:[#allocation21_spill]]  ;;  %s6205_s14 = sand.u32 1, %s7915_s18  }
0x1101   : > { %p9565_p5 = scmp.ne.s32.totalorder %s9547_s7, 0  ;;  %s6206_s20 = scalar_lea.sflag [#allocation6], %s6205_s14 }
0x1106   : > { %p9566_p1 = scmp.ge.s32.totalorder %s9564_s15, 2 }
0x1108   : > { %p7042_p0 = pnand %p9566_p1, %p9565_p5 }
0x110a   : > { %p7043_p3 = pneg %p7042_p0 }
0x110c   : > { %7906 = dma.done.wait (%p7043_p3), %s6206_s20, 128  }
0x110d   : > { %7908 = vsyncadd (%p7043_p3), %s6206_s20, 4294967168  ;;  %s6215_s22 = scalar_lea.sflag [#allocation14], %s6205_s14 }
0x110e   : > { %7910 = dma.done.wait (%p7043_p3), %s6215_s22, 128  }
0x110f   : > { %7912 = vsyncadd (%p7043_p3), %s6215_s22, 4294967168  ;;  %s9567_s21 = sld [smem:[#allocation22_spill]]  ;;  %s9570_s18 = smov %s7919_s19 }
0x1110   : > { %s9568_s25 = sld [smem:[#allocation20_spill]] }
0x1111   : > { %s9569_s20 = sld [smem:[#allocation23_spill]] }
0x1115   : > { %p26_p4 = scmp.ge.s32.totalorder %s9567_s21, 4  }
0x1116   : > { %s9571_s19 = smov %s9568_s25 }
0x1117   :  { %28 = sbr.rel (!%p26_p4) target bundleno = 13 (0xd), region = 163 }
0x111c   :  { %6220 = vsyncpa [#allocation5], 1 }
0x111d   :  { %6222 = vsyncpa [#allocation5 + $0x1], 1 }
0x111e   :  { %6223 = vsyncpa [#allocation8], 1 }
0x111f   :  { %6225 = vsyncpa [#allocation8 + $0x1], 1 }
0x1120   :  { %6226 = vsyncpa [#allocation11], 1 }
0x1121   :  { %6228 = vsyncpa [#allocation11 + $0x1], 1 }
0x1122   :  { %6229 = vsyncpa [#allocation6], 1 }
0x1123   :  { %6231 = vsyncpa [#allocation6 + $0x1], 1 }
0x1124   :  { %6232 = vsyncpa [#allocation14], 1 }
0x1125   :  { %6234 = vsyncpa [#allocation14 + $0x1], 1 }

</bundles_post_ra>
